<compile_context>
chip_gen: v7x
topology: tpu7x:2x2x1
jax: 0.10.0
libtpu: 0.0.40
codegen_flags: <defaults>
</compile_context>

<pallas_src>
import jax
import jax.numpy as jnp
from jax.experimental import pallas as pl
from jax.experimental.pallas import tpu as pltpu

X_DIM = 28 * 28            # 784
H1, H2 = 400, 200
Z_DIM = 16
DROP_P = 0.2

# lane-padded feature dims
X_PAD = 896                # 7 * 128
H1_PAD = 512
H2_PAD = 256
N_STATS = 3 * Z_DIM + 2    # [z | mean | logvar | kl_row | rec_row]


def vae_kernel(x_ref, eps_ref, mask_ref,
               w_e1, b_e1, w_e2, b_e2, w_mv, b_mv,
               w_d1, b_d1, w_d2, b_d2, w_d3, b_d3,
               y_ref, stats_ref):
    f32 = jnp.float32
    bf16 = jnp.bfloat16

    x = x_ref[...]                                    # [TB, X_PAD] f32 (kept for loss)
    xb = x.astype(bf16)

    # ---- encoder ----
    h = jnp.dot(xb, w_e1[...], preferred_element_type=f32) + b_e1[...]
    h = jnp.maximum(h, 0.0).astype(bf16)
    h = jnp.dot(h, w_e2[...], preferred_element_type=f32) + b_e2[...]
    h = jnp.maximum(h, 0.0).astype(bf16)

    # fused mean/logvar head: [TB, 2*Z] = [mean | logvar]
    mv = jnp.dot(h, w_mv[...], preferred_element_type=f32) + b_mv[...]
    mean = mv[:, :Z_DIM]
    logvar = mv[:, Z_DIM:]

    # ---- reparameterization: z = mean + eps * exp(0.5 * logvar) (f32) ----
    z = mean + eps_ref[...] * jnp.exp(0.5 * logvar)

    # ---- decoder ----
    d = jnp.dot(z.astype(bf16), w_d1[...], preferred_element_type=f32) + b_d1[...]
    d = jnp.maximum(d, 0.0).astype(bf16)
    d = jnp.dot(d, w_d2[...], preferred_element_type=f32) + b_d2[...]
    d = jnp.maximum(d, 0.0).astype(bf16) * mask_ref[...]   # dropout (mask pre-scaled by 1/(1-p))
    logits = jnp.dot(d, w_d3[...], preferred_element_type=f32) + b_d3[...]  # [TB, X_PAD] f32

    y_ref[...] = jax.nn.sigmoid(logits)

    # ---- per-row losses (f32) ----
    # KL_row = 0.5 * sum_z(1 + logvar - mean^2 - exp(logvar))
    kl_row = 0.5 * jnp.sum(1.0 + logvar - mean * mean - jnp.exp(logvar),
                           axis=-1, keepdims=True)                       # [TB, 1]
    # reconstruction = -BCE(sum) from logits: x*l - softplus(l), masked on real lanes
    softplus = jnp.maximum(logits, 0.0) + jnp.log(1.0 + jnp.exp(-jnp.abs(logits)))
    lane = jax.lax.broadcasted_iota(jnp.int32, logits.shape, 1)
    valid = (lane < X_DIM).astype(f32)
    rec_row = jnp.sum((x * logits - softplus) * valid,
                      axis=-1, keepdims=True)                            # [TB, 1]

    # single lane-dense packed store: [z | mean | logvar | kl_row | rec_row]
    stats_ref[...] = jnp.concatenate([z, mv, kl_row, rec_row], axis=-1)


def init_params(key):
    """Deterministic synthetic parameters (PyTorch Linear-style init).

    Weights stored as [in, out], biases as [1, out], all f32 and unpadded.
    """
    dims = [
        ("enc_fc1", X_DIM, H1),
        ("enc_fc2", H1, H2),
        ("enc_fc3_mean", H2, Z_DIM),
        ("enc_fc3_logvar", H2, Z_DIM),
        ("dec_fc1", Z_DIM, H2),
        ("dec_fc2", H2, H1),
        ("dec_fc3", H1, X_DIM),
    ]
    params = {}
    for name, din, dout in dims:
        key, kw, kb = jax.random.split(key, 3)
        bound = 1.0 / (float(din) ** 0.5)
        params[name + "_w"] = jax.random.uniform(
            kw, (din, dout), jnp.float32, -bound, bound)
        params[name + "_b"] = jax.random.uniform(
            kb, (1, dout), jnp.float32, -bound, bound)
    return params


def prepare_params(params):
    """Pad to lane multiples, fuse mean/logvar head, cast weights to bf16."""
    def padw(w, rows, cols):
        out = jnp.zeros((rows, cols), jnp.float32)
        out = out.at[:w.shape[0], :w.shape[1]].set(w)
        return out.astype(jnp.bfloat16)

    def padb(b, cols):
        out = jnp.zeros((1, cols), jnp.float32)
        return out.at[:, :b.shape[1]].set(b)

    w_mv = jnp.concatenate(
        [params["enc_fc3_mean_w"], params["enc_fc3_logvar_w"]], axis=1)
    b_mv = jnp.concatenate(
        [params["enc_fc3_mean_b"], params["enc_fc3_logvar_b"]], axis=1)

    return [
        (padw(params["enc_fc1_w"], X_PAD, H1_PAD), padb(params["enc_fc1_b"], H1_PAD)),
        (padw(params["enc_fc2_w"], H1_PAD, H2_PAD), padb(params["enc_fc2_b"], H2_PAD)),
        (padw(w_mv, H2_PAD, 2 * Z_DIM), padb(b_mv, 2 * Z_DIM)),
        (padw(params["dec_fc1_w"], Z_DIM, H2_PAD), padb(params["dec_fc1_b"], H2_PAD)),
        (padw(params["dec_fc2_w"], H2_PAD, H1_PAD), padb(params["dec_fc2_b"], H1_PAD)),
        (padw(params["dec_fc3_w"], H1_PAD, X_PAD), padb(params["dec_fc3_b"], X_PAD)),
    ]


def vae_forward(x, eps, drop_mask, params, *, batch_block=128):
    """x:[B,784] f32, eps:[B,Z] f32, drop_mask:[B,400] f32 (pre-scaled by 1/(1-p))."""
    B = x.shape[0]
    TB = min(batch_block, B)
    assert B % TB == 0, "batch must be a multiple of the batch tile"
    grid = (B // TB,)

    xp = jnp.pad(x.astype(jnp.float32), ((0, 0), (0, X_PAD - X_DIM)))
    maskp = jnp.pad(drop_mask.astype(jnp.float32),
                    ((0, 0), (0, H1_PAD - H1))).astype(jnp.bfloat16)
    eps = eps.astype(jnp.float32)

    weight_bias = prepare_params(params)

    def act_spec(feat):
        return pl.BlockSpec((TB, feat), lambda i: (i, 0))

    def res_spec(shape):
        return pl.BlockSpec(shape, lambda i: (0, 0))

    in_specs = [act_spec(X_PAD), act_spec(Z_DIM), act_spec(H1_PAD)]
    args = [xp, eps, maskp]
    for w, b in weight_bias:
        in_specs += [res_spec(w.shape), res_spec(b.shape)]
        args += [w, b]

    out_specs = (act_spec(X_PAD), act_spec(N_STATS))
    out_shape = (
        jax.ShapeDtypeStruct((B, X_PAD), jnp.float32),    # y (padded)
        jax.ShapeDtypeStruct((B, N_STATS), jnp.float32),  # packed stats
    )

    y_pad, stats = pl.pallas_call(
        vae_kernel,
        grid=grid,
        in_specs=in_specs,
        out_specs=out_specs,
        out_shape=out_shape,
        compiler_params=pltpu.CompilerParams(
            dimension_semantics=("parallel",),
            vmem_limit_bytes=24 << 20),
    )(*args)

    y = y_pad[:, :X_DIM]
    z = stats[:, :Z_DIM]
    mean = stats[:, Z_DIM:2 * Z_DIM]
    logvar = stats[:, 2 * Z_DIM:3 * Z_DIM]
    kl = jnp.sum(stats[:, 3 * Z_DIM])
    rec = jnp.sum(stats[:, 3 * Z_DIM + 1])
    return [kl, rec], z, y, mean, logvar


if __name__ == "__main__":
    key = jax.random.PRNGKey(0)
    kparam, kx, keps, kdrop = jax.random.split(key, 4)

    params = init_params(kparam)

    B = 16
    # x plays the role of flattened MNIST pixels in [0, 1]
    x = jax.random.uniform(kx, (B, X_DIM), jnp.float32, 0.0, 1.0)
    eps = jax.random.normal(keps, (B, Z_DIM), jnp.float32)
    keep = jax.random.bernoulli(kdrop, 1.0 - DROP_P, (B, H1))
    drop_mask = keep.astype(jnp.float32) / (1.0 - DROP_P)

    # small batch tile (8) -> grid of 2 to exercise the batch grid; use 128/256
    # for real workloads.
    (kl, rec), z, y, mean, logvar = vae_forward(
        x, eps, drop_mask, params, batch_block=8)
    jax.block_until_ready((kl, rec, z, y, mean, logvar))

    assert y.shape == (B, X_DIM) and z.shape == (B, Z_DIM)
    assert mean.shape == (B, Z_DIM) and logvar.shape == (B, Z_DIM)
    assert bool(jnp.isfinite(kl)) and bool(jnp.isfinite(rec))
    assert bool(jnp.all((y >= 0.0) & (y <= 1.0)))
    print("KERNEL_OK")
</pallas_src>

<mosaic_0001>
module attributes {stable_mosaic.version = 11 : i64} {
  func.func @vae_kernel(%arg0: i32, %arg1: memref<8x896xf32, #tpu.memory_space<vmem>>, %arg2: memref<8x16xf32, #tpu.memory_space<vmem>>, %arg3: memref<8x512xbf16, #tpu.memory_space<vmem>>, %arg4: memref<896x512xbf16, #tpu.memory_space<vmem>>, %arg5: memref<1x512xf32, #tpu.memory_space<vmem>>, %arg6: memref<512x256xbf16, #tpu.memory_space<vmem>>, %arg7: memref<1x256xf32, #tpu.memory_space<vmem>>, %arg8: memref<256x32xbf16, #tpu.memory_space<vmem>>, %arg9: memref<1x32xf32, #tpu.memory_space<vmem>>, %arg10: memref<16x256xbf16, #tpu.memory_space<vmem>>, %arg11: memref<1x256xf32, #tpu.memory_space<vmem>>, %arg12: memref<256x512xbf16, #tpu.memory_space<vmem>>, %arg13: memref<1x512xf32, #tpu.memory_space<vmem>>, %arg14: memref<512x896xbf16, #tpu.memory_space<vmem>>, %arg15: memref<1x896xf32, #tpu.memory_space<vmem>>, %arg16: memref<8x896xf32, #tpu.memory_space<vmem>>, %arg17: memref<8x50xf32, #tpu.memory_space<vmem>>) attributes {dimension_semantics = [#tpu.dimension_semantics<parallel>], iteration_bounds = array<i64: 2>, scalar_prefetch = 0 : i64, scratch_operands = 0 : i64, tpu.core_type = #tpu.core_type<tc>, window_params = [{transform_indices = @transform_0, window_bounds = array<i64: 8, 896>}, {transform_indices = @transform_1, window_bounds = array<i64: 8, 16>}, {transform_indices = @transform_2, window_bounds = array<i64: 8, 512>}, {pipeline_mode = #tpu.pipeline_mode<synchronous>, transform_indices = @transform_3, window_bounds = array<i64: 896, 512>}, {pipeline_mode = #tpu.pipeline_mode<synchronous>, transform_indices = @transform_4, window_bounds = array<i64: 1, 512>}, {pipeline_mode = #tpu.pipeline_mode<synchronous>, transform_indices = @transform_5, window_bounds = array<i64: 512, 256>}, {pipeline_mode = #tpu.pipeline_mode<synchronous>, transform_indices = @transform_6, window_bounds = array<i64: 1, 256>}, {pipeline_mode = #tpu.pipeline_mode<synchronous>, transform_indices = @transform_7, window_bounds = array<i64: 256, 32>}, {pipeline_mode = #tpu.pipeline_mode<synchronous>, transform_indices = @transform_8, window_bounds = array<i64: 1, 32>}, {pipeline_mode = #tpu.pipeline_mode<synchronous>, transform_indices = @transform_9, window_bounds = array<i64: 16, 256>}, {pipeline_mode = #tpu.pipeline_mode<synchronous>, transform_indices = @transform_10, window_bounds = array<i64: 1, 256>}, {pipeline_mode = #tpu.pipeline_mode<synchronous>, transform_indices = @transform_11, window_bounds = array<i64: 256, 512>}, {pipeline_mode = #tpu.pipeline_mode<synchronous>, transform_indices = @transform_12, window_bounds = array<i64: 1, 512>}, {pipeline_mode = #tpu.pipeline_mode<synchronous>, transform_indices = @transform_13, window_bounds = array<i64: 512, 896>}, {pipeline_mode = #tpu.pipeline_mode<synchronous>, transform_indices = @transform_14, window_bounds = array<i64: 1, 896>}, {transform_indices = @transform_15, window_bounds = array<i64: 8, 896>}, {transform_indices = @transform_16, window_bounds = array<i64: 8, 50>}]} {
    %c0 = arith.constant 0 : index
    %c0_0 = arith.constant 0 : index
    %0 = vector.load %arg1[%c0, %c0_0] : memref<8x896xf32, #tpu.memory_space<vmem>>, vector<8x896xf32>
    %1 = arith.truncf %0 : vector<8x896xf32> to vector<8x896xbf16>
    %c0_1 = arith.constant 0 : index
    %c0_2 = arith.constant 0 : index
    %2 = vector.load %arg4[%c0_1, %c0_2] : memref<896x512xbf16, #tpu.memory_space<vmem>>, vector<896x512xbf16>
    %cst = arith.constant dense<0.000000e+00> : vector<8x512xf32>
    %3 = tpu.matmul %1, %2, %cst {dimension_numbers = #tpu.dot_dimension_numbers<[1], [0], [0], [1], [0, 0, 1, 1], [], []>} : vector<8x896xbf16>, vector<896x512xbf16>, vector<8x512xf32> -> vector<8x512xf32>
    %c0_3 = arith.constant 0 : index
    %c0_4 = arith.constant 0 : index
    %4 = vector.load %arg5[%c0_3, %c0_4] : memref<1x512xf32, #tpu.memory_space<vmem>>, vector<1x512xf32>
    %5 = vector.broadcast %4 : vector<1x512xf32> to vector<8x512xf32>
    %6 = arith.addf %3, %5 : vector<8x512xf32>
    %cst_5 = arith.constant 0.000000e+00 : f32
    %7 = vector.broadcast %cst_5 : f32 to vector<8x512xf32>
    %8 = arith.maximumf %6, %7 : vector<8x512xf32>
    %9 = arith.truncf %8 : vector<8x512xf32> to vector<8x512xbf16>
    %c0_6 = arith.constant 0 : index
    %c0_7 = arith.constant 0 : index
    %10 = vector.load %arg6[%c0_6, %c0_7] : memref<512x256xbf16, #tpu.memory_space<vmem>>, vector<512x256xbf16>
    %cst_8 = arith.constant dense<0.000000e+00> : vector<8x256xf32>
    %11 = tpu.matmul %9, %10, %cst_8 {dimension_numbers = #tpu.dot_dimension_numbers<[1], [0], [0], [1], [0, 0, 1, 1], [], []>} : vector<8x512xbf16>, vector<512x256xbf16>, vector<8x256xf32> -> vector<8x256xf32>
    %c0_9 = arith.constant 0 : index
    %c0_10 = arith.constant 0 : index
    %12 = vector.load %arg7[%c0_9, %c0_10] : memref<1x256xf32, #tpu.memory_space<vmem>>, vector<1x256xf32>
    %13 = vector.broadcast %12 : vector<1x256xf32> to vector<8x256xf32>
    %14 = arith.addf %11, %13 : vector<8x256xf32>
    %cst_11 = arith.constant 0.000000e+00 : f32
    %15 = vector.broadcast %cst_11 : f32 to vector<8x256xf32>
    %16 = arith.maximumf %14, %15 : vector<8x256xf32>
    %17 = arith.truncf %16 : vector<8x256xf32> to vector<8x256xbf16>
    %c0_12 = arith.constant 0 : index
    %c0_13 = arith.constant 0 : index
    %18 = vector.load %arg8[%c0_12, %c0_13] : memref<256x32xbf16, #tpu.memory_space<vmem>>, vector<256x32xbf16>
    %cst_14 = arith.constant dense<0.000000e+00> : vector<8x32xf32>
    %19 = tpu.matmul %17, %18, %cst_14 {dimension_numbers = #tpu.dot_dimension_numbers<[1], [0], [0], [1], [0, 0, 1, 1], [], []>} : vector<8x256xbf16>, vector<256x32xbf16>, vector<8x32xf32> -> vector<8x32xf32>
    %c0_15 = arith.constant 0 : index
    %c0_16 = arith.constant 0 : index
    %20 = vector.load %arg9[%c0_15, %c0_16] : memref<1x32xf32, #tpu.memory_space<vmem>>, vector<1x32xf32>
    %21 = vector.broadcast %20 : vector<1x32xf32> to vector<8x32xf32>
    %22 = arith.addf %19, %21 : vector<8x32xf32>
    %23 = vector.extract_strided_slice %22 {offsets = [0, 0], sizes = [8, 16], strides = [1, 1]} : vector<8x32xf32> to vector<8x16xf32>
    %24 = vector.extract_strided_slice %22 {offsets = [0, 16], sizes = [8, 16], strides = [1, 1]} : vector<8x32xf32> to vector<8x16xf32>
    %c0_17 = arith.constant 0 : index
    %c0_18 = arith.constant 0 : index
    %25 = vector.load %arg2[%c0_17, %c0_18] : memref<8x16xf32, #tpu.memory_space<vmem>>, vector<8x16xf32>
    %cst_19 = arith.constant 5.000000e-01 : f32
    %26 = vector.broadcast %cst_19 : f32 to vector<8x16xf32>
    %27 = arith.mulf %26, %24 : vector<8x16xf32>
    %28 = math.exp %27 : vector<8x16xf32>
    %29 = arith.mulf %25, %28 : vector<8x16xf32>
    %30 = arith.addf %23, %29 : vector<8x16xf32>
    %31 = arith.truncf %30 : vector<8x16xf32> to vector<8x16xbf16>
    %c0_20 = arith.constant 0 : index
    %c0_21 = arith.constant 0 : index
    %32 = vector.load %arg10[%c0_20, %c0_21] : memref<16x256xbf16, #tpu.memory_space<vmem>>, vector<16x256xbf16>
    %cst_22 = arith.constant dense<0.000000e+00> : vector<8x256xf32>
    %33 = tpu.matmul %31, %32, %cst_22 {dimension_numbers = #tpu.dot_dimension_numbers<[1], [0], [0], [1], [0, 0, 1, 1], [], []>} : vector<8x16xbf16>, vector<16x256xbf16>, vector<8x256xf32> -> vector<8x256xf32>
    %c0_23 = arith.constant 0 : index
    %c0_24 = arith.constant 0 : index
    %34 = vector.load %arg11[%c0_23, %c0_24] : memref<1x256xf32, #tpu.memory_space<vmem>>, vector<1x256xf32>
    %35 = vector.broadcast %34 : vector<1x256xf32> to vector<8x256xf32>
    %36 = arith.addf %33, %35 : vector<8x256xf32>
    %cst_25 = arith.constant 0.000000e+00 : f32
    %37 = vector.broadcast %cst_25 : f32 to vector<8x256xf32>
    %38 = arith.maximumf %36, %37 : vector<8x256xf32>
    %39 = arith.truncf %38 : vector<8x256xf32> to vector<8x256xbf16>
    %c0_26 = arith.constant 0 : index
    %c0_27 = arith.constant 0 : index
    %40 = vector.load %arg12[%c0_26, %c0_27] : memref<256x512xbf16, #tpu.memory_space<vmem>>, vector<256x512xbf16>
    %cst_28 = arith.constant dense<0.000000e+00> : vector<8x512xf32>
    %41 = tpu.matmul %39, %40, %cst_28 {dimension_numbers = #tpu.dot_dimension_numbers<[1], [0], [0], [1], [0, 0, 1, 1], [], []>} : vector<8x256xbf16>, vector<256x512xbf16>, vector<8x512xf32> -> vector<8x512xf32>
    %c0_29 = arith.constant 0 : index
    %c0_30 = arith.constant 0 : index
    %42 = vector.load %arg13[%c0_29, %c0_30] : memref<1x512xf32, #tpu.memory_space<vmem>>, vector<1x512xf32>
    %43 = vector.broadcast %42 : vector<1x512xf32> to vector<8x512xf32>
    %44 = arith.addf %41, %43 : vector<8x512xf32>
    %cst_31 = arith.constant 0.000000e+00 : f32
    %45 = vector.broadcast %cst_31 : f32 to vector<8x512xf32>
    %46 = arith.maximumf %44, %45 : vector<8x512xf32>
    %47 = arith.truncf %46 : vector<8x512xf32> to vector<8x512xbf16>
    %c0_32 = arith.constant 0 : index
    %c0_33 = arith.constant 0 : index
    %48 = vector.load %arg3[%c0_32, %c0_33] : memref<8x512xbf16, #tpu.memory_space<vmem>>, vector<8x512xbf16>
    %49 = arith.mulf %47, %48 : vector<8x512xbf16>
    %c0_34 = arith.constant 0 : index
    %c0_35 = arith.constant 0 : index
    %50 = vector.load %arg14[%c0_34, %c0_35] : memref<512x896xbf16, #tpu.memory_space<vmem>>, vector<512x896xbf16>
    %cst_36 = arith.constant dense<0.000000e+00> : vector<8x896xf32>
    %51 = tpu.matmul %49, %50, %cst_36 {dimension_numbers = #tpu.dot_dimension_numbers<[1], [0], [0], [1], [0, 0, 1, 1], [], []>} : vector<8x512xbf16>, vector<512x896xbf16>, vector<8x896xf32> -> vector<8x896xf32>
    %c0_37 = arith.constant 0 : index
    %c0_38 = arith.constant 0 : index
    %52 = vector.load %arg15[%c0_37, %c0_38] : memref<1x896xf32, #tpu.memory_space<vmem>>, vector<1x896xf32>
    %53 = vector.broadcast %52 : vector<1x896xf32> to vector<8x896xf32>
    %54 = arith.addf %51, %53 : vector<8x896xf32>
    %55 = arith.negf %54 : vector<8x896xf32>
    %56 = math.exp %55 : vector<8x896xf32>
    %cst_39 = arith.constant 1.000000e+00 : f32
    %57 = vector.broadcast %cst_39 : f32 to vector<8x896xf32>
    %58 = arith.addf %57, %56 : vector<8x896xf32>
    %59 = arith.divf %57, %58 : vector<8x896xf32>
    %c0_40 = arith.constant 0 : index
    %c0_41 = arith.constant 0 : index
    %60 = vector.load %arg16[%c0_40, %c0_41] : memref<8x896xf32, #tpu.memory_space<vmem>>, vector<8x896xf32>
    tpu.vector_store %arg16[%c0_40, %c0_41], %59 {strides = array<i32>} : memref<8x896xf32, #tpu.memory_space<vmem>>, vector<8x896xf32>,
    %cst_42 = arith.constant 1.000000e+00 : f32
    %61 = vector.broadcast %cst_42 : f32 to vector<8x16xf32>
    %62 = arith.addf %61, %24 : vector<8x16xf32>
    %63 = arith.mulf %23, %23 : vector<8x16xf32>
    %64 = arith.subf %62, %63 : vector<8x16xf32>
    %65 = math.exp %24 : vector<8x16xf32>
    %66 = arith.subf %64, %65 : vector<8x16xf32>
    %cst_43 = arith.constant dense<0.000000e+00> : vector<8xf32>
    %67 = vector.multi_reduction <add>, %66, %cst_43 [1] : vector<8x16xf32> to vector<8xf32>
    %68 = vector.shape_cast %67 : vector<8xf32> to vector<8x1xf32>
    %cst_44 = arith.constant 5.000000e-01 : f32
    %69 = vector.broadcast %cst_44 : f32 to vector<8x1xf32>
    %70 = arith.mulf %69, %68 : vector<8x1xf32>
    %cst_45 = arith.constant 0.000000e+00 : f32
    %71 = vector.broadcast %cst_45 : f32 to vector<8x896xf32>
    %72 = arith.maximumf %54, %71 : vector<8x896xf32>
    %73 = math.absf %54 : vector<8x896xf32>
    %cst_46 = arith.constant 0.000000e+00 : f32
    %74 = vector.broadcast %cst_46 : f32 to vector<8x896xf32>
    %75 = arith.subf %74, %73 : vector<8x896xf32>
    %76 = math.exp %75 : vector<8x896xf32>
    %cst_47 = arith.constant 1.000000e+00 : f32
    %77 = vector.broadcast %cst_47 : f32 to vector<8x896xf32>
    %78 = arith.addf %77, %76 : vector<8x896xf32>
    %79 = math.log %78 : vector<8x896xf32>
    %80 = arith.addf %72, %79 : vector<8x896xf32>
    %81 = tpu.iota {dimensions = array<i32: 1>} : vector<8x896xi32>
    %c784_i32 = arith.constant 784 : i32
    %82 = vector.broadcast %c784_i32 : i32 to vector<8x896xi32>
    %83 = arith.cmpi slt, %81, %82 : vector<8x896xi32>
    %84 = arith.extui %83 : vector<8x896xi1> to vector<8x896xi32>
    %85 = arith.sitofp %84 : vector<8x896xi32> to vector<8x896xf32>
    %86 = arith.mulf %0, %54 : vector<8x896xf32>
    %87 = arith.subf %86, %80 : vector<8x896xf32>
    %88 = arith.mulf %87, %85 : vector<8x896xf32>
    %cst_48 = arith.constant dense<0.000000e+00> : vector<8xf32>
    %89 = vector.multi_reduction <add>, %88, %cst_48 [1] : vector<8x896xf32> to vector<8xf32>
    %90 = vector.shape_cast %89 : vector<8xf32> to vector<8x1xf32>
    %91 = tpu.concatenate %30, %22, %70, %90 in 1 : vector<8x16xf32>, vector<8x32xf32>, vector<8x1xf32>, vector<8x1xf32> -> vector<8x50xf32>
    %c0_49 = arith.constant 0 : index
    %c0_50 = arith.constant 0 : index
    %92 = vector.load %arg17[%c0_49, %c0_50] : memref<8x50xf32, #tpu.memory_space<vmem>>, vector<8x50xf32>
    tpu.vector_store %arg17[%c0_49, %c0_50], %91 {strides = array<i32>} : memref<8x50xf32, #tpu.memory_space<vmem>>, vector<8x50xf32>,
    return
  }
  func.func @transform_0(%arg0: i32) -> (i32, i32) {
    %c0_i32 = arith.constant 0 : i32
    %c0_i32_0 = arith.constant 0 : i32
    return %arg0, %c0_i32 : i32, i32
  }
  func.func @transform_1(%arg0: i32) -> (i32, i32) {
    %c0_i32 = arith.constant 0 : i32
    %c0_i32_0 = arith.constant 0 : i32
    return %arg0, %c0_i32 : i32, i32
  }
  func.func @transform_2(%arg0: i32) -> (i32, i32) {
    %c0_i32 = arith.constant 0 : i32
    %c0_i32_0 = arith.constant 0 : i32
    return %arg0, %c0_i32 : i32, i32
  }
  func.func @transform_3(%arg0: i32) -> (i32, i32) {
    %c0_i32 = arith.constant 0 : i32
    %c0_i32_0 = arith.constant 0 : i32
    %c0_i32_1 = arith.constant 0 : i32
    return %c0_i32, %c0_i32_0 : i32, i32
  }
  func.func @transform_4(%arg0: i32) -> (i32, i32) {
    %c0_i32 = arith.constant 0 : i32
    %c0_i32_0 = arith.constant 0 : i32
    %c0_i32_1 = arith.constant 0 : i32
    return %c0_i32, %c0_i32_0 : i32, i32
  }
  func.func @transform_5(%arg0: i32) -> (i32, i32) {
    %c0_i32 = arith.constant 0 : i32
    %c0_i32_0 = arith.constant 0 : i32
    %c0_i32_1 = arith.constant 0 : i32
    return %c0_i32, %c0_i32_0 : i32, i32
  }
  func.func @transform_6(%arg0: i32) -> (i32, i32) {
    %c0_i32 = arith.constant 0 : i32
    %c0_i32_0 = arith.constant 0 : i32
    %c0_i32_1 = arith.constant 0 : i32
    return %c0_i32, %c0_i32_0 : i32, i32
  }
  func.func @transform_7(%arg0: i32) -> (i32, i32) {
    %c0_i32 = arith.constant 0 : i32
    %c0_i32_0 = arith.constant 0 : i32
    %c0_i32_1 = arith.constant 0 : i32
    return %c0_i32, %c0_i32_0 : i32, i32
  }
  func.func @transform_8(%arg0: i32) -> (i32, i32) {
    %c0_i32 = arith.constant 0 : i32
    %c0_i32_0 = arith.constant 0 : i32
    %c0_i32_1 = arith.constant 0 : i32
    return %c0_i32, %c0_i32_0 : i32, i32
  }
  func.func @transform_9(%arg0: i32) -> (i32, i32) {
    %c0_i32 = arith.constant 0 : i32
    %c0_i32_0 = arith.constant 0 : i32
    %c0_i32_1 = arith.constant 0 : i32
    return %c0_i32, %c0_i32_0 : i32, i32
  }
  func.func @transform_10(%arg0: i32) -> (i32, i32) {
    %c0_i32 = arith.constant 0 : i32
    %c0_i32_0 = arith.constant 0 : i32
    %c0_i32_1 = arith.constant 0 : i32
    return %c0_i32, %c0_i32_0 : i32, i32
  }
  func.func @transform_11(%arg0: i32) -> (i32, i32) {
    %c0_i32 = arith.constant 0 : i32
    %c0_i32_0 = arith.constant 0 : i32
    %c0_i32_1 = arith.constant 0 : i32
    return %c0_i32, %c0_i32_0 : i32, i32
  }
  func.func @transform_12(%arg0: i32) -> (i32, i32) {
    %c0_i32 = arith.constant 0 : i32
    %c0_i32_0 = arith.constant 0 : i32
    %c0_i32_1 = arith.constant 0 : i32
    return %c0_i32, %c0_i32_0 : i32, i32
  }
  func.func @transform_13(%arg0: i32) -> (i32, i32) {
    %c0_i32 = arith.constant 0 : i32
    %c0_i32_0 = arith.constant 0 : i32
    %c0_i32_1 = arith.constant 0 : i32
    return %c0_i32, %c0_i32_0 : i32, i32
  }
  func.func @transform_14(%arg0: i32) -> (i32, i32) {
    %c0_i32 = arith.constant 0 : i32
    %c0_i32_0 = arith.constant 0 : i32
    %c0_i32_1 = arith.constant 0 : i32
    return %c0_i32, %c0_i32_0 : i32, i32
  }
  func.func @transform_15(%arg0: i32) -> (i32, i32) {
    %c0_i32 = arith.constant 0 : i32
    %c0_i32_0 = arith.constant 0 : i32
    return %arg0, %c0_i32 : i32, i32
  }
  func.func @transform_16(%arg0: i32) -> (i32, i32) {
    %c0_i32 = arith.constant 0 : i32
    %c0_i32_0 = arith.constant 0 : i32
    return %arg0, %c0_i32 : i32, i32
  }
}

</mosaic_0001>

<bundles_post_ra>
// kernel: tpu_custom_call.1
= control target key start
LH: loop header
LB: loop body
LE: loop exit
PB: predicated region body
PF: predicated region fallthrough
CT: control target
= control target key end

     0   :  { %s8442_s0 = inlined_call_operand.vmem [shape: f32[16,896], index: 0, kind: input, shape index: {}]   ;;  %s8443_s1 = inlined_call_operand.vmem [shape: f32[16,16], index: 1, kind: input, shape index: {}]   ;;  %s8444_s2 = inlined_call_operand.vmem [shape: bf16[16,512], index: 2, kind: input, shape index: {}]   ;;  %s8445_s3 = inlined_call_operand.hbm [shape: bf16[896,512], index: 3, kind: input, shape index: {}]   ;;  %s8446_s4 = inlined_call_operand.hbm [shape: f32[1,512], index: 4, kind: input, shape index: {}]   ;;  %s8447_s5 = inlined_call_operand.hbm [shape: bf16[512,256], index: 5, kind: input, shape index: {}]   ;;  %s8448_s6 = inlined_call_operand.vmem [shape: f32[1,256], index: 6, kind: input, shape index: {}]   ;;  %s8449_s7 = inlined_call_operand.vmem [shape: bf16[256,32], index: 7, kind: input, shape index: {}]   ;;  %s8450_s8 = inlined_call_operand.vmem [shape: f32[1,32], index: 8, kind: input, shape index: {}]   ;;  %s8451_s9 = inlined_call_operand.vmem [shape: bf16[16,256], index: 9, kind: input, shape index: {}]   ;;  %s8452_s10 = inlined_call_operand.vmem [shape: f32[1,256], index: 10, kind: input, shape index: {}]   ;;  %s8453_s11 = inlined_call_operand.hbm [shape: bf16[256,512], index: 11, kind: input, shape index: {}]   ;;  %s8454_s12 = inlined_call_operand.vmem [shape: f32[1,512], index: 12, kind: input, shape index: {}]   ;;  %s8455_s13 = inlined_call_operand.hbm [shape: bf16[512,896], index: 13, kind: input, shape index: {}]   ;;  %s8456_s14 = inlined_call_operand.vmem [shape: f32[1,896], index: 14, kind: input, shape index: {}]   ;;  %s8457_s15 = inlined_call_operand.hbm [shape: f32[16,896], index: 15, kind: output, shape index: {0}]   ;;  %s8458_s16 = inlined_call_operand.hbm [shape: f32[16,50], index: 16, kind: output, shape index: {1}]  }
   0x1   :  { %8472 = sst [smem:[#allocation26_spill]] %s8442_s0 }
   0x2   :  { %8473 = sst [smem:[#allocation27_spill]] %s8446_s4 }
   0x3   :  { %8474 = sst [smem:[#allocation28_spill]] %s8453_s11 }
   0x4   :  { %8475 = sst [smem:[#allocation29_spill]] %s8457_s15 }
   0x5   :  { %8476 = sst [smem:[#allocation30_spill]] %s8458_s16 }
   0x6   :  { %22 = vsyncpa [#allocation3], 0 }
   0x7   :  { %23 = vsyncpa [#allocation6], 0 }
   0x8   :  { %24 = vsyncpa [#allocation9], 0 }
   0x9   :  { %25 = vsyncpa [#allocation4], 0 }
   0xa   :  { %27 = vsyncpa [#allocation4 + $0x1], 0 }
   0xb   :  { %28 = vsyncpa [#allocation13], 0 }
   0xc   :  { %30 = vsyncpa [#allocation13 + $0x1], 0  ;;  %s7928_s21 = smov 0   ;;  %s7930_s22 = smov 0  }
   0xd   :  { %s7932_s23 = smov 0   ;;  %s7934_s24 = smov 0  }
   0xe LB: > { %8477 = sst [smem:[#allocation19_spill]] %s7812_s21  ;;  %s7949_s25 = sadd.s32 4294967295, %s7824_s24   ;;  %s7824_s24 = sphi %s7934_s24, %s8507_s24   ;;  %s7820_s23 = sphi %s7932_s23, %s8509_s23   ;;  %s7816_s22 = sphi %s7930_s22, %s8511_s22   ;;  %s7812_s21 = sphi %s7928_s21, %s8510_s21  }
   0xf   : > { %8478 = sst [smem:[#allocation20_spill]] %s7820_s23  ;;  %s5781_s26 = sadd.s32 4294967294, %s7824_s24  }
  0x10   : > { %8479 = sst [smem:[#allocation21_spill]] %s7824_s24  ;;  %s7953_s27 = sadd.s32 1, %s7824_s24  }
  0x11   : > { %8480 = sst [smem:[#allocation22_spill]] %s7953_s27  ;;  %s373_s28 = sadd.s32 1, %s7820_s23 }
  0x12   : > { %s370_s29 = ssub.s32 %s7824_s24, %s7953_s27  ;;  %p383_p0 = scmp.ne.s32.totalorder %s7820_s23, %s7816_s22 }
  0x13   : > { %p371_p1 = scmp.eq.s32.totalorder %s370_s29, 0  ;;  %p384_p2 = scmp.eq.s32.totalorder %s7949_s25, 1 }
  0x14   : > { %p389_p3 = scmp.ne.s32.totalorder %s7816_s22, %s7812_s21  ;;  %p390_p4 = scmp.eq.s32.totalorder %s5781_s26, 1 }
  0x15   : > { %s7964_s30 = scalar_select %p371_p1, %s7820_s23, %s373_s28  }
  0x16   : > { %p7966_p5 = por %p384_p2, %p383_p0  ;;  %p7970_p6 = por %p390_p4, %p389_p3 }
  0x17   : > { %8481 = sst [smem:[#allocation23_spill]] %s7964_s30  ;;  %p5782_p7 = scmp.ge.s32.totalorder %s7824_s24, 1 }
  0x18   : > { %s8482_s0 = scalar_select %p7966_p5, 1, 0 }
  0x19   : > { %s8484_s17 = scalar_select %p7970_p6, 1, 0 }
  0x1a   : > { %8483 = sst [smem:[#allocation24_spill]] %s8482_s0  ;;  %p423_p8 = scmp.lt.s32.totalorder %s7824_s24, 3 }
  0x1b   : > { %8485 = sst [smem:[#allocation25_spill]] %s8484_s17  ;;  %p8466_p9 = scmp.eq.s32.totalorder %s7949_s25, 0 }
  0x1c   : > { %p7977_p10 = pnand %p5782_p7, %p423_p8  ;;  %s7826_s19 = smov [#allocation5]  }
  0x1d   : > { %s449_s20 = sshll.u32 %s7826_s19, 4  ;;  %s7827_s28 = smov [#allocation8]   ;;  %s450_s20 = int_to_ptr.vmem [resolvable:$true] %s449_s20 }
  0x1e   : > { %s8486_s18 = scalar_select %p7977_p10, 1, 0 }
  0x1f   : > { %p6559_p11 = pneg %p7977_p10  ;;  %s487_s29 = sshll.u32 %s7827_s28, 4  ;;  %s7989_s29 = int_to_ptr.vmem [resolvable:$true] %s487_s29 }
  0x20   : > { %s7828_s30 = smov [#allocation2]   ;;  %s8488_s4 = sld [smem:[#allocation27_spill]] }
  0x21   : > { %p7985_p12 = pnand %p8466_p9, %p6559_p11  ;;  %s7991_s23 = sshll.u32 %s7828_s30, 4  ;;  %s436_s23 = int_to_ptr.vmem [resolvable:$true] %s7991_s23 }
  0x23   : > { %p8001_p0 = pneg %p7985_p12 }
  0x26   : > { %s7578_s19 = scalar_lea.hbm %s8488_s4, 64 }
  0x27   : > { %p7579_p13 = scmp.ne.s32.totalorder %s8488_s4, %s7578_s19  ;;  %p7585_p3 = scmp.lt.u32.totalorder %s7578_s19, %s8488_s4 }
  0x29   : > { %p7581_p1 = pnand %p8001_p0, %p7579_p13 }
  0x2b   : > { %p7582_p2 = pneg %p7581_p1 }
  0x2d   : > { %p7587_p4 = pnand %p7585_p3, %p7582_p2 }
  0x2f   : > { %7590 = shalt.err (!%p7587_p4)
}
  0x30   : > { %s7591_s27 = scalar_lea.vmem %s450_s20, 64  ;;  %p7599_p9 = scmp.lt.s32.totalorder %s450_s20, %s450_s20 }
  0x31   : > { %p7592_p7 = scmp.ne.s32.totalorder %s450_s20, %s7591_s27  ;;  %p7600_p6 = scmp.lt.s32.totalorder %s7591_s27, %s7591_s27 }
  0x33   : > { %p7594_p8 = pnand %p7592_p7, %p8001_p0  ;;  %p7601_p5 = por %p7600_p6, %p7599_p9 }
  0x35   : > { %p7595_p11 = pneg %p7594_p8 }
  0x37   : > { %p7602_p10 = pnand %p7601_p5, %p7595_p11 }
  0x39   : > { %7605 = shalt.err (!%p7602_p10)
}
  0x3a   : > { %6565 = dma.hbm_to_vmem [thread:$0]  (!%p7985_p12), %s8488_s4, 64, %s450_s20, [#allocation6]  }
  0x3b   : > { %s8490_s11 = sld [smem:[#allocation28_spill]] }
  0x41   : > { %s7606_s28 = scalar_lea.hbm %s8490_s11, 8192 }
  0x42   : > { %p7607_p13 = scmp.ne.s32.totalorder %s8490_s11, %s7606_s28  ;;  %p7613_p5 = scmp.lt.u32.totalorder %s7606_s28, %s8490_s11 }
  0x44   : > { %p7609_p1 = pnand %p7607_p13, %p8001_p0 }
  0x46   : > { %p7610_p6 = pneg %p7609_p1 }
  0x48   : > { %p7615_p9 = pnand %p7613_p5, %p7610_p6 }
  0x4a   : > { %7618 = shalt.err (!%p7615_p9)
}
  0x4b   : > { %s7619_s20 = scalar_lea.vmem %s7989_s29, 8192  ;;  %p7627_p4 = scmp.lt.s32.totalorder %s7989_s29, %s7989_s29 }
  0x4c   : > { %p7620_p10 = scmp.ne.s32.totalorder %s7989_s29, %s7619_s20  ;;  %p7628_p7 = scmp.lt.s32.totalorder %s7619_s20, %s7619_s20 }
  0x4e   : > { %p7622_p2 = pnand %p7620_p10, %p8001_p0  ;;  %p7629_p8 = por %p7628_p7, %p7627_p4 }
  0x50   : > { %p7623_p3 = pneg %p7622_p2 }
  0x52   : > { %p7630_p11 = pnand %p7629_p8, %p7623_p3 }
  0x54   : > { %7633 = shalt.err (!%p7630_p11)
}
  0x55   : > { %s7829_s15 = smov 256   ;;  %s7830_s0 = smov 16  }
  0x56   : > { %6571 = dma.hbm_to_vmem [thread:$0]  (!%p7985_p12), %s8490_s11, 8192, %s7989_s29, [#allocation9], %s7829_s15, %s7829_s15, %s7830_s0  }
  0x57   : > { %s7634_s28 = scalar_lea.hbm %s8445_s3, 28672 }
  0x58   : > { %p7635_p13 = scmp.ne.s32.totalorder %s8445_s3, %s7634_s28  ;;  %p7641_p5 = scmp.lt.u32.totalorder %s7634_s28, %s8445_s3 }
  0x5a   : > { %p7637_p1 = pnand %p7635_p13, %p8001_p0 }
  0x5c   : > { %p7638_p6 = pneg %p7637_p1 }
  0x5e   : > { %p7643_p9 = pnand %p7641_p5, %p7638_p6 }
  0x60   : > { %7646 = shalt.err (!%p7643_p9)
}
  0x61   : > { %s7647_s21 = scalar_lea.vmem %s436_s23, 28672  ;;  %p7655_p4 = scmp.lt.s32.totalorder %s436_s23, %s436_s23 }
  0x62   : > { %p7648_p10 = scmp.ne.s32.totalorder %s436_s23, %s7647_s21  ;;  %p7656_p7 = scmp.lt.s32.totalorder %s7647_s21, %s7647_s21 }
  0x64   : > { %p7650_p2 = pnand %p7648_p10, %p8001_p0  ;;  %p7657_p8 = por %p7656_p7, %p7655_p4 }
  0x66   : > { %p7651_p3 = pneg %p7650_p2 }
  0x68   : > { %p7658_p11 = pnand %p7657_p8, %p7651_p3 }
  0x6a   : > { %7661 = shalt.err (!%p7658_p11)
}
  0x6b   : > { %6562 = dma.hbm_to_vmem [thread:$0]  (!%p7985_p12), %s8445_s3, 28672, %s436_s23, [#allocation3], %s7829_s15, %s7829_s15, %s7830_s0  }
  0x6c   : > { %s7831_s4 = smov [#allocation7]   ;;  %s7662_s30 = scalar_lea.hbm %s8447_s5, 8192 }
  0x6d   : > { %s459_s17 = sshll.u32 %s7831_s4, 4  ;;  %p7663_p13 = scmp.ne.s32.totalorder %s8447_s5, %s7662_s30  ;;  %s460_s17 = int_to_ptr.vmem [resolvable:$true] %s459_s17 }
  0x6e   : > { %p7669_p5 = scmp.lt.u32.totalorder %s7662_s30, %s8447_s5 }
  0x6f   : > { %p7665_p1 = pnand %p7663_p13, %p8001_p0 }
  0x71   : > { %p7666_p6 = pneg %p7665_p1 }
  0x73   : > { %p7671_p9 = pnand %p7669_p5, %p7666_p6 }
  0x75   : > { %7674 = shalt.err (!%p7671_p9)
}
  0x76   : > { %s7675_s23 = scalar_lea.vmem %s460_s17, 8192  ;;  %p7683_p4 = scmp.lt.s32.totalorder %s460_s17, %s460_s17 }
  0x77   : > { %p7676_p10 = scmp.ne.s32.totalorder %s460_s17, %s7675_s23  ;;  %p7684_p7 = scmp.lt.s32.totalorder %s7675_s23, %s7675_s23 }
  0x79   : > { %p7678_p2 = pnand %p7676_p10, %p8001_p0  ;;  %p7685_p8 = por %p7684_p7, %p7683_p4 }
  0x7b   : > { %p7679_p3 = pneg %p7678_p2 }
  0x7d   : > { %p7686_p11 = pnand %p7685_p8, %p7679_p3 }
  0x7f   : > { %7689 = shalt.err (!%p7686_p11)
}
  0x80   : > { %s7832_s15 = smov 128   ;;  %s7833_s0 = smov 8  }
  0x81   : > { %6568 = dma.hbm_to_vmem [thread:$0]  (!%p7985_p12), %s8447_s5, 8192, %s460_s17, [#allocation6], %s7832_s15, %s7832_s15, %s7833_s0  }
  0x82   : > { %s7834_s24 = smov [#allocation10]   ;;  %s7690_s30 = scalar_lea.hbm %s8455_s13, 28672 }
  0x83   : > { %s503_s4 = sshll.u32 %s7834_s24, 4  ;;  %p7691_p13 = scmp.ne.s32.totalorder %s8455_s13, %s7690_s30  ;;  %s504_s4 = int_to_ptr.vmem [resolvable:$true] %s503_s4 }
  0x84   : > { %p7697_p5 = scmp.lt.u32.totalorder %s7690_s30, %s8455_s13 }
  0x85   : > { %p7693_p1 = pnand %p7691_p13, %p8001_p0 }
  0x87   : > { %p7694_p6 = pneg %p7693_p1 }
  0x89   : > { %p7699_p9 = pnand %p7697_p5, %p7694_p6 }
  0x8b   : > { %7702 = shalt.err (!%p7699_p9)
}
  0x8c   : > { %s7703_s17 = scalar_lea.vmem %s504_s4, 28672  ;;  %p7711_p4 = scmp.lt.s32.totalorder %s504_s4, %s504_s4 }
  0x8d   : > { %p7704_p10 = scmp.ne.s32.totalorder %s504_s4, %s7703_s17  ;;  %p7712_p7 = scmp.lt.s32.totalorder %s7703_s17, %s7703_s17 }
  0x8f   : > { %p7706_p2 = pnand %p7704_p10, %p8001_p0  ;;  %p7713_p8 = por %p7712_p7, %p7711_p4 }
  0x91   : > { %p7707_p3 = pneg %p7706_p2 }
  0x93   : > { %p7714_p11 = pnand %p7713_p8, %p7707_p3 }
  0x95   : > { %7717 = shalt.err (!%p7714_p11)
}
  0x96   : > { %s7835_s15 = smov 448   ;;  %s7836_s0 = smov 28  }
  0x97   : > { %6574 = dma.hbm_to_vmem [thread:$0]  (!%p7985_p12), %s8455_s13, 28672, %s504_s4, [#allocation9], %s7835_s15, %s7835_s15, %s7836_s0  }
  0x98   : > { %p8491_p13 = scmp.ne.s32.totalorder %s8486_s18, 0 }
  0x99   : > { %p8492_p1 = scmp.eq.s32.totalorder (!%p8491_p13), %s7949_s25, 0 }
  0x9a   : > { %545 = sbr.rel (%p8491_p13) target bundleno = 2304 (0x900), region = 80 }
  0xa1   : > { %7791 = dma.done.wait (%p8492_p1), [#allocation3], 28672   ;;  %p8493_p0 = pmov %p8492_p1 }
  0xa3   : > { %7793 = vsyncadd (%p8493_p0), [#allocation3], 4294938624  ;;  %p8494_p6 = pmov %p8493_p0 }
  0xa4   : > { %p8495_p5 = pmov %p8493_p0 }
  0xa5   : > { %7795 = dma.done.wait (%p8494_p6), [#allocation6], 8256  }
  0xa6   : > { %7797 = vsyncadd (%p8495_p5), [#allocation6], 4294959040  ;;  %p8496_p9 = pmov %p8493_p0 }
  0xa7   : > { %p8497_p12 = pmov %p8493_p0 }
  0xa8   : > { %7799 = dma.done.wait (%p8496_p9), [#allocation9], 36864  }
  0xa9   : > { %7801 = vsyncadd (%p8497_p12), [#allocation9], 4294930432  ;;  %v6640_v0 = vld [vmem:[#allocation2 + $0x4] ss:$16 sps:$4 sm:$0xff]   ;;  %v6642_v1 = vld [vmem:[#allocation2 + $0xc] ss:$16 sps:$4 sm:$0xff]  }
  0xaa   : > { %2020 = vmatprep.subr.bf16.mxu0 %v6640_v0  ;;  %v6644_v2 = vld [vmem:[#allocation2] ss:$16 sps:$4 sm:$0xff]   ;;  %v6645_v3 = vld [vmem:[#allocation2 + $0x8] ss:$16 sps:$4 sm:$0xff]   ;;  %2184 = vmatprep.subr.bf16.mxu1 %v6642_v1  ;;  %v6646_v4 = vld [vmem:[#allocation2 + $0x24] ss:$16 sps:$4 sm:$0xff]  }
  0xab   : > { %2021 = vmatpush1.bf16.msra.mxu0 %v6644_v2  ;;  %2185 = vmatpush1.bf16.msra.mxu1 %v6645_v3  ;;  %v6648_v5 = vld [vmem:[#allocation2 + $0x2c] ss:$16 sps:$4 sm:$0xff]   ;;  %v6650_v6 = vld [vmem:[#allocation2 + $0x20] ss:$16 sps:$4 sm:$0xff]   ;;  %v6651_v7 = vld [vmem:[#allocation2 + $0x28] ss:$16 sps:$4 sm:$0xff]  }
  0xac   : > { %2022 = vmatprep.subr.bf16.mxu0 %v6646_v4  ;;  %2186 = vmatprep.subr.bf16.mxu1 %v6648_v5  ;;  %v6652_v8 = vld [vmem:[#allocation2 + $0x44] ss:$16 sps:$4 sm:$0xff]   ;;  %v6654_v9 = vld [vmem:[#allocation2 + $0x4c] ss:$16 sps:$4 sm:$0xff]   ;;  %v6656_v10 = vld [vmem:[#allocation2 + $0x40] ss:$16 sps:$4 sm:$0xff]  }
  0xad   : > { %v6657_v11 = vld [vmem:[#allocation2 + $0x48] ss:$16 sps:$4 sm:$0xff]   ;;  %v6658_v12 = vld [vmem:[#allocation2 + $0x64] ss:$16 sps:$4 sm:$0xff]   ;;  %v6660_v13 = vld [vmem:[#allocation2 + $0x6c] ss:$16 sps:$4 sm:$0xff]  }
  0xae   : > { %v6662_v14 = vld [vmem:[#allocation2 + $0x60] ss:$16 sps:$4 sm:$0xff]   ;;  %v6663_v15 = vld [vmem:[#allocation2 + $0x68] ss:$16 sps:$4 sm:$0xff]   ;;  %v6664_v16 = vld [vmem:[#allocation2 + $0x84] ss:$16 sps:$4 sm:$0xff]  }
  0xaf   : > { %2023 = vmatpush1.bf16.msra.mxu0 %v6650_v6  ;;  %2187 = vmatpush1.bf16.msra.mxu1 %v6651_v7  ;;  %v6666_v17 = vld [vmem:[#allocation2 + $0x8c] ss:$16 sps:$4 sm:$0xff]   ;;  %v6668_v18 = vld [vmem:[#allocation2 + $0x80] ss:$16 sps:$4 sm:$0xff]   ;;  %v6669_v19 = vld [vmem:[#allocation2 + $0x88] ss:$16 sps:$4 sm:$0xff]  }
  0xb0   : > { %2024 = vmatprep.subr.bf16.mxu0 %v6652_v8  ;;  %2188 = vmatprep.subr.bf16.mxu1 %v6654_v9  ;;  %v6670_v20 = vld [vmem:[#allocation2 + $0xa4] ss:$16 sps:$4 sm:$0xff]   ;;  %v6672_v21 = vld [vmem:[#allocation2 + $0xac] ss:$16 sps:$4 sm:$0xff]   ;;  %v6674_v22 = vld [vmem:[#allocation2 + $0xa0] ss:$16 sps:$4 sm:$0xff]  }
  0xb1   : > { %v6675_v23 = vld [vmem:[#allocation2 + $0xa8] ss:$16 sps:$4 sm:$0xff]   ;;  %v6676_v24 = vld [vmem:[#allocation2 + $0xc4] ss:$16 sps:$4 sm:$0xff]   ;;  %v6678_v25 = vld [vmem:[#allocation2 + $0xcc] ss:$16 sps:$4 sm:$0xff]  }
  0xb2   : > { %v6680_v26 = vld [vmem:[#allocation2 + $0xc0] ss:$16 sps:$4 sm:$0xff]   ;;  %v6681_v27 = vld [vmem:[#allocation2 + $0xc8] ss:$16 sps:$4 sm:$0xff]   ;;  %v6682_v28 = vld [vmem:[#allocation2 + $0xe4] ss:$16 sps:$4 sm:$0xff]  }
  0xb3   : > { %2025 = vmatpush1.bf16.msra.mxu0 %v6656_v10  ;;  %2189 = vmatpush1.bf16.msra.mxu1 %v6657_v11  ;;  %v6684_v29 = vld [vmem:[#allocation2 + $0xec] ss:$16 sps:$4 sm:$0xff]   ;;  %v6686_v30 = vld [vmem:[#allocation2 + $0xe0] ss:$16 sps:$4 sm:$0xff]   ;;  %p625_p10 = scmp.lt.s32.totalorder %s7949_s25, 1  ;;  %s8498_s4 = sld [smem:[#allocation26_spill]] }
  0xb4   : > { %2026 = vmatprep.subr.bf16.mxu0 %v6658_v12  ;;  %2190 = vmatprep.subr.bf16.mxu1 %v6660_v13  ;;  %v6687_v31 = vld [vmem:[#allocation2 + $0xe8] ss:$16 sps:$4 sm:$0xff]   ;;  %v6688_v32 = vld [vmem:[#allocation2 + $0x104] ss:$16 sps:$4 sm:$0xff]   ;;  %v6690_v33 = vld [vmem:[#allocation2 + $0x10c] ss:$16 sps:$4 sm:$0xff]  }
  0xb5   : > { %v6692_v34 = vld [vmem:[#allocation2 + $0x100] ss:$16 sps:$4 sm:$0xff]   ;;  %v6693_v35 = vld [vmem:[#allocation2 + $0x108] ss:$16 sps:$4 sm:$0xff]   ;;  %s8111_s16 = scalar_select %p625_p10, %s7949_s25, 1  ;;  %vm3048_vm0 = vcmask 130048  }
  0xb6   : > { %v6694_v36 = vld [vmem:[#allocation2 + $0x124] ss:$16 sps:$4 sm:$0xff]   ;;  %v6696_v37 = vld [vmem:[#allocation2 + $0x12c] ss:$16 sps:$4 sm:$0xff]   ;;  %v6698_v38 = vld [vmem:[#allocation2 + $0x120] ss:$16 sps:$4 sm:$0xff]  }
  0xb7   : > { %2027 = vmatpush1.bf16.msra.mxu0 %v6662_v14  ;;  %2191 = vmatpush1.bf16.msra.mxu1 %v6663_v15  ;;  %s6533_s18 = smul.u32 56, %s8111_s16  ;;  %v6699_v39 = vld [vmem:[#allocation2 + $0x128] ss:$16 sps:$4 sm:$0xff]   ;;  %v6700_v40 = vld [vmem:[#allocation2 + $0x144] ss:$16 sps:$4 sm:$0xff]   ;;  %s7838_s29 = smov 112  }
  0xb8   : > { %2028 = vmatprep.subr.bf16.mxu0 %v6664_v16  ;;  %2192 = vmatprep.subr.bf16.mxu1 %v6666_v17  ;;  %v6702_v41 = vld [vmem:[#allocation2 + $0x14c] ss:$16 sps:$4 sm:$0xff]   ;;  %v6704_v42 = vld [vmem:[#allocation2 + $0x140] ss:$16 sps:$4 sm:$0xff]   ;;  %v6705_v43 = vld [vmem:[#allocation2 + $0x148] ss:$16 sps:$4 sm:$0xff]  }
  0xb9   : > { %s8117_s19 = scalar_lea.vmem %s8498_s4, %s6533_s18  ;;  %v6706_v44 = vld [vmem:[#allocation2 + $0x164] ss:$16 sps:$4 sm:$0xff]   ;;  %v6708_v45 = vld [vmem:[#allocation2 + $0x16c] ss:$16 sps:$4 sm:$0xff]   ;;  %v6710_v47 = vld [vmem:[#allocation2 + $0x160] ss:$16 sps:$4 sm:$0xff]  }
  0xba   : > { %v641_v46 = vld [vmem:[%s8117_s19 + $0x8] sm:$0xff]  ;;  %v6712_v50 = vld [vmem:[#allocation2 + $0x184] ss:$16 sps:$4 sm:$0xff]   ;;  %v6716_v52 = vld [vmem:[#allocation2 + $0x180] ss:$16 sps:$4 sm:$0xff]   ;;  %s7839_s18 = smov 16  }
  0xbb   : > { %2029 = vmatpush1.bf16.msra.mxu0 %v6668_v18  ;;  %2193 = vmatpush1.bf16.msra.mxu1 %v6669_v19  ;;  %v648_v48 = vpack.c.bf16 %v641_v46, %v641_v46  ;;  %v6711_v49 = vld [vmem:[#allocation2 + $0x168] ss:$16 sps:$4 sm:$0xff]   ;;  %v6714_v51 = vld [vmem:[#allocation2 + $0x18c] ss:$16 sps:$4 sm:$0xff]   ;;  %v6718_v54 = vld [vmem:[#allocation2 + $0x1a4] ss:$16 sps:$4 sm:$0xff]  }
  0xbc   : > { %2030 = vmatprep.subr.bf16.mxu0 %v6670_v20  ;;  %2194 = vmatprep.subr.bf16.mxu1 %v6672_v21  ;;  %v6717_v53 = vld [vmem:[#allocation2 + $0x188] ss:$16 sps:$4 sm:$0xff]   ;;  %v6720_v55 = vld [vmem:[#allocation2 + $0x1ac] ss:$16 sps:$4 sm:$0xff]   ;;  %v6722_v56 = vld [vmem:[#allocation2 + $0x1a0] ss:$16 sps:$4 sm:$0xff]  }
  0xbd   : > { %2052 = vmatprep.mubr.bf16.mxu0 %v648_v48  ;;  %2216 = vmatprep.mubr.bf16.mxu1 %v648_v48  ;;  %v6723_v57 = vld [vmem:[#allocation2 + $0x1a8] ss:$16 sps:$4 sm:$0xff]   ;;  %v6724_v58 = vld [vmem:[#allocation2 + $0x1c4] ss:$16 sps:$4 sm:$0xff]   ;;  %v6726_v59 = vld [vmem:[#allocation2 + $0x1cc] ss:$16 sps:$4 sm:$0xff]  }
  0xbe   : > { %v6728_v60 = vld [vmem:[#allocation2 + $0x1c0] ss:$16 sps:$4 sm:$0xff]   ;;  %v6729_v61 = vld [vmem:[#allocation2 + $0x1c8] ss:$16 sps:$4 sm:$0xff]   ;;  %v6730_v62 = vld [vmem:[#allocation2 + $0x1e4] ss:$16 sps:$4 sm:$0xff]  }
  0xbf   : > { %2031 = vmatpush1.bf16.msra.mxu0 %v6674_v22  ;;  %2195 = vmatpush1.bf16.msra.mxu1 %v6675_v23  ;;  %v6732_v63 = vld [vmem:[#allocation2 + $0x1ec] ss:$16 sps:$4 sm:$0xff]   ;;  %v6734_v0 = vld [vmem:[#allocation2 + $0x1e0] ss:$16 sps:$4 sm:$0xff]   ;;  %v6735_v1 = vld [vmem:[#allocation2 + $0x1e8] ss:$16 sps:$4 sm:$0xff]  }
  0xc0   : > { %2032 = vmatprep.subr.bf16.mxu0 %v6676_v24  ;;  %2196 = vmatprep.subr.bf16.mxu1 %v6678_v25  ;;  %v640_v2 = vld [vmem:[%s8117_s19] sm:$0xff]  ;;  %v6741_v4 = vld [vmem:[#allocation2 + $0x20c] ss:$16 sps:$4 sm:$0xff]   ;;  %v6739_v7 = vld [vmem:[#allocation2 + $0x208] ss:$16 sps:$4 sm:$0xff]   ;;  %s5797_s26 = sshll.u32 %s8111_s16, 3 }
  0xc1   : > { %v6738_v3 = vld [vmem:[#allocation2 + $0x204] ss:$16 sps:$4 sm:$0xff]   ;;  %v647_v5 = vpack.c.bf16 %v640_v2, %v640_v2  ;;  %v6736_v6 = vld [vmem:[#allocation2 + $0x200] ss:$16 sps:$4 sm:$0xff]   ;;  %v6747_v9 = vld [vmem:[#allocation2 + $0x22c] ss:$16 sps:$4 sm:$0xff]   ;;  %s633_s28 = scalar_lea.vmem %s8443_s1, %s5797_s26 }
  0xc2   : > { %v6744_v8 = vld [vmem:[#allocation2 + $0x224] ss:$16 sps:$4 sm:$0xff]   ;;  %v6742_v10 = vld [vmem:[#allocation2 + $0x220] ss:$16 sps:$4 sm:$0xff]   ;;  %v6745_v11 = vld [vmem:[#allocation2 + $0x228] ss:$16 sps:$4 sm:$0xff]  }
  0xc3   : > { %2033 = vmatpush1.bf16.msra.mxu0 %v6680_v26  ;;  %2197 = vmatpush1.bf16.msra.mxu1 %v6681_v27  ;;  %v6750_v12 = vld [vmem:[#allocation2 + $0x244] ss:$16 sps:$4 sm:$0xff]   ;;  %v6753_v13 = vld [vmem:[#allocation2 + $0x24c] ss:$16 sps:$4 sm:$0xff]   ;;  %v6748_v14 = vld [vmem:[#allocation2 + $0x240] ss:$16 sps:$4 sm:$0xff]  }
  0xc4   : > { %2034 = vmatprep.subr.bf16.mxu0 %v6682_v28  ;;  %2198 = vmatprep.subr.bf16.mxu1 %v6684_v29  ;;  %v6751_v15 = vld [vmem:[#allocation2 + $0x248] ss:$16 sps:$4 sm:$0xff]   ;;  %v6756_v16 = vld [vmem:[#allocation2 + $0x264] ss:$16 sps:$4 sm:$0xff]   ;;  %v6759_v17 = vld [vmem:[#allocation2 + $0x26c] ss:$16 sps:$4 sm:$0xff]  }
  0xc5   : > { %v6754_v18 = vld [vmem:[#allocation2 + $0x260] ss:$16 sps:$4 sm:$0xff]   ;;  %v6757_v19 = vld [vmem:[#allocation2 + $0x268] ss:$16 sps:$4 sm:$0xff]   ;;  %v6762_v20 = vld [vmem:[#allocation2 + $0x284] ss:$16 sps:$4 sm:$0xff]  }
  0xc6   : > { %v6765_v21 = vld [vmem:[#allocation2 + $0x28c] ss:$16 sps:$4 sm:$0xff]   ;;  %v6760_v22 = vld [vmem:[#allocation2 + $0x280] ss:$16 sps:$4 sm:$0xff]   ;;  %v6763_v23 = vld [vmem:[#allocation2 + $0x288] ss:$16 sps:$4 sm:$0xff]  }
  0xc7   : > { %2035 = vmatpush1.bf16.msra.mxu0 %v6686_v30  ;;  %2199 = vmatpush1.bf16.msra.mxu1 %v6687_v31  ;;  %v6768_v24 = vld [vmem:[#allocation2 + $0x2a4] ss:$16 sps:$4 sm:$0xff]   ;;  %v6771_v25 = vld [vmem:[#allocation2 + $0x2ac] ss:$16 sps:$4 sm:$0xff]   ;;  %v6766_v26 = vld [vmem:[#allocation2 + $0x2a0] ss:$16 sps:$4 sm:$0xff]  }
  0xc8   : > { %2036 = vmatprep.subr.bf16.mxu0 %v6688_v32  ;;  %2200 = vmatprep.subr.bf16.mxu1 %v6690_v33  ;;  %v6769_v27 = vld [vmem:[#allocation2 + $0x2a8] ss:$16 sps:$4 sm:$0xff]   ;;  %v6774_v28 = vld [vmem:[#allocation2 + $0x2c4] ss:$16 sps:$4 sm:$0xff]   ;;  %v6777_v29 = vld [vmem:[#allocation2 + $0x2cc] ss:$16 sps:$4 sm:$0xff]  }
  0xc9   : > { %v643_v30 = vld [vmem:[%s8117_s19 + $0x18] sm:$0xff]  ;;  %v6772_v31 = vld [vmem:[#allocation2 + $0x2c0] ss:$16 sps:$4 sm:$0xff]   ;;  %v6798_v46 = vld [vmem:[#allocation2 + $0x344] ss:$16 sps:$4 sm:$0xff]   ;;  %s6413_s23 = sshll.u32 %s8111_s16, 4 }
  0xca   : > { %v650_v32 = vpack.c.bf16 %v643_v30, %v643_v30  ;;  %v6775_v33 = vld [vmem:[#allocation2 + $0x2c8] ss:$16 sps:$4 sm:$0xff]   ;;  %v6796_v48 = vld [vmem:[#allocation2 + $0x340] ss:$16 sps:$4 sm:$0xff]   ;;  %v6828_v2 = vld [vmem:[#allocation2 + $0x3e4] ss:$16 sps:$4 sm:$0xff]   ;;  %s8258_s0 = scalar_lea.vmem %s8444_s2, %s6413_s23 }
  0xcb   : > { %2037 = vmatpush1.bf16.msra.mxu0 %v6692_v34  ;;  %2201 = vmatpush1.bf16.msra.mxu1 %v6693_v35  ;;  %v6780_v34 = vld [vmem:[#allocation2 + $0x2e4] ss:$16 sps:$4 sm:$0xff]   ;;  %v6783_v35 = vld [vmem:[#allocation2 + $0x2ec] ss:$16 sps:$4 sm:$0xff]   ;;  %s8499_s4 = sld [smem:[#allocation24_spill]]  ;;  %s8500_s20 = sld [smem:[#allocation29_spill]] }
  0xcc   : > { %2038 = vmatprep.subr.bf16.mxu0 %v6694_v36  ;;  %2202 = vmatprep.subr.bf16.mxu1 %v6696_v37  ;;  %v6778_v36 = vld [vmem:[#allocation2 + $0x2e0] ss:$16 sps:$4 sm:$0xff]   ;;  %v6781_v37 = vld [vmem:[#allocation2 + $0x2e8] ss:$16 sps:$4 sm:$0xff]   ;;  %v6864_v30 = vld [vmem:[#allocation2 + $0x4a4] ss:$16 sps:$4 sm:$0xff]  }
  0xcd   : > { %s7841_s15 = smov [#allocation11]  }
  0xcf   : > { %2039 = vmatpush1.bf16.msra.mxu0 %v6698_v38  ;;  %2203 = vmatpush1.bf16.msra.mxu1 %v6699_v39  ;;  %v6786_v38 = vld [vmem:[#allocation2 + $0x304] ss:$16 sps:$4 sm:$0xff]   ;;  %v6789_v39 = vld [vmem:[#allocation2 + $0x30c] ss:$16 sps:$4 sm:$0xff]  }
  0xd0   : > { %2040 = vmatprep.subr.bf16.mxu0 %v6700_v40  ;;  %2204 = vmatprep.subr.bf16.mxu1 %v6702_v41  ;;  %v6784_v40 = vld [vmem:[#allocation2 + $0x300] ss:$16 sps:$4 sm:$0xff]   ;;  %v6787_v41 = vld [vmem:[#allocation2 + $0x308] ss:$16 sps:$4 sm:$0xff]  }
  0xd1   : > { %p8501_p3 = scmp.ne.s32.totalorder %s8499_s4, 0 }
  0xd3   : > { %2041 = vmatpush1.bf16.msra.mxu0 %v6704_v42  ;;  %2205 = vmatpush1.bf16.msra.mxu1 %v6705_v43  ;;  %v6792_v42 = vld [vmem:[#allocation2 + $0x324] ss:$16 sps:$4 sm:$0xff]   ;;  %v6795_v43 = vld [vmem:[#allocation2 + $0x32c] ss:$16 sps:$4 sm:$0xff]  }
  0xd4   : > { %2042 = vmatprep.subr.bf16.mxu0 %v6706_v44  ;;  %2206 = vmatprep.subr.bf16.mxu1 %v6708_v45  ;;  %v6790_v44 = vld [vmem:[#allocation2 + $0x320] ss:$16 sps:$4 sm:$0xff]   ;;  %v6793_v45 = vld [vmem:[#allocation2 + $0x328] ss:$16 sps:$4 sm:$0xff]  }
  0xd7   : > { %2043 = vmatpush1.bf16.msra.mxu0 %v6710_v47  ;;  %2207 = vmatpush1.bf16.msra.mxu1 %v6711_v49  ;;  %v6801_v47 = vld [vmem:[#allocation2 + $0x34c] ss:$16 sps:$4 sm:$0xff]   ;;  %v6799_v49 = vld [vmem:[#allocation2 + $0x348] ss:$16 sps:$4 sm:$0xff]  }
  0xd8   : > { %2044 = vmatprep.subr.bf16.mxu0 %v6712_v50  ;;  %2208 = vmatprep.subr.bf16.mxu1 %v6714_v51  ;;  %v6804_v50 = vld [vmem:[#allocation2 + $0x364] ss:$16 sps:$4 sm:$0xff]   ;;  %v6807_v51 = vld [vmem:[#allocation2 + $0x36c] ss:$16 sps:$4 sm:$0xff]  }
  0xdb   : > { %2045 = vmatpush1.bf16.msra.mxu0 %v6716_v52  ;;  %2209 = vmatpush1.bf16.msra.mxu1 %v6717_v53  ;;  %v6802_v52 = vld [vmem:[#allocation2 + $0x360] ss:$16 sps:$4 sm:$0xff]   ;;  %v6805_v53 = vld [vmem:[#allocation2 + $0x368] ss:$16 sps:$4 sm:$0xff]  }
  0xdc   : > { %2046 = vmatprep.subr.bf16.mxu0 %v6718_v54  ;;  %2210 = vmatprep.subr.bf16.mxu1 %v6720_v55  ;;  %v6810_v54 = vld [vmem:[#allocation2 + $0x384] ss:$16 sps:$4 sm:$0xff]   ;;  %v6813_v55 = vld [vmem:[#allocation2 + $0x38c] ss:$16 sps:$4 sm:$0xff]  }
  0xdf   : > { %2047 = vmatpush1.bf16.msra.mxu0 %v6722_v56  ;;  %2211 = vmatpush1.bf16.msra.mxu1 %v6723_v57  ;;  %v6808_v56 = vld [vmem:[#allocation2 + $0x380] ss:$16 sps:$4 sm:$0xff]   ;;  %v6811_v57 = vld [vmem:[#allocation2 + $0x388] ss:$16 sps:$4 sm:$0xff]  }
  0xe0   : > { %2048 = vmatprep.subr.bf16.mxu0 %v6724_v58  ;;  %2212 = vmatprep.subr.bf16.mxu1 %v6726_v59  ;;  %v6816_v58 = vld [vmem:[#allocation2 + $0x3a4] ss:$16 sps:$4 sm:$0xff]   ;;  %v6819_v59 = vld [vmem:[#allocation2 + $0x3ac] ss:$16 sps:$4 sm:$0xff]  }
  0xe3   : > { %2049 = vmatpush1.bf16.msra.mxu0 %v6728_v60  ;;  %2213 = vmatpush1.bf16.msra.mxu1 %v6729_v61  ;;  %v6814_v60 = vld [vmem:[#allocation2 + $0x3a0] ss:$16 sps:$4 sm:$0xff]   ;;  %v6817_v61 = vld [vmem:[#allocation2 + $0x3a8] ss:$16 sps:$4 sm:$0xff]  }
  0xe4   : > { %2050 = vmatprep.subr.bf16.mxu0 %v6730_v62  ;;  %2214 = vmatprep.subr.bf16.mxu1 %v6732_v63  ;;  %v6822_v62 = vld [vmem:[#allocation2 + $0x3c4] ss:$16 sps:$4 sm:$0xff]   ;;  %v6825_v63 = vld [vmem:[#allocation2 + $0x3cc] ss:$16 sps:$4 sm:$0xff]  }
  0xe7   : > { %2051 = vmatpush1.bf16.msra.mxu0 %v6734_v0  ;;  %2215 = vmatpush1.bf16.msra.mxu1 %v6735_v1  ;;  %v6820_v0 = vld [vmem:[#allocation2 + $0x3c0] ss:$16 sps:$4 sm:$0xff]   ;;  %v6823_v1 = vld [vmem:[#allocation2 + $0x3c8] ss:$16 sps:$4 sm:$0xff]  }
  0xe8   : > { %2061 = vmatprep.subr.bf16.mxu0 %v6738_v3  ;;  %2225 = vmatprep.subr.bf16.mxu1 %v6741_v4  ;;  %v6831_v3 = vld [vmem:[#allocation2 + $0x3ec] ss:$16 sps:$4 sm:$0xff]   ;;  %v6826_v4 = vld [vmem:[#allocation2 + $0x3e0] ss:$16 sps:$4 sm:$0xff]  }
  0xea   : > { %2053 = vmatmul.mubr.bf16.vlgmr.msra.gmra.mrb[0].mxu0 %v647_v5  ;;  %2217 = vmatmul.mubr.bf16.vlgmr.msra.gmra.mrb[0].mxu1 %v647_v5  ;;  %v6829_v5 = vld [vmem:[#allocation2 + $0x3e8] ss:$16 sps:$4 sm:$0xff]  }
  0xeb   : > { %2062 = vmatpush1.bf16.msra.mxu0 %v6736_v6  ;;  %2226 = vmatpush1.bf16.msra.mxu1 %v6739_v7  ;;  %v6834_v6 = vld [vmem:[#allocation2 + $0x404] ss:$16 sps:$4 sm:$0xff]  }
  0xec   : > { %2063 = vmatprep.subr.bf16.mxu0 %v6744_v8  ;;  %2227 = vmatprep.subr.bf16.mxu1 %v6747_v9  ;;  %v642_v7 = vld [vmem:[%s8117_s19 + $0x10] sm:$0xff]  ;;  %v6837_v8 = vld [vmem:[#allocation2 + $0x40c] ss:$16 sps:$4 sm:$0xff]  }
  0xed   : > { %2093 = vmatprep.mubr.bf16.mxu0 %v650_v32  ;;  %2257 = vmatprep.mubr.bf16.mxu1 %v650_v32  ;;  %v6832_v9 = vld [vmem:[#allocation2 + $0x400] ss:$16 sps:$4 sm:$0xff]  }
  0xee   : > { %v6862_v32 = vld [vmem:[#allocation2 + $0x4a0] ss:$16 sps:$4 sm:$0xff]  }
  0xef   : > { %2064 = vmatpush1.bf16.msra.mxu0 %v6742_v10  ;;  %2228 = vmatpush1.bf16.msra.mxu1 %v6745_v11  ;;  %v6835_v10 = vld [vmem:[#allocation2 + $0x408] ss:$16 sps:$4 sm:$0xff]   ;;  %v649_v11 = vpack.c.bf16 %v642_v7, %v642_v7  ;;  %v6927_v7 = vld [vmem:[#allocation2 + $0x5ec] ss:$16 sps:$4 sm:$0xff]  }
  0xf0   : > { %2065 = vmatprep.subr.bf16.mxu0 %v6750_v12  ;;  %2229 = vmatprep.subr.bf16.mxu1 %v6753_v13  ;;  %v6840_v12 = vld [vmem:[#allocation2 + $0x424] ss:$16 sps:$4 sm:$0xff]   ;;  %v6843_v13 = vld [vmem:[#allocation2 + $0x42c] ss:$16 sps:$4 sm:$0xff]  }
  0xf3   : > { %2066 = vmatpush1.bf16.msra.mxu0 %v6748_v14  ;;  %2230 = vmatpush1.bf16.msra.mxu1 %v6751_v15  ;;  %v645_v14 = vld [vmem:[%s8117_s19 + $0x28] sm:$0xff] }
  0xf4   : > { %2067 = vmatprep.subr.bf16.mxu0 %v6756_v16  ;;  %2231 = vmatprep.subr.bf16.mxu1 %v6759_v17  ;;  %v652_v15 = vpack.c.bf16 %v645_v14, %v645_v14  ;;  %v6838_v16 = vld [vmem:[#allocation2 + $0x420] ss:$16 sps:$4 sm:$0xff]   ;;  %v6841_v17 = vld [vmem:[#allocation2 + $0x428] ss:$16 sps:$4 sm:$0xff]  }
  0xf5   : > { %v6931_v14 = vld [vmem:[#allocation2 + $0x608] ss:$16 sps:$4 sm:$0xff]  }
  0xf7   : > { %2068 = vmatpush1.bf16.msra.mxu0 %v6754_v18  ;;  %2232 = vmatpush1.bf16.msra.mxu1 %v6757_v19  ;;  %v6846_v18 = vld [vmem:[#allocation2 + $0x444] ss:$16 sps:$4 sm:$0xff]   ;;  %v6849_v19 = vld [vmem:[#allocation2 + $0x44c] ss:$16 sps:$4 sm:$0xff]  }
  0xf8   : > { %2069 = vmatprep.subr.bf16.mxu0 %v6762_v20  ;;  %2233 = vmatprep.subr.bf16.mxu1 %v6765_v21  ;;  %v6844_v20 = vld [vmem:[#allocation2 + $0x440] ss:$16 sps:$4 sm:$0xff]   ;;  %v6847_v21 = vld [vmem:[#allocation2 + $0x448] ss:$16 sps:$4 sm:$0xff]  }
  0xfb   : > { %2070 = vmatpush1.bf16.msra.mxu0 %v6760_v22  ;;  %2234 = vmatpush1.bf16.msra.mxu1 %v6763_v23  ;;  %v6852_v22 = vld [vmem:[#allocation2 + $0x464] ss:$16 sps:$4 sm:$0xff]   ;;  %v6855_v23 = vld [vmem:[#allocation2 + $0x46c] ss:$16 sps:$4 sm:$0xff]  }
  0xfc   : > { %2071 = vmatprep.subr.bf16.mxu0 %v6768_v24  ;;  %2235 = vmatprep.subr.bf16.mxu1 %v6771_v25  ;;  %v6850_v24 = vld [vmem:[#allocation2 + $0x460] ss:$16 sps:$4 sm:$0xff]   ;;  %v6853_v25 = vld [vmem:[#allocation2 + $0x468] ss:$16 sps:$4 sm:$0xff]  }
  0xff   : > { %2072 = vmatpush1.bf16.msra.mxu0 %v6766_v26  ;;  %2236 = vmatpush1.bf16.msra.mxu1 %v6769_v27  ;;  %v6858_v26 = vld [vmem:[#allocation2 + $0x484] ss:$16 sps:$4 sm:$0xff]   ;;  %v6861_v27 = vld [vmem:[#allocation2 + $0x48c] ss:$16 sps:$4 sm:$0xff]  }
 0x100   : > { %2073 = vmatprep.subr.bf16.mxu0 %v6774_v28  ;;  %2237 = vmatprep.subr.bf16.mxu1 %v6777_v29  ;;  %v6856_v28 = vld [vmem:[#allocation2 + $0x480] ss:$16 sps:$4 sm:$0xff]   ;;  %v6859_v29 = vld [vmem:[#allocation2 + $0x488] ss:$16 sps:$4 sm:$0xff]  }
 0x103   : > { %2074 = vmatpush1.bf16.msra.mxu0 %v6772_v31  ;;  %2238 = vmatpush1.bf16.msra.mxu1 %v6775_v33  ;;  %v6867_v31 = vld [vmem:[#allocation2 + $0x4ac] ss:$16 sps:$4 sm:$0xff]   ;;  %v6865_v33 = vld [vmem:[#allocation2 + $0x4a8] ss:$16 sps:$4 sm:$0xff]  }
 0x104   : > { %2075 = vmatprep.subr.bf16.mxu0 %v6780_v34  ;;  %2239 = vmatprep.subr.bf16.mxu1 %v6783_v35  ;;  %v6870_v34 = vld [vmem:[#allocation2 + $0x4c4] ss:$16 sps:$4 sm:$0xff]   ;;  %v6873_v35 = vld [vmem:[#allocation2 + $0x4cc] ss:$16 sps:$4 sm:$0xff]  }
 0x107   : > { %2076 = vmatpush1.bf16.msra.mxu0 %v6778_v36  ;;  %2240 = vmatpush1.bf16.msra.mxu1 %v6781_v37  ;;  %v6868_v36 = vld [vmem:[#allocation2 + $0x4c0] ss:$16 sps:$4 sm:$0xff]   ;;  %v6871_v37 = vld [vmem:[#allocation2 + $0x4c8] ss:$16 sps:$4 sm:$0xff]  }
 0x108   : > { %2077 = vmatprep.subr.bf16.mxu0 %v6786_v38  ;;  %2241 = vmatprep.subr.bf16.mxu1 %v6789_v39  ;;  %v6876_v38 = vld [vmem:[#allocation2 + $0x4e4] ss:$16 sps:$4 sm:$0xff]   ;;  %v6879_v39 = vld [vmem:[#allocation2 + $0x4ec] ss:$16 sps:$4 sm:$0xff]  }
 0x10b   : > { %2078 = vmatpush1.bf16.msra.mxu0 %v6784_v40  ;;  %2242 = vmatpush1.bf16.msra.mxu1 %v6787_v41  ;;  %v6874_v40 = vld [vmem:[#allocation2 + $0x4e0] ss:$16 sps:$4 sm:$0xff]   ;;  %v6877_v41 = vld [vmem:[#allocation2 + $0x4e8] ss:$16 sps:$4 sm:$0xff]  }
 0x10c   : > { %2079 = vmatprep.subr.bf16.mxu0 %v6792_v42  ;;  %2243 = vmatprep.subr.bf16.mxu1 %v6795_v43  ;;  %v6882_v42 = vld [vmem:[#allocation2 + $0x504] ss:$16 sps:$4 sm:$0xff]   ;;  %v6885_v43 = vld [vmem:[#allocation2 + $0x50c] ss:$16 sps:$4 sm:$0xff]  }
 0x10f   : > { %2080 = vmatpush1.bf16.msra.mxu0 %v6790_v44  ;;  %2244 = vmatpush1.bf16.msra.mxu1 %v6793_v45  ;;  %v6880_v44 = vld [vmem:[#allocation2 + $0x500] ss:$16 sps:$4 sm:$0xff]   ;;  %v6883_v45 = vld [vmem:[#allocation2 + $0x508] ss:$16 sps:$4 sm:$0xff]  }
 0x110   : > { %2081 = vmatprep.subr.bf16.mxu0 %v6798_v46  ;;  %2245 = vmatprep.subr.bf16.mxu1 %v6801_v47  ;;  %v6888_v46 = vld [vmem:[#allocation2 + $0x524] ss:$16 sps:$4 sm:$0xff]   ;;  %v6891_v47 = vld [vmem:[#allocation2 + $0x52c] ss:$16 sps:$4 sm:$0xff]  }
 0x113   : > { %2082 = vmatpush1.bf16.msra.mxu0 %v6796_v48  ;;  %2246 = vmatpush1.bf16.msra.mxu1 %v6799_v49  ;;  %v6886_v48 = vld [vmem:[#allocation2 + $0x520] ss:$16 sps:$4 sm:$0xff]   ;;  %v6889_v49 = vld [vmem:[#allocation2 + $0x528] ss:$16 sps:$4 sm:$0xff]  }
 0x114   : > { %2083 = vmatprep.subr.bf16.mxu0 %v6804_v50  ;;  %2247 = vmatprep.subr.bf16.mxu1 %v6807_v51  ;;  %v6894_v50 = vld [vmem:[#allocation2 + $0x544] ss:$16 sps:$4 sm:$0xff]   ;;  %v6897_v51 = vld [vmem:[#allocation2 + $0x54c] ss:$16 sps:$4 sm:$0xff]  }
 0x117   : > { %2084 = vmatpush1.bf16.msra.mxu0 %v6802_v52  ;;  %2248 = vmatpush1.bf16.msra.mxu1 %v6805_v53  ;;  %v6892_v52 = vld [vmem:[#allocation2 + $0x540] ss:$16 sps:$4 sm:$0xff]   ;;  %v6895_v53 = vld [vmem:[#allocation2 + $0x548] ss:$16 sps:$4 sm:$0xff]  }
 0x118   : > { %2085 = vmatprep.subr.bf16.mxu0 %v6810_v54  ;;  %2249 = vmatprep.subr.bf16.mxu1 %v6813_v55  ;;  %v6900_v54 = vld [vmem:[#allocation2 + $0x564] ss:$16 sps:$4 sm:$0xff]   ;;  %v6903_v55 = vld [vmem:[#allocation2 + $0x56c] ss:$16 sps:$4 sm:$0xff]  }
 0x11b   : > { %2086 = vmatpush1.bf16.msra.mxu0 %v6808_v56  ;;  %2250 = vmatpush1.bf16.msra.mxu1 %v6811_v57  ;;  %v6898_v56 = vld [vmem:[#allocation2 + $0x560] ss:$16 sps:$4 sm:$0xff]   ;;  %v6901_v57 = vld [vmem:[#allocation2 + $0x568] ss:$16 sps:$4 sm:$0xff]  }
 0x11c   : > { %2087 = vmatprep.subr.bf16.mxu0 %v6816_v58  ;;  %2251 = vmatprep.subr.bf16.mxu1 %v6819_v59  ;;  %v6906_v58 = vld [vmem:[#allocation2 + $0x584] ss:$16 sps:$4 sm:$0xff]   ;;  %v6909_v59 = vld [vmem:[#allocation2 + $0x58c] ss:$16 sps:$4 sm:$0xff]  }
 0x11f   : > { %2088 = vmatpush1.bf16.msra.mxu0 %v6814_v60  ;;  %2252 = vmatpush1.bf16.msra.mxu1 %v6817_v61  ;;  %v6904_v60 = vld [vmem:[#allocation2 + $0x580] ss:$16 sps:$4 sm:$0xff]   ;;  %v6907_v61 = vld [vmem:[#allocation2 + $0x588] ss:$16 sps:$4 sm:$0xff]  }
 0x120   : > { %2089 = vmatprep.subr.bf16.mxu0 %v6822_v62  ;;  %2253 = vmatprep.subr.bf16.mxu1 %v6825_v63  ;;  %v6912_v62 = vld [vmem:[#allocation2 + $0x5a4] ss:$16 sps:$4 sm:$0xff]   ;;  %v6915_v63 = vld [vmem:[#allocation2 + $0x5ac] ss:$16 sps:$4 sm:$0xff]  }
 0x123   : > { %2090 = vmatpush1.bf16.msra.mxu0 %v6820_v0  ;;  %2254 = vmatpush1.bf16.msra.mxu1 %v6823_v1  ;;  %v6910_v0 = vld [vmem:[#allocation2 + $0x5a0] ss:$16 sps:$4 sm:$0xff]   ;;  %v6913_v1 = vld [vmem:[#allocation2 + $0x5a8] ss:$16 sps:$4 sm:$0xff]  }
 0x124   : > { %2091 = vmatprep.subr.bf16.mxu0 %v6828_v2  ;;  %2255 = vmatprep.subr.bf16.mxu1 %v6831_v3  ;;  %v6918_v2 = vld [vmem:[#allocation2 + $0x5c4] ss:$16 sps:$4 sm:$0xff]   ;;  %v6921_v3 = vld [vmem:[#allocation2 + $0x5cc] ss:$16 sps:$4 sm:$0xff]  }
 0x127   : > { %2092 = vmatpush1.bf16.msra.mxu0 %v6826_v4  ;;  %2256 = vmatpush1.bf16.msra.mxu1 %v6829_v5  ;;  %v6916_v4 = vld [vmem:[#allocation2 + $0x5c0] ss:$16 sps:$4 sm:$0xff]   ;;  %v6919_v5 = vld [vmem:[#allocation2 + $0x5c8] ss:$16 sps:$4 sm:$0xff]  }
 0x128   : > { %2102 = vmatprep.subr.bf16.mxu0 %v6834_v6  ;;  %2266 = vmatprep.subr.bf16.mxu1 %v6837_v8  ;;  %v6924_v6 = vld [vmem:[#allocation2 + $0x5e4] ss:$16 sps:$4 sm:$0xff]   ;;  %v6922_v8 = vld [vmem:[#allocation2 + $0x5e0] ss:$16 sps:$4 sm:$0xff]  }
 0x12a   : > { %2094 = vmatmul.mubr.bf16.vlgmr.msra.gmra.mrb[0].mxu0 %v649_v11  ;;  %2258 = vmatmul.mubr.bf16.vlgmr.msra.gmra.mrb[0].mxu1 %v649_v11  ;;  %v6930_v11 = vld [vmem:[#allocation2 + $0x604] ss:$16 sps:$4 sm:$0xff]  }
 0x12b   : > { %2103 = vmatpush1.bf16.msra.mxu0 %v6832_v9  ;;  %2267 = vmatpush1.bf16.msra.mxu1 %v6835_v10  ;;  %v6925_v9 = vld [vmem:[#allocation2 + $0x5e8] ss:$16 sps:$4 sm:$0xff]   ;;  %v644_v10 = vld [vmem:[%s8117_s19 + $0x20] sm:$0xff] }
 0x12c   : > { %2104 = vmatprep.subr.bf16.mxu0 %v6840_v12  ;;  %2268 = vmatprep.subr.bf16.mxu1 %v6843_v13  ;;  %v6933_v12 = vld [vmem:[#allocation2 + $0x60c] ss:$16 sps:$4 sm:$0xff]   ;;  %v6928_v13 = vld [vmem:[#allocation2 + $0x600] ss:$16 sps:$4 sm:$0xff]  }
 0x12d   : > { %2134 = vmatprep.mubr.bf16.mxu0 %v652_v15  ;;  %2298 = vmatprep.mubr.bf16.mxu1 %v652_v15  ;;  %v651_v15 = vpack.c.bf16 %v644_v10, %v644_v10  ;;  %v7015_v10 = vld [vmem:[#allocation7 + $0xd0] ss:$8 sps:$4 sm:$0xff]  }
 0x12f   : > { %2105 = vmatpush1.bf16.msra.mxu0 %v6838_v16  ;;  %2269 = vmatpush1.bf16.msra.mxu1 %v6841_v17  ;;  %v6936_v16 = vld [vmem:[#allocation2 + $0x624] ss:$16 sps:$4 sm:$0xff]   ;;  %v6939_v17 = vld [vmem:[#allocation2 + $0x62c] ss:$16 sps:$4 sm:$0xff]  }
 0x130   : > { %2106 = vmatprep.subr.bf16.mxu0 %v6846_v18  ;;  %2270 = vmatprep.subr.bf16.mxu1 %v6849_v19  ;;  %v6934_v18 = vld [vmem:[#allocation2 + $0x620] ss:$16 sps:$4 sm:$0xff]   ;;  %v6937_v19 = vld [vmem:[#allocation2 + $0x628] ss:$16 sps:$4 sm:$0xff]  }
 0x133   : > { %2107 = vmatpush1.bf16.msra.mxu0 %v6844_v20  ;;  %2271 = vmatpush1.bf16.msra.mxu1 %v6847_v21  ;;  %v6942_v20 = vld [vmem:[#allocation2 + $0x644] ss:$16 sps:$4 sm:$0xff]   ;;  %v6945_v21 = vld [vmem:[#allocation2 + $0x64c] ss:$16 sps:$4 sm:$0xff]  }
 0x134   : > { %2108 = vmatprep.subr.bf16.mxu0 %v6852_v22  ;;  %2272 = vmatprep.subr.bf16.mxu1 %v6855_v23  ;;  %v6940_v22 = vld [vmem:[#allocation2 + $0x640] ss:$16 sps:$4 sm:$0xff]   ;;  %v6943_v23 = vld [vmem:[#allocation2 + $0x648] ss:$16 sps:$4 sm:$0xff]  }
 0x137   : > { %2109 = vmatpush1.bf16.msra.mxu0 %v6850_v24  ;;  %2273 = vmatpush1.bf16.msra.mxu1 %v6853_v25  ;;  %v7837_v24 = vmov 0   ;;  %v6948_v25 = vld [vmem:[#allocation2 + $0x664] ss:$16 sps:$4 sm:$0xff]  }
 0x138   : > { %2110 = vmatprep.subr.bf16.mxu0 %v6858_v26  ;;  %2274 = vmatprep.subr.bf16.mxu1 %v6861_v27  ;;  %v6951_v26 = vld [vmem:[#allocation2 + $0x66c] ss:$16 sps:$4 sm:$0xff]   ;;  %v6946_v27 = vld [vmem:[#allocation2 + $0x660] ss:$16 sps:$4 sm:$0xff]  }
 0x13b   : > { %2111 = vmatpush1.bf16.msra.mxu0 %v6856_v28  ;;  %2275 = vmatpush1.bf16.msra.mxu1 %v6859_v29  ;;  %v6949_v28 = vld [vmem:[#allocation2 + $0x668] ss:$16 sps:$4 sm:$0xff]   ;;  %v6954_v29 = vld [vmem:[#allocation2 + $0x684] ss:$16 sps:$4 sm:$0xff]  }
 0x13c   : > { %2112 = vmatprep.subr.bf16.mxu0 %v6864_v30  ;;  %2276 = vmatprep.subr.bf16.mxu1 %v6867_v31  ;;  %v6957_v30 = vld [vmem:[#allocation2 + $0x68c] ss:$16 sps:$4 sm:$0xff]   ;;  %v6952_v31 = vld [vmem:[#allocation2 + $0x680] ss:$16 sps:$4 sm:$0xff]  }
 0x13f   : > { %2113 = vmatpush1.bf16.msra.mxu0 %v6862_v32  ;;  %2277 = vmatpush1.bf16.msra.mxu1 %v6865_v33  ;;  %v6955_v32 = vld [vmem:[#allocation2 + $0x688] ss:$16 sps:$4 sm:$0xff]   ;;  %v6960_v33 = vld [vmem:[#allocation2 + $0x6a4] ss:$16 sps:$4 sm:$0xff]  }
 0x140   : > { %2114 = vmatprep.subr.bf16.mxu0 %v6870_v34  ;;  %2278 = vmatprep.subr.bf16.mxu1 %v6873_v35  ;;  %v6963_v34 = vld [vmem:[#allocation2 + $0x6ac] ss:$16 sps:$4 sm:$0xff]   ;;  %v6958_v35 = vld [vmem:[#allocation2 + $0x6a0] ss:$16 sps:$4 sm:$0xff]  }
 0x143   : > { %2115 = vmatpush1.bf16.msra.mxu0 %v6868_v36  ;;  %2279 = vmatpush1.bf16.msra.mxu1 %v6871_v37  ;;  %v6961_v36 = vld [vmem:[#allocation2 + $0x6a8] ss:$16 sps:$4 sm:$0xff]   ;;  %v6966_v37 = vld [vmem:[#allocation2 + $0x6c4] ss:$16 sps:$4 sm:$0xff]  }
 0x144   : > { %2116 = vmatprep.subr.bf16.mxu0 %v6876_v38  ;;  %2280 = vmatprep.subr.bf16.mxu1 %v6879_v39  ;;  %v6969_v38 = vld [vmem:[#allocation2 + $0x6cc] ss:$16 sps:$4 sm:$0xff]   ;;  %v6964_v39 = vld [vmem:[#allocation2 + $0x6c0] ss:$16 sps:$4 sm:$0xff]  }
 0x147   : > { %2117 = vmatpush1.bf16.msra.mxu0 %v6874_v40  ;;  %2281 = vmatpush1.bf16.msra.mxu1 %v6877_v41  ;;  %v6967_v40 = vld [vmem:[#allocation2 + $0x6c8] ss:$16 sps:$4 sm:$0xff]   ;;  %v6972_v41 = vld [vmem:[#allocation2 + $0x6e4] ss:$16 sps:$4 sm:$0xff]  }
 0x148   : > { %2118 = vmatprep.subr.bf16.mxu0 %v6882_v42  ;;  %2282 = vmatprep.subr.bf16.mxu1 %v6885_v43  ;;  %v6975_v42 = vld [vmem:[#allocation2 + $0x6ec] ss:$16 sps:$4 sm:$0xff]   ;;  %v6970_v43 = vld [vmem:[#allocation2 + $0x6e0] ss:$16 sps:$4 sm:$0xff]  }
 0x14b   : > { %2119 = vmatpush1.bf16.msra.mxu0 %v6880_v44  ;;  %2283 = vmatpush1.bf16.msra.mxu1 %v6883_v45  ;;  %v6973_v44 = vld [vmem:[#allocation2 + $0x6e8] ss:$16 sps:$4 sm:$0xff]   ;;  %v646_v45 = vld [vmem:[%s8117_s19 + $0x30] sm:$0xff] }
 0x14c   : > { %2120 = vmatprep.subr.bf16.mxu0 %v6888_v46  ;;  %2284 = vmatprep.subr.bf16.mxu1 %v6891_v47  ;;  %v6978_v46 = vld [vmem:[#allocation7 + $0x4] ss:$8 sps:$4 sm:$0xff]   ;;  %v6976_v47 = vld [vmem:[#allocation7] ss:$8 sps:$4 sm:$0xff]  }
 0x14f   : > { %2121 = vmatpush1.bf16.msra.mxu0 %v6886_v48  ;;  %2285 = vmatpush1.bf16.msra.mxu1 %v6889_v49  ;;  %v653_v48 = vpack.c.bf16 %v646_v45, %v646_v45  ;;  %v6981_v49 = vld [vmem:[#allocation7 + $0x14] ss:$8 sps:$4 sm:$0xff]  }
 0x150   : > { %2122 = vmatprep.subr.bf16.mxu0 %v6894_v50  ;;  %2286 = vmatprep.subr.bf16.mxu1 %v6897_v51  ;;  %v6979_v50 = vld [vmem:[#allocation7 + $0x10] ss:$8 sps:$4 sm:$0xff]   ;;  %v6984_v51 = vld [vmem:[#allocation7 + $0x24] ss:$8 sps:$4 sm:$0xff]  }
 0x153   : > { %2123 = vmatpush1.bf16.msra.mxu0 %v6892_v52  ;;  %2287 = vmatpush1.bf16.msra.mxu1 %v6895_v53  ;;  %v6982_v52 = vld [vmem:[#allocation7 + $0x20] ss:$8 sps:$4 sm:$0xff]   ;;  %v6987_v53 = vld [vmem:[#allocation7 + $0x34] ss:$8 sps:$4 sm:$0xff]  }
 0x154   : > { %2124 = vmatprep.subr.bf16.mxu0 %v6900_v54  ;;  %2288 = vmatprep.subr.bf16.mxu1 %v6903_v55  ;;  %v6985_v54 = vld [vmem:[#allocation7 + $0x30] ss:$8 sps:$4 sm:$0xff]   ;;  %v6990_v55 = vld [vmem:[#allocation7 + $0x44] ss:$8 sps:$4 sm:$0xff]  }
 0x157   : > { %2125 = vmatpush1.bf16.msra.mxu0 %v6898_v56  ;;  %2289 = vmatpush1.bf16.msra.mxu1 %v6901_v57  ;;  %v6988_v56 = vld [vmem:[#allocation7 + $0x40] ss:$8 sps:$4 sm:$0xff]   ;;  %v6993_v57 = vld [vmem:[#allocation7 + $0x54] ss:$8 sps:$4 sm:$0xff]  }
 0x158   : > { %2126 = vmatprep.subr.bf16.mxu0 %v6906_v58  ;;  %2290 = vmatprep.subr.bf16.mxu1 %v6909_v59  ;;  %v6991_v58 = vld [vmem:[#allocation7 + $0x50] ss:$8 sps:$4 sm:$0xff]   ;;  %v6996_v59 = vld [vmem:[#allocation7 + $0x64] ss:$8 sps:$4 sm:$0xff]  }
 0x15b   : > { %2127 = vmatpush1.bf16.msra.mxu0 %v6904_v60  ;;  %2291 = vmatpush1.bf16.msra.mxu1 %v6907_v61  ;;  %v6994_v60 = vld [vmem:[#allocation7 + $0x60] ss:$8 sps:$4 sm:$0xff]   ;;  %v6999_v61 = vld [vmem:[#allocation7 + $0x74] ss:$8 sps:$4 sm:$0xff]  }
 0x15c   : > { %2128 = vmatprep.subr.bf16.mxu0 %v6912_v62  ;;  %2292 = vmatprep.subr.bf16.mxu1 %v6915_v63  ;;  %v6997_v62 = vld [vmem:[#allocation7 + $0x70] ss:$8 sps:$4 sm:$0xff]   ;;  %v7002_v63 = vld [vmem:[#allocation7 + $0x84] ss:$8 sps:$4 sm:$0xff]  }
 0x15f   : > { %2129 = vmatpush1.bf16.msra.mxu0 %v6910_v0  ;;  %2293 = vmatpush1.bf16.msra.mxu1 %v6913_v1  ;;  %v7000_v0 = vld [vmem:[#allocation7 + $0x80] ss:$8 sps:$4 sm:$0xff]   ;;  %v7005_v1 = vld [vmem:[#allocation7 + $0x94] ss:$8 sps:$4 sm:$0xff]  }
 0x160   : > { %2130 = vmatprep.subr.bf16.mxu0 %v6918_v2  ;;  %2294 = vmatprep.subr.bf16.mxu1 %v6921_v3  ;;  %v7003_v2 = vld [vmem:[#allocation7 + $0x90] ss:$8 sps:$4 sm:$0xff]   ;;  %v7008_v3 = vld [vmem:[#allocation7 + $0xa4] ss:$8 sps:$4 sm:$0xff]  }
 0x163   : > { %2131 = vmatpush1.bf16.msra.mxu0 %v6916_v4  ;;  %2295 = vmatpush1.bf16.msra.mxu1 %v6919_v5  ;;  %v7006_v4 = vld [vmem:[#allocation7 + $0xa0] ss:$8 sps:$4 sm:$0xff]   ;;  %v7011_v5 = vld [vmem:[#allocation7 + $0xb4] ss:$8 sps:$4 sm:$0xff]  }
 0x164   : > { %2132 = vmatprep.subr.bf16.mxu0 %v6924_v6  ;;  %2296 = vmatprep.subr.bf16.mxu1 %v6927_v7  ;;  %v7009_v6 = vld [vmem:[#allocation7 + $0xb0] ss:$8 sps:$4 sm:$0xff]   ;;  %v7014_v7 = vld [vmem:[#allocation7 + $0xc4] ss:$8 sps:$4 sm:$0xff]  }
 0x167   : > { %2133 = vmatpush1.bf16.msra.mxu0 %v6922_v8  ;;  %2297 = vmatpush1.bf16.msra.mxu1 %v6925_v9  ;;  %v7012_v8 = vld [vmem:[#allocation7 + $0xc0] ss:$8 sps:$4 sm:$0xff]   ;;  %v7017_v9 = vld [vmem:[#allocation7 + $0xd4] ss:$8 sps:$4 sm:$0xff]  }
 0x168   : > { %2143 = vmatprep.subr.bf16.mxu0 %v6930_v11  ;;  %2307 = vmatprep.subr.bf16.mxu1 %v6933_v12  ;;  %v7020_v11 = vld [vmem:[#allocation7 + $0xe4] ss:$8 sps:$4 sm:$0xff]   ;;  %v7018_v12 = vld [vmem:[#allocation7 + $0xe0] ss:$8 sps:$4 sm:$0xff]  }
 0x16a   : > { %2135 = vmatmul.mubr.bf16.vlgmr.msra.gmra.mrb[0].mxu0 %v651_v15  ;;  %2299 = vmatmul.mubr.bf16.vlgmr.msra.gmra.mrb[0].mxu1 %v651_v15  ;;  %v7026_v15 = vld [vmem:[#allocation7 + $0x104] ss:$8 sps:$4 sm:$0xff]  }
 0x16b   : > { %2144 = vmatpush1.bf16.msra.mxu0 %v6928_v13  ;;  %2308 = vmatpush1.bf16.msra.mxu1 %v6931_v14  ;;  %v7023_v13 = vld [vmem:[#allocation7 + $0xf4] ss:$8 sps:$4 sm:$0xff]   ;;  %v7021_v14 = vld [vmem:[#allocation7 + $0xf0] ss:$8 sps:$4 sm:$0xff]  }
 0x16c   : > { %2145 = vmatprep.subr.bf16.mxu0 %v6936_v16  ;;  %2309 = vmatprep.subr.bf16.mxu1 %v6939_v17  ;;  %v7072_v16 = vld [vmem:[%s8449_s7 + $0x40] sm:$0xff]  }
 0x16d   : > { %2175 = vmatprep.mubr.bf16.mxu0 %v7837_v24  ;;  %2339 = vmatprep.mubr.bf16.mxu1 %v7837_v24  ;;  %v7073_v17 = vld [vmem:[%s8449_s7] sm:$0xff]  }
 0x16f   : > { %2146 = vmatpush1.bf16.msra.mxu0 %v6934_v18  ;;  %2310 = vmatpush1.bf16.msra.mxu1 %v6937_v19  ;;  %v7074_v18 = vld [vmem:[%s8449_s7 + $0x48] sm:$0xff]  }
 0x170   : > { %2147 = vmatprep.subr.bf16.mxu0 %v6942_v20  ;;  %2311 = vmatprep.subr.bf16.mxu1 %v6945_v21  ;;  %v7075_v19 = vld [vmem:[%s8449_s7 + $0x8] sm:$0xff]   ;;  %v7076_v20 = vld [vmem:[%s8449_s7 + $0x50] sm:$0xff]  }
 0x171   : > { %v7077_v21 = vld [vmem:[%s8449_s7 + $0x10] sm:$0xff]  }
 0x173   : > { %2148 = vmatpush1.bf16.msra.mxu0 %v6940_v22  ;;  %2312 = vmatpush1.bf16.msra.mxu1 %v6943_v23  ;;  %v7078_v22 = vld [vmem:[%s8449_s7 + $0x58] sm:$0xff]  }
 0x174   : > { %2149 = vmatprep.subr.bf16.mxu0 %v6948_v25  ;;  %2313 = vmatprep.subr.bf16.mxu1 %v6951_v26  ;;  %v7079_v23 = vld [vmem:[%s8449_s7 + $0x18] sm:$0xff]   ;;  %v7080_v25 = vld [vmem:[%s8449_s7 + $0x60] sm:$0xff]  }
 0x175   : > { %v7081_v26 = vld [vmem:[%s8449_s7 + $0x20] sm:$0xff]  }
 0x177   : > { %2150 = vmatpush1.bf16.msra.mxu0 %v6946_v27  ;;  %2314 = vmatpush1.bf16.msra.mxu1 %v6949_v28  ;;  %v7082_v27 = vld [vmem:[%s8449_s7 + $0x68] sm:$0xff]  }
 0x178   : > { %2151 = vmatprep.subr.bf16.mxu0 %v6954_v29  ;;  %2315 = vmatprep.subr.bf16.mxu1 %v6957_v30  ;;  %v7083_v28 = vld [vmem:[%s8449_s7 + $0x28] sm:$0xff]   ;;  %v880_v29 = vlaneseq }
 0x17a   : > { %v8165_v30 = vshrl.u32 %v880_v29, 7 }
 0x17b   : > { %2152 = vmatpush1.bf16.msra.mxu0 %v6952_v31  ;;  %2316 = vmatpush1.bf16.msra.mxu1 %v6955_v32  ;;  %v8170_v32 = vld [vmem:[#allocation5] sm:$0xf] }
 0x17c   : > { %2153 = vmatprep.subr.bf16.mxu0 %v6960_v33  ;;  %2317 = vmatprep.subr.bf16.mxu1 %v6963_v34  ;;  %v8168_v31 = vsub.s32 0, %v8165_v30  ;;  %v8173_v33 = vsub.s32 1, %v8165_v30  ;;  %v8176_v34 = vsub.s32 3, %v8165_v30 }
 0x17f   : > { %2154 = vmatpush1.bf16.msra.mxu0 %v6958_v35  ;;  %2318 = vmatpush1.bf16.msra.mxu1 %v6961_v36  ;;  %v883_v35 = vrot.slane %v8170_v32, %v8168_v31  ;;  %v887_v36 = vrot.slane %v8170_v32, %v8173_v33 }
 0x180   : > { %2155 = vmatprep.subr.bf16.mxu0 %v6966_v37  ;;  %2319 = vmatprep.subr.bf16.mxu1 %v6969_v38  ;;  %v895_v37 = vrot.slane %v8170_v32, %v8176_v34 }
 0x183   : > { %2156 = vmatpush1.bf16.msra.mxu0 %v6964_v39  ;;  %2320 = vmatpush1.bf16.msra.mxu1 %v6967_v40 }
 0x184   : > { %2157 = vmatprep.subr.bf16.mxu0 %v6972_v41  ;;  %2321 = vmatprep.subr.bf16.mxu1 %v6975_v42 }
 0x187   : > { %2158 = vmatpush1.bf16.msra.mxu0 %v6970_v43  ;;  %2322 = vmatpush1.bf16.msra.mxu1 %v6973_v44 }
 0x188   : > { %2752 = vmatprep.subr.bf16.mxu0 %v6978_v46  ;;  %6414 = vmatprep.subr.bf16.mxu1 %v7072_v16  ;;  %v8187_v16 = vsub.s32 2, %v8165_v30 }
 0x18a   : > { %2176 = vmatmul.mubr.bf16.vlgmr.msra.gmra.mrb[0].mxu0 %v653_v48  ;;  %2340 = vmatmul.mubr.bf16.vlgmr.msra.gmra.mrb[0].mxu1 %v653_v48 }
 0x18b   : > { %2753 = vmatpush1.bf16.msra.mxu0 %v6976_v47  ;;  %6415 = vmatpush3.bf16.msra.mxu1 %v7073_v17  ;;  %v7065_v17 = vld [vmem:[#allocation7 + $0x1d4] ss:$8 sps:$4 sm:$0xff]  }
 0x18c   : > { %2754 = vmatprep.subr.bf16.mxu0 %v6981_v49  ;;  %6416 = vmatprep.subr.bf16.mxu1 %v7074_v18  ;;  %v7063_v18 = vld [vmem:[#allocation7 + $0x1d0] ss:$8 sps:$4 sm:$0xff]  }
 0x18f   : > { %2755 = vmatpush1.bf16.msra.mxu0 %v6979_v50  ;;  %6417 = vmatpush3.bf16.msra.mxu1 %v7075_v19  ;;  %v891_v19 = vrot.slane %v8170_v32, %v8187_v16  ;;  %v7085_v32 = vld [vmem:[%s8449_s7 + $0x30] sm:$0xff]  }
 0x190   : > { %2756 = vmatprep.subr.bf16.mxu0 %v6984_v51  ;;  %6418 = vmatprep.subr.bf16.mxu1 %v7076_v20  ;;  %v7068_v20 = vld [vmem:[#allocation7 + $0x1e4] ss:$8 sps:$4 sm:$0xff]  }
 0x193   : > { %2757 = vmatpush1.bf16.msra.mxu0 %v6982_v52  ;;  %6419 = vmatpush3.bf16.msra.mxu1 %v7077_v21  ;;  %v7066_v21 = vld [vmem:[#allocation7 + $0x1e0] ss:$8 sps:$4 sm:$0xff]  }
 0x194   : > { %2758 = vmatprep.subr.bf16.mxu0 %v6987_v53  ;;  %6420 = vmatprep.subr.bf16.mxu1 %v7078_v22  ;;  %v7024_v53 = vld [vmem:[#allocation7 + $0x100] ss:$8 sps:$4 sm:$0xff]  }
 0x197   : > { %2759 = vmatpush1.bf16.msra.mxu0 %v6985_v54  ;;  %6421 = vmatpush3.bf16.msra.mxu1 %v7079_v23  ;;  %v7071_v23 = vld [vmem:[#allocation7 + $0x1f4] ss:$8 sps:$4 sm:$0xff]  }
 0x198   : > { %2760 = vmatprep.subr.bf16.mxu0 %v6990_v55  ;;  %6422 = vmatprep.subr.bf16.mxu1 %v7080_v25  ;;  %v7029_v55 = vld [vmem:[#allocation7 + $0x114] ss:$8 sps:$4 sm:$0xff]   ;;  %v7069_v25 = vld [vmem:[#allocation7 + $0x1f0] ss:$8 sps:$4 sm:$0xff]  }
 0x19b   : > { %2761 = vmatpush1.bf16.msra.mxu0 %v6988_v56  ;;  %6423 = vmatpush3.bf16.msra.mxu1 %v7081_v26 }
 0x19c   : > { %2762 = vmatprep.subr.bf16.mxu0 %v6993_v57  ;;  %6424 = vmatprep.subr.bf16.mxu1 %v7082_v27  ;;  %v7027_v57 = vld [vmem:[#allocation7 + $0x110] ss:$8 sps:$4 sm:$0xff]  }
 0x19f   : > { %2763 = vmatpush1.bf16.msra.mxu0 %v6991_v58  ;;  %6425 = vmatpush3.bf16.msra.mxu1 %v7083_v28  ;;  %v7032_v58 = vld [vmem:[#allocation7 + $0x124] ss:$8 sps:$4 sm:$0xff]  }
 0x1a0   : > { %2764 = vmatprep.subr.bf16.mxu0 %v6996_v59  ;;  %v7030_v59 = vld [vmem:[#allocation7 + $0x120] ss:$8 sps:$4 sm:$0xff]   ;;  %v7084_v28 = vld [vmem:[%s8449_s7 + $0x70] sm:$0xff]  }
 0x1a1   : > { %6426 = vmatprep.subr.bf16.mxu1 %v7084_v28  ;;  %v7115_v28 = vld [vmem:[#allocation8 + $0x100] ss:$16 sps:$4 sm:$0xff]  }
 0x1a3   : > { %2765 = vmatpush1.bf16.msra.mxu0 %v6994_v60  ;;  %v7035_v60 = vld [vmem:[#allocation7 + $0x134] ss:$8 sps:$4 sm:$0xff]   ;;  %6427 = vmatpush3.bf16.msra.mxu1 %v7085_v32 }
 0x1a4   : > { %2766 = vmatprep.subr.bf16.mxu0 %v6999_v61  ;;  %v7033_v61 = vld [vmem:[#allocation7 + $0x130] ss:$8 sps:$4 sm:$0xff]   ;;  %v7120_v32 = vld [vmem:[#allocation8 + $0x124] ss:$16 sps:$4 sm:$0xff]  }
 0x1a7   : > { %2767 = vmatpush1.bf16.msra.mxu0 %v6997_v62  ;;  %v7038_v62 = vld [vmem:[#allocation7 + $0x144] ss:$8 sps:$4 sm:$0xff]  }
 0x1a8   : > { %2768 = vmatprep.subr.bf16.mxu0 %v7002_v63  ;;  %v7036_v63 = vld [vmem:[#allocation7 + $0x140] ss:$8 sps:$4 sm:$0xff]  }
 0x1ab   : > { %2769 = vmatpush1.bf16.msra.mxu0 %v7000_v0  ;;  %v7041_v0 = vld [vmem:[#allocation7 + $0x154] ss:$8 sps:$4 sm:$0xff]  }
 0x1ac   : > { %2770 = vmatprep.subr.bf16.mxu0 %v7005_v1  ;;  %v7039_v1 = vld [vmem:[#allocation7 + $0x150] ss:$8 sps:$4 sm:$0xff]  }
 0x1af   : > { %2771 = vmatpush1.bf16.msra.mxu0 %v7003_v2  ;;  %v7044_v2 = vld [vmem:[#allocation7 + $0x164] ss:$8 sps:$4 sm:$0xff]  }
 0x1b0   : > { %2772 = vmatprep.subr.bf16.mxu0 %v7008_v3  ;;  %v7042_v3 = vld [vmem:[#allocation7 + $0x160] ss:$8 sps:$4 sm:$0xff]  }
 0x1b3   : > { %2773 = vmatpush1.bf16.msra.mxu0 %v7006_v4  ;;  %v7047_v4 = vld [vmem:[#allocation7 + $0x174] ss:$8 sps:$4 sm:$0xff]  }
 0x1b4   : > { %2774 = vmatprep.subr.bf16.mxu0 %v7011_v5  ;;  %v7045_v5 = vld [vmem:[#allocation7 + $0x170] ss:$8 sps:$4 sm:$0xff]  }
 0x1b7   : > { %2775 = vmatpush1.bf16.msra.mxu0 %v7009_v6  ;;  %v7050_v6 = vld [vmem:[#allocation7 + $0x184] ss:$8 sps:$4 sm:$0xff]  }
 0x1b8   : > { %2776 = vmatprep.subr.bf16.mxu0 %v7014_v7  ;;  %v7048_v7 = vld [vmem:[#allocation7 + $0x180] ss:$8 sps:$4 sm:$0xff]  }
 0x1bb   : > { %2777 = vmatpush1.bf16.msra.mxu0 %v7012_v8  ;;  %v7053_v8 = vld [vmem:[#allocation7 + $0x194] ss:$8 sps:$4 sm:$0xff]  }
 0x1bc   : > { %2778 = vmatprep.subr.bf16.mxu0 %v7017_v9  ;;  %v7051_v9 = vld [vmem:[#allocation7 + $0x190] ss:$8 sps:$4 sm:$0xff]  }
 0x1bf   : > { %2779 = vmatpush1.bf16.msra.mxu0 %v7015_v10  ;;  %v7056_v10 = vld [vmem:[#allocation7 + $0x1a4] ss:$8 sps:$4 sm:$0xff]  }
 0x1c0   : > { %2780 = vmatprep.subr.bf16.mxu0 %v7020_v11  ;;  %v7054_v11 = vld [vmem:[#allocation7 + $0x1a0] ss:$8 sps:$4 sm:$0xff]  }
 0x1c3   : > { %2781 = vmatpush1.bf16.msra.mxu0 %v7018_v12  ;;  %v7059_v12 = vld [vmem:[#allocation7 + $0x1b4] ss:$8 sps:$4 sm:$0xff]  }
 0x1c4   : > { %2782 = vmatprep.subr.bf16.mxu0 %v7023_v13  ;;  %v7057_v13 = vld [vmem:[#allocation7 + $0x1b0] ss:$8 sps:$4 sm:$0xff]  }
 0x1c7   : > { %2783 = vmatpush1.bf16.msra.mxu0 %v7021_v14  ;;  %v7062_v14 = vld [vmem:[#allocation7 + $0x1c4] ss:$8 sps:$4 sm:$0xff]  }
 0x1c8   : > { %2793 = vmatprep.subr.bf16.mxu0 %v7026_v15  ;;  %v7060_v15 = vld [vmem:[#allocation7 + $0x1c0] ss:$8 sps:$4 sm:$0xff]  }
 0x25d   : > { %v2177_v38 = vpop.f32.mrb[0].mxu0  ;;  %v8184_v39 = vpop.f32.mrb[0].mxu1 }
 0x25e   : > { %v6480_v40 = vadd.f32 %v2177_v38, %v883_v35  ;;  %v2179_v41 = vpop.f32.mrb[1].mxu0  ;;  %v2343_v42 = vpop.f32.mrb[1].mxu1  ;;  %v6482_v22 = vadd.f32 %v8184_v39, %v891_v19  ;;  %v7086_v35 = vld [vmem:[%s8449_s7 + $0x78] sm:$0xff]   ;;  %v7103_v19 = vld [vmem:[#allocation8 + $0x80] ss:$16 sps:$4 sm:$0xff]  }
 0x25f   : > { %v6481_v43 = vadd.f32 %v2179_v41, %v887_v36  ;;  %v6483_v44 = vadd.f32 %v2343_v42, %v895_v37  ;;  %v2181_v45 = vpop.f32.mrb[2].mxu0  ;;  %v2345_v46 = vpop.f32.mrb[2].mxu1  ;;  %v7087_v36 = vld [vmem:[%s8449_s7 + $0x38] sm:$0xff]   ;;  %6428 = vmatprep.subr.bf16.mxu1 %v7086_v35  ;;  %v2420_v37 = vld [vmem:[%s8448_s6] sm:$0x3] }
 0x260   : > { %v2348_v47 = vmax.f32 %v6480_v40, 0.0  ;;  %v2182_v48 = vpop.f32.mrb[3].mxu0  ;;  %v2346_v49 = vpop.f32.mrb[3].mxu1  ;;  %v2350_v26 = vmax.f32 %v6482_v22, 0.0  ;;  %6429 = vmatpush3.bf16.msra.mxu1 %v7087_v36  ;;  %v2425_v38 = vrot.slane %v2420_v37, %v8168_v31  ;;  %v2429_v39 = vrot.slane %v2420_v37, %v8173_v33  ;;  %v7111_v22 = vld [vmem:[#allocation8 + $0xc4] ss:$16 sps:$4 sm:$0xff]  }
 0x261   : > { %v2349_v50 = vmax.f32 %v6481_v43, 0.0  ;;  %v2351_v51 = vmax.f32 %v6483_v44, 0.0  ;;  %v7118_v35 = vld [vmem:[#allocation8 + $0x120] ss:$16 sps:$4 sm:$0xff]   ;;  %v7123_v36 = vld [vmem:[#allocation8 + $0x144] ss:$16 sps:$4 sm:$0xff]  }
 0x262   : > { %v2352_v54 = vpack.c.bf16 %v2348_v47, %v2348_v47  ;;  %v2354_v27 = vpack.c.bf16 %v2350_v26, %v2350_v26  ;;  %v7112_v26 = vld [vmem:[#allocation8 + $0xe0] ss:$16 sps:$4 sm:$0xff]  }
 0x263   : > { %v2353_v52 = vpack.c.bf16 %v2349_v50, %v2349_v50  ;;  %v2355_v56 = vpack.c.bf16 %v2351_v51, %v2351_v51  ;;  %v7088_v50 = vld [vmem:[%s8451_s9] ss:$8 sps:$4 sm:$0xff]   ;;  %v7090_v51 = vld [vmem:[%s8451_s9 + $0x4] ss:$8 sps:$4 sm:$0xff]  }
 0x264   : > { %3052 = vmatprep.subr.bf16.mxu1 %v7090_v51  ;;  %v7121_v37 = vld [vmem:[#allocation8 + $0x140] ss:$16 sps:$4 sm:$0xff]  }
 0x265   : > { %2784 = vmatprep.mubr.bf16.mxu0 %v2353_v52  ;;  %v7187_v51 = vld [vmem:[#allocation10] ss:$28 sps:$4 sm:$0xff]  }
 0x266   : > { %2785 = vmatmul.mubr.bf16.vlgmr.msra.gmra.mrb[4].mxu0 %v2352_v54 }
 0x267   : > { %2794 = vmatpush1.bf16.msra.mxu0 %v7024_v53  ;;  %2825 = vmatprep.mubr.bf16.mxu0 %v2355_v56  ;;  %v6088_v53 = vld [vmem:[%s8450_s8] ss:$0 sm:$0xff] }
 0x268   : > { %2795 = vmatprep.subr.bf16.mxu0 %v7029_v55 }
 0x26b   : > { %2796 = vmatpush1.bf16.msra.mxu0 %v7027_v57 }
 0x26c   : > { %2797 = vmatprep.subr.bf16.mxu0 %v7032_v58 }
 0x26f   : > { %2798 = vmatpush1.bf16.msra.mxu0 %v7030_v59 }
 0x270   : > { %2799 = vmatprep.subr.bf16.mxu0 %v7035_v60 }
 0x273   : > { %2800 = vmatpush1.bf16.msra.mxu0 %v7033_v61 }
 0x274   : > { %2801 = vmatprep.subr.bf16.mxu0 %v7038_v62 }
 0x277   : > { %2802 = vmatpush1.bf16.msra.mxu0 %v7036_v63  ;;  %v7093_v63 = vld [vmem:[#allocation8 + $0x4] ss:$16 sps:$4 sm:$0xff]  }
 0x278   : > { %2803 = vmatprep.subr.bf16.mxu0 %v7041_v0  ;;  %v3013_v0 = vld [vmem:[%s633_s28] sm:$0xff]  ;;  %s6534_s28 = smul.u32 896, %s7949_s25 }
 0x27a   : > { %s8372_s21 = scalar_lea.hbm %s8500_s20, %s6534_s28 }
 0x27b   : > { %2804 = vmatpush1.bf16.msra.mxu0 %v7039_v1 }
 0x27c   : > { %2805 = vmatprep.subr.bf16.mxu0 %v7044_v2 }
 0x27f   : > { %2806 = vmatpush1.bf16.msra.mxu0 %v7042_v3 }
 0x280   : > { %2807 = vmatprep.subr.bf16.mxu0 %v7047_v4 }
 0x283   : > { %2808 = vmatpush1.bf16.msra.mxu0 %v7045_v5 }
 0x284   : > { %2809 = vmatprep.subr.bf16.mxu0 %v7050_v6  ;;  %v7091_v6 = vld [vmem:[#allocation8] ss:$16 sps:$4 sm:$0xff]  }
 0x287   : > { %2810 = vmatpush1.bf16.msra.mxu0 %v7048_v7 }
 0x288   : > { %2811 = vmatprep.subr.bf16.mxu0 %v7053_v8 }
 0x28b   : > { %2812 = vmatpush1.bf16.msra.mxu0 %v7051_v9  ;;  %v7096_v9 = vld [vmem:[#allocation8 + $0x24] ss:$16 sps:$4 sm:$0xff]  }
 0x28c   : > { %2813 = vmatprep.subr.bf16.mxu0 %v7056_v10 }
 0x28f   : > { %2814 = vmatpush1.bf16.msra.mxu0 %v7054_v11 }
 0x290   : > { %2815 = vmatprep.subr.bf16.mxu0 %v7059_v12  ;;  %v7094_v12 = vld [vmem:[#allocation8 + $0x20] ss:$16 sps:$4 sm:$0xff]  }
 0x293   : > { %2816 = vmatpush1.bf16.msra.mxu0 %v7057_v13  ;;  %v7099_v13 = vld [vmem:[#allocation8 + $0x44] ss:$16 sps:$4 sm:$0xff]  }
 0x294   : > { %2817 = vmatprep.subr.bf16.mxu0 %v7062_v14  ;;  %v7097_v14 = vld [vmem:[#allocation8 + $0x40] ss:$16 sps:$4 sm:$0xff]  }
 0x297   : > { %2818 = vmatpush1.bf16.msra.mxu0 %v7060_v15  ;;  %v7102_v15 = vld [vmem:[#allocation8 + $0x64] ss:$16 sps:$4 sm:$0xff]  }
 0x298   : > { %2819 = vmatprep.subr.bf16.mxu0 %v7065_v17  ;;  %v7100_v17 = vld [vmem:[#allocation8 + $0x60] ss:$16 sps:$4 sm:$0xff]  }
 0x29b   : > { %2820 = vmatpush1.bf16.msra.mxu0 %v7063_v18  ;;  %v7105_v18 = vld [vmem:[#allocation8 + $0x84] ss:$16 sps:$4 sm:$0xff]  }
 0x29c   : > { %2821 = vmatprep.subr.bf16.mxu0 %v7068_v20  ;;  %v7108_v20 = vld [vmem:[#allocation8 + $0xa4] ss:$16 sps:$4 sm:$0xff]  }
 0x29f   : > { %2822 = vmatpush1.bf16.msra.mxu0 %v7066_v21  ;;  %v7106_v21 = vld [vmem:[#allocation8 + $0xa0] ss:$16 sps:$4 sm:$0xff]  }
 0x2a0   : > { %2823 = vmatprep.subr.bf16.mxu0 %v7071_v23  ;;  %v7109_v23 = vld [vmem:[#allocation8 + $0xc0] ss:$16 sps:$4 sm:$0xff]  }
 0x2a3   : > { %2824 = vmatpush1.bf16.msra.mxu0 %v7069_v25  ;;  %v7114_v25 = vld [vmem:[#allocation8 + $0xe4] ss:$16 sps:$4 sm:$0xff]  }
 0x2a6   : > { %2826 = vmatmul.mubr.bf16.vlgmr.msra.gmra.mrb[4].mxu0 %v2354_v27  ;;  %v7117_v27 = vld [vmem:[#allocation8 + $0x104] ss:$16 sps:$4 sm:$0xff]  }
 0x379   : > { %v2827_v40 = vpop.f32.mrb[4].mxu0 }
 0x37a   : > { %v6484_v41 = vadd.f32 %v2827_v40, %v2425_v38  ;;  %v2829_v42 = vpop.f32.mrb[5].mxu0  ;;  %v7126_v38 = vld [vmem:[#allocation8 + $0x164] ss:$16 sps:$4 sm:$0xff]  }
 0x37b   : > { %v6485_v43 = vadd.f32 %v2829_v42, %v2429_v39  ;;  %v2831_v44 = vpop.f32.mrb[6].mxu0  ;;  %v7124_v39 = vld [vmem:[#allocation8 + $0x160] ss:$16 sps:$4 sm:$0xff]   ;;  %v7129_v40 = vld [vmem:[#allocation8 + $0x184] ss:$16 sps:$4 sm:$0xff]  }
 0x37c   : > { %v2834_v45 = vmax.f32 %v6484_v41, 0.0  ;;  %v2832_v46 = vpop.f32.mrb[7].mxu0  ;;  %v7127_v41 = vld [vmem:[#allocation8 + $0x180] ss:$16 sps:$4 sm:$0xff]   ;;  %v7132_v42 = vld [vmem:[#allocation8 + $0x1a4] ss:$16 sps:$4 sm:$0xff]  }
 0x37d   : > { %v2835_v47 = vmax.f32 %v6485_v43, 0.0  ;;  %v7130_v43 = vld [vmem:[#allocation8 + $0x1a0] ss:$16 sps:$4 sm:$0xff]   ;;  %v7135_v44 = vld [vmem:[#allocation8 + $0x1c4] ss:$16 sps:$4 sm:$0xff]  }
 0x37e   : > { %v2836_v49 = vpack.c.bf16 %v2834_v45, %v2834_v45  ;;  %v7133_v45 = vld [vmem:[#allocation8 + $0x1c0] ss:$16 sps:$4 sm:$0xff]   ;;  %v7138_v46 = vld [vmem:[#allocation8 + $0x1e4] ss:$16 sps:$4 sm:$0xff]  }
 0x37f   : > { %v2837_v48 = vpack.c.bf16 %v2835_v47, %v2835_v47  ;;  %v7136_v47 = vld [vmem:[#allocation8 + $0x1e0] ss:$16 sps:$4 sm:$0xff]  }
 0x381   : > { %3005 = vmatprep.mubr.bf16.mxu1 %v2837_v48  ;;  %v7141_v48 = vld [vmem:[#allocation8 + $0xc] ss:$16 sps:$4 sm:$0xff]  }
 0x382   : > { %3006 = vmatmul.mubr.bf16.vlgmr.msra.gmra.mrb[4].mxu1 %v2836_v49 }
 0x383   : > { %3084 = vmatprep.mubr.bf16.mxu1 %v7837_v24  ;;  %3053 = vmatpush1.bf16.msra.mxu1 %v7088_v50 }
 0x384   : > { %3503 = vmatprep.subr.bf16.mxu1 %v7093_v63  ;;  %v7225_v63 = vld [vmem:[#allocation10 + $0x154] ss:$28 sps:$4 sm:$0xff]  }
 0x455   : > { %v6430_v52 = vpop.f32.mrb[4].mxu1 }
 0x456   : > { %v6431_v54 = vpop.f32.mrb[5].mxu1 }
 0x457   : > { %v6432_v55 = vadd.f32 %v6431_v54, %v6430_v52  ;;  %v6433_v56 = vpop.f32.mrb[6].mxu1  ;;  %v7189_v52 = vld [vmem:[#allocation10 + $0x4] ss:$28 sps:$4 sm:$0xff]   ;;  %v7193_v54 = vld [vmem:[#allocation10 + $0x38] ss:$28 sps:$4 sm:$0xff]  }
 0x458   : > { %v6434_v24 = vpop.f32.mrb[7].mxu1  ;;  %5058 = vmatprep.subr.bf16.mxu0 %v7189_v52  ;;  %v7199_v56 = vld [vmem:[#allocation10 + $0x70] ss:$28 sps:$4 sm:$0xff]   ;;  %v7163_v52 = vld [vmem:[#allocation8 + $0x108] ss:$16 sps:$4 sm:$0xff]  }
 0x459   : > { %v8219_v57 = vadd.f32 %v6432_v55, %v6088_v53  ;;  %v7195_v53 = vld [vmem:[#allocation10 + $0x3c] ss:$28 sps:$4 sm:$0xff]   ;;  %5059 = vmatpush1.bf16.msra.mxu0 %v7187_v51  ;;  %v7201_v55 = vld [vmem:[#allocation10 + $0x74] ss:$28 sps:$4 sm:$0xff]   ;;  %v7207_v24 = vld [vmem:[#allocation10 + $0xac] ss:$28 sps:$4 sm:$0xff]  }
 0x45a   : > { %5060 = vmatprep.subr.bf16.mxu0 %v7195_v53  ;;  %v7165_v51 = vld [vmem:[#allocation8 + $0x10c] ss:$16 sps:$4 sm:$0xff]  }
 0x45b   : > { %v3014_v58 = vmul.f32 0.5, %v8219_v57  ;;  %v5434_v61 = vmul.f32 %v8219_v57, %v8219_v57  ;;  %v5440_v62 = vmul.f32 1.442695, %v8219_v57  ;;  %v5433_v4 = vadd.f32 1.0, %v8219_v57  ;;  %v7168_v53 = vld [vmem:[#allocation8 + $0x12c] ss:$16 sps:$4 sm:$0xff]  }
 0x45d   : > { %v3015_v59 = vmul.f32 1.442695, %v3014_v58  ;;  %5061 = vmatpush1.bf16.msra.mxu0 %v7193_v54  ;;  %v7205_v58 = vld [vmem:[#allocation10 + $0xa8] ss:$28 sps:$4 sm:$0xff]  }
 0x45e   : > { %5062 = vmatprep.subr.bf16.mxu0 %v7201_v55  ;;  %v7166_v54 = vld [vmem:[#allocation8 + $0x128] ss:$16 sps:$4 sm:$0xff]   ;;  %v7171_v55 = vld [vmem:[#allocation8 + $0x14c] ss:$16 sps:$4 sm:$0xff]  }
 0x45f   : > { %7511 = vpow2.f32 %v3015_v59  ;;  %v7213_v59 = vld [vmem:[#allocation10 + $0xe4] ss:$28 sps:$4 sm:$0xff]  }
 0x460   : > { %7513 = vpow2.f32 %v5440_v62  ;;  %v7217_v62 = vld [vmem:[#allocation10 + $0x118] ss:$28 sps:$4 sm:$0xff]  }
 0x461   : > { %5063 = vmatpush1.bf16.msra.mxu0 %v7199_v56  ;;  %v7169_v56 = vld [vmem:[#allocation8 + $0x148] ss:$16 sps:$4 sm:$0xff]  }
 0x462   : > { %5064 = vmatprep.subr.bf16.mxu0 %v7207_v24  ;;  %v7174_v24 = vld [vmem:[#allocation8 + $0x16c] ss:$16 sps:$4 sm:$0xff]  }
 0x465   : > { %5065 = vmatpush1.bf16.msra.mxu0 %v7205_v58  ;;  %v7172_v58 = vld [vmem:[#allocation8 + $0x168] ss:$16 sps:$4 sm:$0xff]  }
 0x466   : > { %5066 = vmatprep.subr.bf16.mxu0 %v7213_v59  ;;  %v7177_v59 = vld [vmem:[#allocation8 + $0x18c] ss:$16 sps:$4 sm:$0xff]  }
 0x469   : > { %v7512_v60 = vpop.eup %7511 }
 0x46a   : > { %3018 = vrot.lane.b32.xlu0 %v7512_v60, %s7838_s29  ;;  %v7514_v10 = vpop.eup %7513  ;;  %v7211_v60 = vld [vmem:[#allocation10 + $0xe0] ss:$28 sps:$4 sm:$0xff]  }
 0x46b   : > { %5067 = vmatpush1.bf16.msra.mxu0 %v7211_v60  ;;  %v7175_v60 = vld [vmem:[#allocation8 + $0x188] ss:$16 sps:$4 sm:$0xff]  }
 0x46e   : > { %5436 = vrot.lane.b32.xlu0 %v5434_v61, %s7839_s18  ;;  %v7219_v61 = vld [vmem:[#allocation10 + $0x11c] ss:$28 sps:$4 sm:$0xff]  }
 0x46f   : > { %5068 = vmatprep.subr.bf16.mxu0 %v7219_v61  ;;  %v7180_v61 = vld [vmem:[#allocation8 + $0x1ac] ss:$16 sps:$4 sm:$0xff]  }
 0x470   : > { %5069 = vmatpush1.bf16.msra.mxu0 %v7217_v62  ;;  %v7178_v62 = vld [vmem:[#allocation8 + $0x1a8] ss:$16 sps:$4 sm:$0xff]  }
 0x471   : > { %5070 = vmatprep.subr.bf16.mxu0 %v7225_v63  ;;  %v7183_v63 = vld [vmem:[#allocation8 + $0x1cc] ss:$16 sps:$4 sm:$0xff]  }
 0x4dc   : > { %v3019_v1 = vpop.permute.xlu0 %3018 }
 0x4dd   : > { %v3021_v2 = vmul.f32 %v3019_v1, %v3013_v0  ;;  %v7223_v0 = vld [vmem:[#allocation10 + $0x150] ss:$28 sps:$4 sm:$0xff]  }
 0x4de   : > { %v7231_v1 = vld [vmem:[#allocation10 + $0x18c] ss:$28 sps:$4 sm:$0xff]   ;;  %5071 = vmatpush1.bf16.msra.mxu0 %v7223_v0 }
 0x4df   : > { %v8231_v3 = vadd.f32 %v3021_v2, %v8219_v57  ;;  %v7229_v2 = vld [vmem:[#allocation10 + $0x188] ss:$28 sps:$4 sm:$0xff]   ;;  %5072 = vmatprep.subr.bf16.mxu0 %v7231_v1  ;;  %v7186_v1 = vld [vmem:[#allocation8 + $0x1ec] ss:$16 sps:$4 sm:$0xff]  }
 0x4e0   : > { %v5437_v5 = vpop.permute.xlu0 %5436  ;;  %v7181_v0 = vld [vmem:[#allocation8 + $0x1c8] ss:$16 sps:$4 sm:$0xff]  }
 0x4e1   : > { %v3023_v7 = vpack.c.bf16 %v8231_v3, %v8231_v3  ;;  %v5439_v8 = vsub.f32 %v5433_v4, %v5437_v5  ;;  %v7237_v4 = vld [vmem:[#allocation10 + $0x1c4] ss:$28 sps:$4 sm:$0xff]  }
 0x4e2   : > { %5073 = vmatpush1.bf16.msra.mxu0 %v7229_v2  ;;  %v7235_v5 = vld [vmem:[#allocation10 + $0x1c0] ss:$28 sps:$4 sm:$0xff]   ;;  %v7184_v2 = vld [vmem:[#allocation8 + $0x1e8] ss:$16 sps:$4 sm:$0xff]  }
 0x4e3   : > { %6107 = vmatmul.mubr.msk.bf16.vlgmr.msra.gmra.mrb[8].mxu1 %vm3048_vm0, %v3023_v7  ;;  %v5442_v11 = vsub.f32 %v5439_v8, %v7514_v10  ;;  %5074 = vmatprep.subr.bf16.mxu0 %v7237_v4  ;;  %v7241_v7 = vld [vmem:[#allocation10 + $0x1f8] ss:$28 sps:$4 sm:$0xff]   ;;  %v7255_v10 = vld [vmem:[#allocation10 + $0x26c] ss:$28 sps:$4 sm:$0xff]  }
 0x4e4   : > { %3504 = vmatpush1.bf16.msra.mxu1 %v7091_v6  ;;  %v7243_v6 = vld [vmem:[#allocation10 + $0x1fc] ss:$28 sps:$4 sm:$0xff]   ;;  %v7249_v8 = vld [vmem:[#allocation10 + $0x234] ss:$28 sps:$4 sm:$0xff]   ;;  %v7192_v4 = vld [vmem:[#allocation10 + $0xc] ss:$28 sps:$4 sm:$0xff]  }
 0x4e5   : > { %5444 = vrot.lane.b32.xlu1 %v5442_v11, %s7838_s29  ;;  %3505 = vmatprep.subr.bf16.mxu1 %v7096_v9  ;;  %v7247_v9 = vld [vmem:[#allocation10 + $0x230] ss:$28 sps:$4 sm:$0xff]   ;;  %v7253_v11 = vld [vmem:[#allocation10 + $0x268] ss:$28 sps:$4 sm:$0xff]   ;;  %s8322_s29 = sand.u32 1, %s7816_s22  }
 0x4e6   : > { %5075 = vmatpush1.bf16.msra.mxu0 %v7235_v5  ;;  %v7190_v5 = vld [vmem:[#allocation10 + $0x8] ss:$28 sps:$4 sm:$0xff]   ;;  %s6532_s26 = smul.u32 56, %s8322_s29  ;;  %s5584_s23 = scalar_lea.sflag [#allocation4], %s8322_s29 }
 0x4e7   : > { %5076 = vmatprep.subr.bf16.mxu0 %v7243_v6  ;;  %v7198_v6 = vld [vmem:[#allocation10 + $0x44] ss:$28 sps:$4 sm:$0xff]  }
 0x4e8   : > { %3506 = vmatpush1.bf16.msra.mxu1 %v7094_v12  ;;  %v7261_v12 = vld [vmem:[#allocation10 + $0x2a4] ss:$28 sps:$4 sm:$0xff]   ;;  %s8325_s24 = scalar_lea.vmem [#allocation11], %s6532_s26 }
 0x4e9   : > { %3507 = vmatprep.subr.bf16.mxu1 %v7099_v13  ;;  %v7259_v13 = vld [vmem:[#allocation10 + $0x2a0] ss:$28 sps:$4 sm:$0xff]   ;;  %s5603_s30 = sshll.u32 %s8325_s24, 4  ;;  %s5604_s30 = int_to_ptr.vmem [resolvable:$true] %s5603_s30 }
 0x4ea   : > { %5077 = vmatpush1.bf16.msra.mxu0 %v7241_v7  ;;  %v7196_v7 = vld [vmem:[#allocation10 + $0x40] ss:$28 sps:$4 sm:$0xff]   ;;  %s7718_s17 = scalar_lea.vmem %s5604_s30, 896 }
 0x4eb   : > { %5078 = vmatprep.subr.bf16.mxu0 %v7249_v8  ;;  %v7204_v8 = vld [vmem:[#allocation10 + $0x7c] ss:$28 sps:$4 sm:$0xff]   ;;  %p7719_p2 = scmp.ne.s32.totalorder %s5604_s30, %s7718_s17 }
 0x4ec   : > { %3508 = vmatpush1.bf16.msra.mxu1 %v7097_v14  ;;  %v3026_v14 = vld [vmem:[%s8452_s10] sm:$0x3] }
 0x4ed   : > { %3509 = vmatprep.subr.bf16.mxu1 %v7102_v15  ;;  %v7267_v15 = vld [vmem:[#allocation10 + $0x2dc] ss:$28 sps:$4 sm:$0xff]   ;;  %p7720_p4 = pnand %p7719_p2, %p8501_p3 }
 0x4ee   : > { %5079 = vmatpush1.bf16.msra.mxu0 %v7247_v9  ;;  %v7202_v9 = vld [vmem:[#allocation10 + $0x78] ss:$28 sps:$4 sm:$0xff]  }
 0x4ef   : > { %5080 = vmatprep.subr.bf16.mxu0 %v7255_v10  ;;  %v7210_v10 = vld [vmem:[#allocation10 + $0xb4] ss:$28 sps:$4 sm:$0xff]   ;;  %p7721_p7 = pneg %p7720_p4 }
 0x4f0   : > { %3510 = vmatpush1.bf16.msra.mxu1 %v7100_v17  ;;  %v7265_v17 = vld [vmem:[#allocation10 + $0x2d8] ss:$28 sps:$4 sm:$0xff]  }
 0x4f1   : > { %3511 = vmatprep.subr.bf16.mxu1 %v7105_v18  ;;  %v3031_v18 = vrot.slane %v3026_v14, %v8168_v31 }
 0x4f2   : > { %5081 = vmatpush1.bf16.msra.mxu0 %v7253_v11  ;;  %v7208_v11 = vld [vmem:[#allocation10 + $0xb0] ss:$28 sps:$4 sm:$0xff]  }
 0x4f3   : > { %5082 = vmatprep.subr.bf16.mxu0 %v7261_v12  ;;  %v7216_v12 = vld [vmem:[#allocation10 + $0xec] ss:$28 sps:$4 sm:$0xff]  }
 0x4f4   : > { %3512 = vmatpush1.bf16.msra.mxu1 %v7103_v19  ;;  %v3035_v19 = vrot.slane %v3026_v14, %v8173_v33  ;;  %v7222_v14 = vld [vmem:[#allocation10 + $0x124] ss:$28 sps:$4 sm:$0xff]  }
 0x4f5   : > { %3513 = vmatprep.subr.bf16.mxu1 %v7108_v20 }
 0x4f6   : > { %5083 = vmatpush1.bf16.msra.mxu0 %v7259_v13  ;;  %v7214_v13 = vld [vmem:[#allocation10 + $0xe8] ss:$28 sps:$4 sm:$0xff]  }
 0x4f7   : > { %5084 = vmatprep.subr.bf16.mxu0 %v7267_v15  ;;  %v7220_v15 = vld [vmem:[#allocation10 + $0x120] ss:$28 sps:$4 sm:$0xff]  }
 0x4f8   : > { %3514 = vmatpush1.bf16.msra.mxu1 %v7106_v21 }
 0x4f9   : > { %3515 = vmatprep.subr.bf16.mxu1 %v7111_v22 }
 0x4fa   : > { %5085 = vmatpush1.bf16.msra.mxu0 %v7265_v17  ;;  %v7228_v17 = vld [vmem:[#allocation10 + $0x15c] ss:$28 sps:$4 sm:$0xff]  }
 0x4fc   : > { %3516 = vmatpush1.bf16.msra.mxu1 %v7109_v23 }
 0x4fd   : > { %3517 = vmatprep.subr.bf16.mxu1 %v7114_v25 }
 0x500   : > { %3518 = vmatpush1.bf16.msra.mxu1 %v7112_v26 }
 0x501   : > { %3519 = vmatprep.subr.bf16.mxu1 %v7117_v27 }
 0x504   : > { %3520 = vmatpush1.bf16.msra.mxu1 %v7115_v28 }
 0x505   : > { %3521 = vmatprep.subr.bf16.mxu1 %v7120_v32 }
 0x508   : > { %3522 = vmatpush1.bf16.msra.mxu1 %v7118_v35  ;;  %v7139_v35 = vld [vmem:[#allocation8 + $0x8] ss:$16 sps:$4 sm:$0xff]  }
 0x509   : > { %3523 = vmatprep.subr.bf16.mxu1 %v7123_v36 }
 0x50c   : > { %3524 = vmatpush1.bf16.msra.mxu1 %v7121_v37  ;;  %v7144_v37 = vld [vmem:[#allocation8 + $0x2c] ss:$16 sps:$4 sm:$0xff]  }
 0x50d   : > { %3525 = vmatprep.subr.bf16.mxu1 %v7126_v38  ;;  %v7142_v38 = vld [vmem:[#allocation8 + $0x28] ss:$16 sps:$4 sm:$0xff]  }
 0x510   : > { %3526 = vmatpush1.bf16.msra.mxu1 %v7124_v39  ;;  %v7147_v39 = vld [vmem:[#allocation8 + $0x4c] ss:$16 sps:$4 sm:$0xff]  }
 0x511   : > { %3527 = vmatprep.subr.bf16.mxu1 %v7129_v40  ;;  %v7145_v40 = vld [vmem:[#allocation8 + $0x48] ss:$16 sps:$4 sm:$0xff]  }
 0x514   : > { %3528 = vmatpush1.bf16.msra.mxu1 %v7127_v41  ;;  %v7150_v41 = vld [vmem:[#allocation8 + $0x6c] ss:$16 sps:$4 sm:$0xff]  }
 0x515   : > { %3529 = vmatprep.subr.bf16.mxu1 %v7132_v42  ;;  %v7148_v42 = vld [vmem:[#allocation8 + $0x68] ss:$16 sps:$4 sm:$0xff]  }
 0x518   : > { %3530 = vmatpush1.bf16.msra.mxu1 %v7130_v43  ;;  %v7153_v43 = vld [vmem:[#allocation8 + $0x8c] ss:$16 sps:$4 sm:$0xff]  }
 0x519   : > { %3531 = vmatprep.subr.bf16.mxu1 %v7135_v44  ;;  %v7151_v44 = vld [vmem:[#allocation8 + $0x88] ss:$16 sps:$4 sm:$0xff]  }
 0x51c   : > { %3532 = vmatpush1.bf16.msra.mxu1 %v7133_v45  ;;  %v7156_v45 = vld [vmem:[#allocation8 + $0xac] ss:$16 sps:$4 sm:$0xff]  }
 0x51d   : > { %3533 = vmatprep.subr.bf16.mxu1 %v7138_v46  ;;  %v7154_v46 = vld [vmem:[#allocation8 + $0xa8] ss:$16 sps:$4 sm:$0xff]  }
 0x520   : > { %3534 = vmatpush1.bf16.msra.mxu1 %v7136_v47  ;;  %v7159_v47 = vld [vmem:[#allocation8 + $0xcc] ss:$16 sps:$4 sm:$0xff]  }
 0x521   : > { %3544 = vmatprep.subr.bf16.mxu1 %v7141_v48  ;;  %v7157_v48 = vld [vmem:[#allocation8 + $0xc8] ss:$16 sps:$4 sm:$0xff]  }
 0x557   : > { %v5445_v49 = vpop.permute.xlu1 %5444 }
 0x558   : > { %v5447_v50 = vsel %vm3048_vm0, %v5445_v49, 0.0  ;;  %v7162_v49 = vld [vmem:[#allocation8 + $0xec] ss:$16 sps:$4 sm:$0xff]  }
 0x559   : > { %5448 = vadd.xlane.f32.xlu1 %v5447_v50  ;;  %v7160_v50 = vld [vmem:[#allocation8 + $0xe8] ss:$16 sps:$4 sm:$0xff]  }
 0x5b6   : > { %v3086_v20 = vpop.f32.mrb[8].mxu1 }
 0x5b7   : > { %v3087_v21 = vadd.f32 %v3086_v20, %v3031_v18  ;;  %v3088_v22 = vpop.f32.mrb[9].mxu1  ;;  %v7275_v18 = vld [vmem:[#allocation10 + $0x314] ss:$28 sps:$4 sm:$0xff]  }
 0x5b8   : > { %v3089_v23 = vadd.f32 %v3088_v22, %v3035_v19  ;;  %v3090_v25 = vpop.f32.mrb[10].mxu1  ;;  %v7226_v19 = vld [vmem:[#allocation10 + $0x158] ss:$28 sps:$4 sm:$0xff]   ;;  %v7273_v20 = vld [vmem:[#allocation10 + $0x310] ss:$28 sps:$4 sm:$0xff]   ;;  %5086 = vmatprep.subr.bf16.mxu0 %v7275_v18 }
 0x5b9   : > { %v3093_v26 = vmax.f32 %v3087_v21, 0.0  ;;  %v3091_v27 = vpop.f32.mrb[11].mxu1  ;;  %v7234_v21 = vld [vmem:[#allocation10 + $0x194] ss:$28 sps:$4 sm:$0xff]   ;;  %5087 = vmatpush1.bf16.msra.mxu0 %v7273_v20  ;;  %v7281_v22 = vld [vmem:[#allocation10 + $0x34c] ss:$28 sps:$4 sm:$0xff]  }
 0x5ba   : > { %v3094_v28 = vmax.f32 %v3089_v23, 0.0  ;;  %v7232_v23 = vld [vmem:[#allocation10 + $0x190] ss:$28 sps:$4 sm:$0xff]   ;;  %v7279_v25 = vld [vmem:[#allocation10 + $0x348] ss:$28 sps:$4 sm:$0xff]   ;;  %5088 = vmatprep.subr.bf16.mxu0 %v7281_v22 }
 0x5bb   : > { %v8243_v36 = vpack.c.bf16 %v3093_v26, %v3093_v26  ;;  %v7240_v26 = vld [vmem:[#allocation10 + $0x1cc] ss:$28 sps:$4 sm:$0xff]   ;;  %v7287_v27 = vld [vmem:[#allocation10 + $0x384] ss:$28 sps:$4 sm:$0xff]  }
 0x5bc   : > { %v3096_v32 = vpack.c.bf16 %v3094_v28, %v3094_v28  ;;  %v7238_v28 = vld [vmem:[#allocation10 + $0x1c8] ss:$28 sps:$4 sm:$0xff]   ;;  %v7306_v18 = vld [vmem:[#allocation10 + $0x430] ss:$28 sps:$4 sm:$0xff]  }
 0x5bd   : > { %5089 = vmatpush1.bf16.msra.mxu0 %v7279_v25  ;;  %v7314_v20 = vld [vmem:[#allocation10 + $0x46c] ss:$28 sps:$4 sm:$0xff]   ;;  %v7320_v25 = vld [vmem:[#allocation10 + $0x4a4] ss:$28 sps:$4 sm:$0xff]  }
 0x5be   : > { %3535 = vmatprep.mubr.bf16.mxu1 %v3096_v32  ;;  %5099 = vmatprep.subr.bf16.mxu0 %v7287_v27  ;;  %v7312_v22 = vld [vmem:[#allocation10 + $0x468] ss:$28 sps:$4 sm:$0xff]   ;;  %v7318_v27 = vld [vmem:[#allocation10 + $0x4a0] ss:$28 sps:$4 sm:$0xff]  }
 0x5bf   : > { %3536 = vmatmul.mubr.bf16.vlgmr.msra.gmra.mrb[12].mxu1 %v8243_v36 }
 0x5c0   : > { %3545 = vmatpush1.bf16.msra.mxu1 %v7139_v35  ;;  %3576 = vmatprep.mubr.bf16.mxu1 %v3096_v32  ;;  %v7246_v32 = vld [vmem:[#allocation10 + $0x204] ss:$28 sps:$4 sm:$0xff]  }
 0x5c1   : > { %3546 = vmatprep.subr.bf16.mxu1 %v7144_v37  ;;  %v7244_v35 = vld [vmem:[#allocation10 + $0x200] ss:$28 sps:$4 sm:$0xff]   ;;  %v7250_v37 = vld [vmem:[#allocation10 + $0x238] ss:$28 sps:$4 sm:$0xff]  }
 0x5c4   : > { %3547 = vmatpush1.bf16.msra.mxu1 %v7142_v38  ;;  %v7258_v38 = vld [vmem:[#allocation10 + $0x274] ss:$28 sps:$4 sm:$0xff]  }
 0x5c5   : > { %3548 = vmatprep.subr.bf16.mxu1 %v7147_v39  ;;  %v7256_v39 = vld [vmem:[#allocation10 + $0x270] ss:$28 sps:$4 sm:$0xff]  }
 0x5c8   : > { %3549 = vmatpush1.bf16.msra.mxu1 %v7145_v40  ;;  %v7264_v40 = vld [vmem:[#allocation10 + $0x2ac] ss:$28 sps:$4 sm:$0xff]  }
 0x5c9   : > { %3550 = vmatprep.subr.bf16.mxu1 %v7150_v41  ;;  %v7262_v41 = vld [vmem:[#allocation10 + $0x2a8] ss:$28 sps:$4 sm:$0xff]  }
 0x5cc   : > { %3551 = vmatpush1.bf16.msra.mxu1 %v7148_v42  ;;  %v7270_v42 = vld [vmem:[#allocation10 + $0x2e4] ss:$28 sps:$4 sm:$0xff]  }
 0x5cd   : > { %3552 = vmatprep.subr.bf16.mxu1 %v7153_v43  ;;  %v7268_v43 = vld [vmem:[#allocation10 + $0x2e0] ss:$28 sps:$4 sm:$0xff]  }
 0x5d0   : > { %3553 = vmatpush1.bf16.msra.mxu1 %v7151_v44  ;;  %v7278_v44 = vld [vmem:[#allocation10 + $0x31c] ss:$28 sps:$4 sm:$0xff]  }
 0x5d1   : > { %3554 = vmatprep.subr.bf16.mxu1 %v7156_v45  ;;  %v7276_v45 = vld [vmem:[#allocation10 + $0x318] ss:$28 sps:$4 sm:$0xff]  }
 0x5d4   : > { %3555 = vmatpush1.bf16.msra.mxu1 %v7154_v46  ;;  %v7284_v46 = vld [vmem:[#allocation10 + $0x354] ss:$28 sps:$4 sm:$0xff]  }
 0x5d5   : > { %3556 = vmatprep.subr.bf16.mxu1 %v7159_v47  ;;  %v7282_v47 = vld [vmem:[#allocation10 + $0x350] ss:$28 sps:$4 sm:$0xff]  }
 0x5d8   : > { %3557 = vmatpush1.bf16.msra.mxu1 %v7157_v48  ;;  %v7290_v48 = vld [vmem:[#allocation10 + $0x38c] ss:$28 sps:$4 sm:$0xff]  }
 0x5d9   : > { %3558 = vmatprep.subr.bf16.mxu1 %v7162_v49  ;;  %v8250_v49 = vld [vmem:[%s8454_s12] sm:$0xf] }
 0x5dc   : > { %3559 = vmatpush1.bf16.msra.mxu1 %v7160_v50  ;;  %v3166_v50 = vrot.slane %v8250_v49, %v8168_v31 }
 0x5dd   : > { %3560 = vmatprep.subr.bf16.mxu1 %v7165_v51  ;;  %v3170_v51 = vrot.slane %v8250_v49, %v8173_v33 }
 0x5e0   : > { %3561 = vmatpush1.bf16.msra.mxu1 %v7163_v52 }
 0x5e1   : > { %3562 = vmatprep.subr.bf16.mxu1 %v7168_v53 }
 0x5e4   : > { %3563 = vmatpush1.bf16.msra.mxu1 %v7166_v54  ;;  %v3593_v54 = vld [vmem:[%s8258_s0] sm:$0xff] }
 0x5e5   : > { %3564 = vmatprep.subr.bf16.mxu1 %v7171_v55 }
 0x5e8   : > { %3565 = vmatpush1.bf16.msra.mxu1 %v7169_v56 }
 0x5e9   : > { %3566 = vmatprep.subr.bf16.mxu1 %v7174_v24 }
 0x5ec   : > { %3567 = vmatpush1.bf16.msra.mxu1 %v7172_v58 }
 0x5ed   : > { %3568 = vmatprep.subr.bf16.mxu1 %v7177_v59 }
 0x5f0   : > { %3569 = vmatpush1.bf16.msra.mxu1 %v7175_v60 }
 0x5f1   : > { %3570 = vmatprep.subr.bf16.mxu1 %v7180_v61  ;;  %v6173_v61 = vcombine.high %v3593_v54, %v3593_v54 }
 0x5f4   : > { %3571 = vmatpush1.bf16.msra.mxu1 %v7178_v62 }
 0x5f5   : > { %3572 = vmatprep.subr.bf16.mxu1 %v7183_v63  ;;  %v6172_v63 = vcombine.low %v3593_v54, %v3593_v54  ;;  %v7353_v54 = vld [vmem:[#allocation10 + $0x5ec] ss:$28 sps:$4 sm:$0xff]  }
 0x5f8   : > { %3573 = vmatpush1.bf16.msra.mxu1 %v7181_v0 }
 0x5f9   : > { %3574 = vmatprep.subr.bf16.mxu1 %v7186_v1 }
 0x5fc   : > { %3575 = vmatpush1.bf16.msra.mxu1 %v7184_v2  ;;  %v7285_v2 = vld [vmem:[#allocation10 + $0x380] ss:$28 sps:$4 sm:$0xff]  }
 0x5fd   : > { %5140 = vmatprep.subr.bf16.mxu1 %v7192_v4  ;;  %v7288_v4 = vld [vmem:[#allocation10 + $0x388] ss:$28 sps:$4 sm:$0xff]  }
 0x5ff   : > { %3577 = vmatmul.mubr.bf16.vlgmr.msra.gmra.mrb[16].mxu1 %v8243_v36  ;;  %v7252_v36 = vld [vmem:[#allocation10 + $0x23c] ss:$28 sps:$4 sm:$0xff]  }
 0x600   : > { %5141 = vmatpush1.bf16.msra.mxu1 %v7190_v5 }
 0x601   : > { %5142 = vmatprep.subr.bf16.mxu1 %v7198_v6  ;;  %v7293_v6 = vld [vmem:[#allocation10 + $0x3bc] ss:$28 sps:$4 sm:$0xff]  }
 0x604   : > { %5143 = vmatpush1.bf16.msra.mxu1 %v7196_v7  ;;  %v7296_v7 = vld [vmem:[#allocation10 + $0x3c4] ss:$28 sps:$4 sm:$0xff]  }
 0x605   : > { %5144 = vmatprep.subr.bf16.mxu1 %v7204_v8  ;;  %v7291_v8 = vld [vmem:[#allocation10 + $0x3b8] ss:$28 sps:$4 sm:$0xff]  }
 0x608   : > { %5145 = vmatpush1.bf16.msra.mxu1 %v7202_v9  ;;  %v7294_v9 = vld [vmem:[#allocation10 + $0x3c0] ss:$28 sps:$4 sm:$0xff]  }
 0x609   : > { %5146 = vmatprep.subr.bf16.mxu1 %v7210_v10  ;;  %v7299_v10 = vld [vmem:[#allocation10 + $0x3f4] ss:$28 sps:$4 sm:$0xff]  }
 0x60c   : > { %5147 = vmatpush1.bf16.msra.mxu1 %v7208_v11  ;;  %v7302_v11 = vld [vmem:[#allocation10 + $0x3fc] ss:$28 sps:$4 sm:$0xff]  }
 0x60d   : > { %5148 = vmatprep.subr.bf16.mxu1 %v7216_v12  ;;  %v7297_v12 = vld [vmem:[#allocation10 + $0x3f0] ss:$28 sps:$4 sm:$0xff]  }
 0x610   : > { %5149 = vmatpush1.bf16.msra.mxu1 %v7214_v13  ;;  %v7300_v13 = vld [vmem:[#allocation10 + $0x3f8] ss:$28 sps:$4 sm:$0xff]  }
 0x611   : > { %5150 = vmatprep.subr.bf16.mxu1 %v7222_v14  ;;  %v7305_v14 = vld [vmem:[#allocation10 + $0x42c] ss:$28 sps:$4 sm:$0xff]  }
 0x614   : > { %5151 = vmatpush1.bf16.msra.mxu1 %v7220_v15  ;;  %v7308_v15 = vld [vmem:[#allocation10 + $0x434] ss:$28 sps:$4 sm:$0xff]  }
 0x615   : > { %5152 = vmatprep.subr.bf16.mxu1 %v7228_v17  ;;  %v7303_v17 = vld [vmem:[#allocation10 + $0x428] ss:$28 sps:$4 sm:$0xff]  }
 0x618   : > { %5153 = vmatpush1.bf16.msra.mxu1 %v7226_v19  ;;  %v7311_v19 = vld [vmem:[#allocation10 + $0x464] ss:$28 sps:$4 sm:$0xff]  }
 0x619   : > { %5154 = vmatprep.subr.bf16.mxu1 %v7234_v21  ;;  %v7309_v21 = vld [vmem:[#allocation10 + $0x460] ss:$28 sps:$4 sm:$0xff]  }
 0x61c   : > { %5155 = vmatpush1.bf16.msra.mxu1 %v7232_v23  ;;  %v7317_v23 = vld [vmem:[#allocation10 + $0x49c] ss:$28 sps:$4 sm:$0xff]  }
 0x61d   : > { %5156 = vmatprep.subr.bf16.mxu1 %v7240_v26  ;;  %v7315_v26 = vld [vmem:[#allocation10 + $0x498] ss:$28 sps:$4 sm:$0xff]  }
 0x620   : > { %5157 = vmatpush1.bf16.msra.mxu1 %v7238_v28  ;;  %v7323_v28 = vld [vmem:[#allocation10 + $0x4d4] ss:$28 sps:$4 sm:$0xff]  }
 0x621   : > { %5158 = vmatprep.subr.bf16.mxu1 %v7246_v32  ;;  %v7326_v32 = vld [vmem:[#allocation10 + $0x4dc] ss:$28 sps:$4 sm:$0xff]  }
 0x624   : > { %5159 = vmatpush1.bf16.msra.mxu1 %v7244_v35  ;;  %v7321_v35 = vld [vmem:[#allocation10 + $0x4d0] ss:$28 sps:$4 sm:$0xff]  }
 0x625   : > { %5160 = vmatprep.subr.bf16.mxu1 %v7252_v36  ;;  %v7324_v36 = vld [vmem:[#allocation10 + $0x4d8] ss:$28 sps:$4 sm:$0xff]  }
 0x628   : > { %5161 = vmatpush1.bf16.msra.mxu1 %v7250_v37  ;;  %v7329_v37 = vld [vmem:[#allocation10 + $0x50c] ss:$28 sps:$4 sm:$0xff]  }
 0x629   : > { %5162 = vmatprep.subr.bf16.mxu1 %v7258_v38  ;;  %v7332_v38 = vld [vmem:[#allocation10 + $0x514] ss:$28 sps:$4 sm:$0xff]  }
 0x62c   : > { %5163 = vmatpush1.bf16.msra.mxu1 %v7256_v39  ;;  %v7327_v39 = vld [vmem:[#allocation10 + $0x508] ss:$28 sps:$4 sm:$0xff]  }
 0x62d   : > { %5164 = vmatprep.subr.bf16.mxu1 %v7264_v40  ;;  %v7330_v40 = vld [vmem:[#allocation10 + $0x510] ss:$28 sps:$4 sm:$0xff]  }
 0x630   : > { %5165 = vmatpush1.bf16.msra.mxu1 %v7262_v41  ;;  %v7335_v41 = vld [vmem:[#allocation10 + $0x544] ss:$28 sps:$4 sm:$0xff]  }
 0x631   : > { %5166 = vmatprep.subr.bf16.mxu1 %v7270_v42  ;;  %v7338_v42 = vld [vmem:[#allocation10 + $0x54c] ss:$28 sps:$4 sm:$0xff]  }
 0x634   : > { %5167 = vmatpush1.bf16.msra.mxu1 %v7268_v43  ;;  %v7333_v43 = vld [vmem:[#allocation10 + $0x540] ss:$28 sps:$4 sm:$0xff]  }
 0x635   : > { %5168 = vmatprep.subr.bf16.mxu1 %v7278_v44  ;;  %v7336_v44 = vld [vmem:[#allocation10 + $0x548] ss:$28 sps:$4 sm:$0xff]  }
 0x638   : > { %5169 = vmatpush1.bf16.msra.mxu1 %v7276_v45  ;;  %v7341_v45 = vld [vmem:[#allocation10 + $0x57c] ss:$28 sps:$4 sm:$0xff]  }
 0x639   : > { %5170 = vmatprep.subr.bf16.mxu1 %v7284_v46  ;;  %v7344_v46 = vld [vmem:[#allocation10 + $0x584] ss:$28 sps:$4 sm:$0xff]  }
 0x63c   : > { %5171 = vmatpush1.bf16.msra.mxu1 %v7282_v47  ;;  %v7339_v47 = vld [vmem:[#allocation10 + $0x578] ss:$28 sps:$4 sm:$0xff]  }
 0x63d   : > { %5181 = vmatprep.subr.bf16.mxu1 %v7290_v48  ;;  %v7342_v48 = vld [vmem:[#allocation10 + $0x580] ss:$28 sps:$4 sm:$0xff]  }
 0x692   : > { %v3537_v52 = vpop.f32.mrb[12].mxu1 }
 0x693   : > { %v3538_v53 = vadd.f32 %v3537_v52, %v3166_v50  ;;  %v3539_v55 = vpop.f32.mrb[13].mxu1  ;;  %v7347_v50 = vld [vmem:[#allocation10 + $0x5b4] ss:$28 sps:$4 sm:$0xff]  }
 0x694   : > { %v3540_v56 = vadd.f32 %v3539_v55, %v3170_v51  ;;  %v3541_v24 = vpop.f32.mrb[14].mxu1  ;;  %v7350_v51 = vld [vmem:[#allocation10 + $0x5bc] ss:$28 sps:$4 sm:$0xff]   ;;  %v7345_v52 = vld [vmem:[#allocation10 + $0x5b0] ss:$28 sps:$4 sm:$0xff]  }
 0x695   : > { %v3585_v58 = vmax.f32 %v3538_v53, 0.0  ;;  %v3542_v59 = vpop.f32.mrb[15].mxu1  ;;  %v7348_v53 = vld [vmem:[#allocation10 + $0x5b8] ss:$28 sps:$4 sm:$0xff]   ;;  %v7354_v24 = vld [vmem:[#allocation10 + $0x5f0] ss:$28 sps:$4 sm:$0xff]  }
 0x696   : > { %v3586_v60 = vmax.f32 %v3540_v56, 0.0  ;;  %v7356_v55 = vld [vmem:[#allocation10 + $0x5f4] ss:$28 sps:$4 sm:$0xff]   ;;  %v7351_v56 = vld [vmem:[#allocation10 + $0x5e8] ss:$28 sps:$4 sm:$0xff]  }
 0x697   : > { %v3589_v62 = vpack.c.bf16 %v3585_v58, %v3585_v58  ;;  %v7359_v58 = vld [vmem:[#allocation10 + $0x624] ss:$28 sps:$4 sm:$0xff]   ;;  %v7362_v59 = vld [vmem:[#allocation10 + $0x62c] ss:$28 sps:$4 sm:$0xff]  }
 0x698   : > { %v3590_v0 = vpack.c.bf16 %v3586_v60, %v3586_v60  ;;  %v7357_v60 = vld [vmem:[#allocation10 + $0x620] ss:$28 sps:$4 sm:$0xff]  }
 0x699   : > { %v8265_v5 = vmul.bf16 %v6172_v63, %v3589_v62  ;;  %v7365_v62 = vld [vmem:[#allocation10 + $0x65c] ss:$28 sps:$4 sm:$0xff]   ;;  %v7368_v63 = vld [vmem:[#allocation10 + $0x664] ss:$28 sps:$4 sm:$0xff]  }
 0x69a   : > { %v8263_v1 = vmul.bf16 %v6173_v61, %v3590_v0  ;;  %v7360_v61 = vld [vmem:[#allocation10 + $0x628] ss:$28 sps:$4 sm:$0xff]   ;;  %v7363_v0 = vld [vmem:[#allocation10 + $0x658] ss:$28 sps:$4 sm:$0xff]  }
 0x69c   : > { %5090 = vmatprep.mubr.bf16.mxu0 %v8263_v1  ;;  %5172 = vmatprep.mubr.bf16.mxu1 %v8263_v1 }
 0x69d   : > { %5091 = vmatmul.mubr.bf16.vlgmr.msra.gmra.mrb[8].mxu0 %v8265_v5  ;;  %5173 = vmatmul.mubr.bf16.vlgmr.msra.gmra.mrb[20].mxu1 %v8265_v5 }
 0x69e   : > { %5100 = vmatpush1.bf16.msra.mxu0 %v7285_v2  ;;  %5182 = vmatpush1.bf16.msra.mxu1 %v7288_v4  ;;  %v7366_v2 = vld [vmem:[#allocation10 + $0x660] ss:$28 sps:$4 sm:$0xff]   ;;  %v3174_v4 = vrot.slane %v8250_v49, %v8187_v16 }
 0x69f   : > { %5101 = vmatprep.subr.bf16.mxu0 %v7293_v6  ;;  %5183 = vmatprep.subr.bf16.mxu1 %v7296_v7  ;;  %v7373_v6 = vld [vmem:[#allocation10 + $0x694] ss:$28 sps:$4 sm:$0xff]   ;;  %v7376_v7 = vld [vmem:[#allocation10 + $0x69c] ss:$28 sps:$4 sm:$0xff]  }
 0x6a2   : > { %5102 = vmatpush1.bf16.msra.mxu0 %v7291_v8  ;;  %5184 = vmatpush1.bf16.msra.mxu1 %v7294_v9  ;;  %v3178_v8 = vrot.slane %v8250_v49, %v8176_v34  ;;  %v7377_v49 = vld [vmem:[#allocation10 + $0x6c8] ss:$28 sps:$4 sm:$0xff]  }
 0x6a3   : > { %5103 = vmatprep.subr.bf16.mxu0 %v7299_v10  ;;  %5185 = vmatprep.subr.bf16.mxu1 %v7302_v11  ;;  %v3594_v10 = vld [vmem:[%s8258_s0 + $0x8] sm:$0xff]  ;;  %v7371_v11 = vld [vmem:[#allocation10 + $0x690] ss:$28 sps:$4 sm:$0xff]   ;;  %s7722_s0 = sshll.u32 %s7841_s15, 4  ;;  %s7723_s0 = int_to_ptr.vmem [resolvable:$false] %s7722_s0 }
 0x6a4   : > { %s7724_s16 = scalar_lea.vmem %s7723_s0, 1792  ;;  %p7725_p8 = scmp.lt.s32.totalorder %s5604_s30, %s7723_s0 }
 0x6a5   : > { %p7726_p11 = scmp.lt.s32.totalorder %s7724_s16, %s7718_s17 }
 0x6a6   : > { %5104 = vmatpush1.bf16.msra.mxu0 %v7297_v12  ;;  %5186 = vmatpush1.bf16.msra.mxu1 %v7300_v13  ;;  %v7374_v12 = vld [vmem:[#allocation10 + $0x698] ss:$28 sps:$4 sm:$0xff]  }
 0x6a7   : > { %5105 = vmatprep.subr.bf16.mxu0 %v7305_v14  ;;  %5187 = vmatprep.subr.bf16.mxu1 %v7308_v15  ;;  %v7379_v15 = vld [vmem:[#allocation10 + $0x6cc] ss:$28 sps:$4 sm:$0xff]   ;;  %p7727_p13 = por %p7726_p11, %p7725_p8 }
 0x6a9   : > { %p7728_p1 = pnand %p7727_p13, %p7721_p7 }
 0x6aa   : > { %5106 = vmatpush1.bf16.msra.mxu0 %v7303_v17  ;;  %5188 = vmatpush1.bf16.msra.mxu1 %v7306_v18  ;;  %v7382_v17 = vld [vmem:[#allocation10 + $0x6d4] ss:$28 sps:$4 sm:$0xff]  }
 0x6ab   : > { %5107 = vmatprep.subr.bf16.mxu0 %v7311_v19  ;;  %5189 = vmatprep.subr.bf16.mxu1 %v7314_v20 }
 0x6ae   : > { %5108 = vmatpush1.bf16.msra.mxu0 %v7309_v21  ;;  %5190 = vmatpush1.bf16.msra.mxu1 %v7312_v22  ;;  %v6174_v21 = vcombine.low %v3594_v10, %v3594_v10 }
 0x6af   : > { %5109 = vmatprep.subr.bf16.mxu0 %v7317_v23  ;;  %5191 = vmatprep.subr.bf16.mxu1 %v7320_v25  ;;  %v6175_v25 = vcombine.high %v3594_v10, %v3594_v10  ;;  %v7427_v10 = vld [vmem:[#allocation10 + $0x398] ss:$28 sps:$4 sm:$0xff]  }
 0x6b2   : > { %5110 = vmatpush1.bf16.msra.mxu0 %v7315_v26  ;;  %5192 = vmatpush1.bf16.msra.mxu1 %v7318_v27  ;;  %v7380_v26 = vld [vmem:[#allocation10 + $0x6d0] ss:$28 sps:$4 sm:$0xff]  }
 0x6b3   : > { %5111 = vmatprep.subr.bf16.mxu0 %v7323_v28  ;;  %5193 = vmatprep.subr.bf16.mxu1 %v7326_v32  ;;  %v7385_v28 = vld [vmem:[#allocation10 + $0x14] ss:$28 sps:$4 sm:$0xff]  }
 0x6b4   : > { %v7386_v32 = vld [vmem:[#allocation10 + $0x1d8] ss:$28 sps:$4 sm:$0xff]  }
 0x6b6   : > { %5112 = vmatpush1.bf16.msra.mxu0 %v7321_v35  ;;  %5194 = vmatpush1.bf16.msra.mxu1 %v7324_v36 }
 0x6b7   : > { %5113 = vmatprep.subr.bf16.mxu0 %v7329_v37  ;;  %5195 = vmatprep.subr.bf16.mxu1 %v7332_v38  ;;  %v7383_v38 = vld [vmem:[#allocation10 + $0x10] ss:$28 sps:$4 sm:$0xff]  }
 0x6ba   : > { %5114 = vmatpush1.bf16.msra.mxu0 %v7327_v39  ;;  %5196 = vmatpush1.bf16.msra.mxu1 %v7330_v40  ;;  %v7387_v39 = vld [vmem:[#allocation10 + $0x18] ss:$28 sps:$4 sm:$0xff]   ;;  %v7390_v40 = vld [vmem:[#allocation10 + $0x4c] ss:$28 sps:$4 sm:$0xff]  }
 0x6bb   : > { %5115 = vmatprep.subr.bf16.mxu0 %v7335_v41  ;;  %5197 = vmatprep.subr.bf16.mxu1 %v7338_v42  ;;  %v7391_v41 = vld [vmem:[#allocation10 + $0x210] ss:$28 sps:$4 sm:$0xff]   ;;  %v7388_v42 = vld [vmem:[#allocation10 + $0x48] ss:$28 sps:$4 sm:$0xff]  }
 0x6be   : > { %5116 = vmatpush1.bf16.msra.mxu0 %v7333_v43  ;;  %5198 = vmatpush1.bf16.msra.mxu1 %v7336_v44  ;;  %v7392_v43 = vld [vmem:[#allocation10 + $0x50] ss:$28 sps:$4 sm:$0xff]   ;;  %v7395_v44 = vld [vmem:[#allocation10 + $0x84] ss:$28 sps:$4 sm:$0xff]  }
 0x6bf   : > { %5117 = vmatprep.subr.bf16.mxu0 %v7341_v45  ;;  %5199 = vmatprep.subr.bf16.mxu1 %v7344_v46  ;;  %v7396_v45 = vld [vmem:[#allocation10 + $0x248] ss:$28 sps:$4 sm:$0xff]   ;;  %v7393_v46 = vld [vmem:[#allocation10 + $0x80] ss:$28 sps:$4 sm:$0xff]  }
 0x6c2   : > { %5118 = vmatpush1.bf16.msra.mxu0 %v7339_v47  ;;  %5200 = vmatpush1.bf16.msra.mxu1 %v7342_v48  ;;  %v7397_v47 = vld [vmem:[#allocation10 + $0x88] ss:$28 sps:$4 sm:$0xff]   ;;  %v7400_v48 = vld [vmem:[#allocation10 + $0xbc] ss:$28 sps:$4 sm:$0xff]  }
 0x6c3   : > { %5119 = vmatprep.subr.bf16.mxu0 %v7347_v50  ;;  %5201 = vmatprep.subr.bf16.mxu1 %v7350_v51  ;;  %v7401_v50 = vld [vmem:[#allocation10 + $0x280] ss:$28 sps:$4 sm:$0xff]   ;;  %v7398_v51 = vld [vmem:[#allocation10 + $0xb8] ss:$28 sps:$4 sm:$0xff]  }
 0x6c6   : > { %5120 = vmatpush1.bf16.msra.mxu0 %v7345_v52  ;;  %5202 = vmatpush1.bf16.msra.mxu1 %v7348_v53  ;;  %v7402_v52 = vld [vmem:[#allocation10 + $0xc0] ss:$28 sps:$4 sm:$0xff]   ;;  %v7405_v53 = vld [vmem:[#allocation10 + $0xf4] ss:$28 sps:$4 sm:$0xff]  }
 0x6c7   : > { %5121 = vmatprep.subr.bf16.mxu0 %v7353_v54  ;;  %5203 = vmatprep.subr.bf16.mxu1 %v7356_v55  ;;  %v7403_v54 = vld [vmem:[#allocation10 + $0xf0] ss:$28 sps:$4 sm:$0xff]   ;;  %v7407_v55 = vld [vmem:[#allocation10 + $0xf8] ss:$28 sps:$4 sm:$0xff]  }
 0x6ca   : > { %5122 = vmatpush1.bf16.msra.mxu0 %v7351_v56  ;;  %5204 = vmatpush1.bf16.msra.mxu1 %v7354_v24  ;;  %v7410_v56 = vld [vmem:[#allocation10 + $0x12c] ss:$28 sps:$4 sm:$0xff]  }
 0x6cb   : > { %5123 = vmatprep.subr.bf16.mxu0 %v7359_v58  ;;  %5205 = vmatprep.subr.bf16.mxu1 %v7362_v59  ;;  %v7411_v24 = vld [vmem:[#allocation10 + $0x2f0] ss:$28 sps:$4 sm:$0xff]   ;;  %v7408_v58 = vld [vmem:[#allocation10 + $0x128] ss:$28 sps:$4 sm:$0xff]  }
 0x6cc   : > { %v7412_v59 = vld [vmem:[#allocation10 + $0x130] ss:$28 sps:$4 sm:$0xff]  }
 0x6ce   : > { %5124 = vmatpush1.bf16.msra.mxu0 %v7357_v60  ;;  %5206 = vmatpush1.bf16.msra.mxu1 %v7360_v61  ;;  %v7415_v60 = vld [vmem:[#allocation10 + $0x164] ss:$28 sps:$4 sm:$0xff]  }
 0x6cf   : > { %5125 = vmatprep.subr.bf16.mxu0 %v7365_v62  ;;  %5207 = vmatprep.subr.bf16.mxu1 %v7368_v63  ;;  %v7416_v61 = vld [vmem:[#allocation10 + $0x328] ss:$28 sps:$4 sm:$0xff]   ;;  %v7413_v62 = vld [vmem:[#allocation10 + $0x160] ss:$28 sps:$4 sm:$0xff]  }
 0x6d0   : > { %v7417_v63 = vld [vmem:[#allocation10 + $0x168] ss:$28 sps:$4 sm:$0xff]  }
 0x6d2   : > { %v3578_v9 = vpop.f32.mrb[16].mxu1  ;;  %5126 = vmatpush1.bf16.msra.mxu0 %v7363_v0  ;;  %5208 = vmatpush1.bf16.msra.mxu1 %v7366_v2  ;;  %v7420_v0 = vld [vmem:[#allocation10 + $0x19c] ss:$28 sps:$4 sm:$0xff]  }
 0x6d3   : > { %v3579_v13 = vadd.f32 %v3578_v9, %v3174_v4  ;;  %v3580_v14 = vpop.f32.mrb[17].mxu1  ;;  %5127 = vmatprep.subr.bf16.mxu0 %v7373_v6  ;;  %5209 = vmatprep.subr.bf16.mxu1 %v7376_v7  ;;  %v7421_v2 = vld [vmem:[#allocation10 + $0x360] ss:$28 sps:$4 sm:$0xff]   ;;  %v7418_v4 = vld [vmem:[#allocation10 + $0x198] ss:$28 sps:$4 sm:$0xff]  }
 0x6d4   : > { %v3581_v18 = vadd.f32 %v3580_v14, %v3178_v8  ;;  %v3582_v19 = vpop.f32.mrb[18].mxu1  ;;  %v7422_v6 = vld [vmem:[#allocation10 + $0x1a0] ss:$28 sps:$4 sm:$0xff]   ;;  %v7425_v7 = vld [vmem:[#allocation10 + $0x1d4] ss:$28 sps:$4 sm:$0xff]  }
 0x6d5   : > { %v3587_v20 = vmax.f32 %v3579_v13, 0.0  ;;  %v3583_v22 = vpop.f32.mrb[19].mxu1  ;;  %v7426_v8 = vld [vmem:[#allocation10 + $0x558] ss:$28 sps:$4 sm:$0xff]   ;;  %v7423_v9 = vld [vmem:[#allocation10 + $0x1d0] ss:$28 sps:$4 sm:$0xff]  }
 0x6d6   : > { %v3588_v23 = vmax.f32 %v3581_v18, 0.0  ;;  %5128 = vmatpush1.bf16.msra.mxu0 %v7371_v11  ;;  %5210 = vmatpush1.bf16.msra.mxu1 %v7374_v12  ;;  %v7430_v11 = vld [vmem:[#allocation10 + $0x20c] ss:$28 sps:$4 sm:$0xff]   ;;  %v7433_v18 = vld [vmem:[#allocation10 + $0x240] ss:$28 sps:$4 sm:$0xff]  }
 0x6d7   : > { %v3591_v27 = vpack.c.bf16 %v3587_v20, %v3587_v20  ;;  %5129 = vmatprep.subr.bf16.mxu0 %v7379_v15  ;;  %5211 = vmatprep.subr.bf16.mxu1 %v7382_v17  ;;  %v7431_v12 = vld [vmem:[#allocation10 + $0x590] ss:$28 sps:$4 sm:$0xff]   ;;  %v7428_v13 = vld [vmem:[#allocation10 + $0x208] ss:$28 sps:$4 sm:$0xff]   ;;  %v7440_v20 = vld [vmem:[#allocation10 + $0x27c] ss:$28 sps:$4 sm:$0xff]  }
 0x6d8   : > { %v3592_v35 = vpack.c.bf16 %v3588_v23, %v3588_v23  ;;  %v7432_v14 = vld [vmem:[#allocation10 + $0x3d0] ss:$28 sps:$4 sm:$0xff]   ;;  %v7435_v15 = vld [vmem:[#allocation10 + $0x244] ss:$28 sps:$4 sm:$0xff]   ;;  %v7438_v22 = vld [vmem:[#allocation10 + $0x278] ss:$28 sps:$4 sm:$0xff]  }
 0x6d9   : > { %v8276_v36 = vmul.bf16 %v6174_v21, %v3591_v27  ;;  %v7436_v17 = vld [vmem:[#allocation10 + $0x5c8] ss:$28 sps:$4 sm:$0xff]   ;;  %v7441_v21 = vld [vmem:[#allocation10 + $0x600] ss:$28 sps:$4 sm:$0xff]   ;;  %v7447_v27 = vld [vmem:[#allocation10 + $0x478] ss:$28 sps:$4 sm:$0xff]  }
 0x6da   : > { %v8278_v37 = vmul.bf16 %v6175_v25, %v3592_v35  ;;  %5130 = vmatpush1.bf16.msra.mxu0 %v7377_v49  ;;  %5212 = vmatpush1.bf16.msra.mxu1 %v7380_v26  ;;  %v7437_v19 = vld [vmem:[#allocation10 + $0x408] ss:$28 sps:$4 sm:$0xff]   ;;  %v7442_v23 = vld [vmem:[#allocation10 + $0x440] ss:$28 sps:$4 sm:$0xff]   ;;  %v7445_v25 = vld [vmem:[#allocation10 + $0x2b4] ss:$28 sps:$4 sm:$0xff]  }
 0x6db   : > { %5222 = vmatprep.subr.bf16.mxu0 %v7385_v28  ;;  %6436 = vmatprep.subr.bf16.mxu1 %v7386_v32  ;;  %v7446_v49 = vld [vmem:[#allocation10 + $0x638] ss:$28 sps:$4 sm:$0xff]   ;;  %v7443_v26 = vld [vmem:[#allocation10 + $0x2b0] ss:$28 sps:$4 sm:$0xff]   ;;  %v7448_v35 = vld [vmem:[#allocation10 + $0x2e8] ss:$28 sps:$4 sm:$0xff]  }
 0x6dc   : > { %5131 = vmatprep.mubr.bf16.mxu0 %v8278_v37  ;;  %5213 = vmatprep.mubr.bf16.mxu1 %v8278_v37  ;;  %v7450_v28 = vld [vmem:[#allocation10 + $0x2ec] ss:$28 sps:$4 sm:$0xff]  }
 0x6dd   : > { %5132 = vmatmul.mubr.bf16.vlgmr.msra.gmra.mrb[8].mxu0 %v8276_v36  ;;  %5214 = vmatmul.mubr.bf16.vlgmr.msra.gmra.mrb[20].mxu1 %v8276_v36  ;;  %v7451_v32 = vld [vmem:[#allocation10 + $0x670] ss:$28 sps:$4 sm:$0xff]  }
 0x6de   : > { %5223 = vmatpush1.bf16.msra.mxu0 %v7383_v38  ;;  %5254 = vmatprep.mubr.bf16.mxu0 %v8263_v1  ;;  %v7452_v38 = vld [vmem:[#allocation10 + $0x4b0] ss:$28 sps:$4 sm:$0xff]  }
 0x6df   : > { %6437 = vmatpush3.bf16.msra.mxu1 %v7387_v39  ;;  %5336 = vmatprep.mubr.bf16.mxu1 %v8263_v1  ;;  %v7406_v1 = vld [vmem:[#allocation10 + $0x2b8] ss:$28 sps:$4 sm:$0xff]   ;;  %v7455_v39 = vld [vmem:[#allocation10 + $0x324] ss:$28 sps:$4 sm:$0xff]  }
 0x6e0   : > { %5224 = vmatprep.subr.bf16.mxu0 %v7390_v40  ;;  %6438 = vmatprep.subr.bf16.mxu1 %v7391_v41  ;;  %v7456_v40 = vld [vmem:[#allocation10 + $0x6a8] ss:$28 sps:$4 sm:$0xff]   ;;  %v7453_v41 = vld [vmem:[#allocation10 + $0x320] ss:$28 sps:$4 sm:$0xff]  }
 0x6e2   : > { %5225 = vmatpush1.bf16.msra.mxu0 %v7388_v42  ;;  %v7457_v42 = vld [vmem:[#allocation10 + $0x4e8] ss:$28 sps:$4 sm:$0xff]  }
 0x6e3   : > { %6439 = vmatpush3.bf16.msra.mxu1 %v7392_v43  ;;  %5226 = vmatprep.subr.bf16.mxu0 %v7395_v44  ;;  %v7460_v43 = vld [vmem:[#allocation10 + $0x35c] ss:$28 sps:$4 sm:$0xff]  }
 0x6e4   : > { %6440 = vmatprep.subr.bf16.mxu1 %v7396_v45  ;;  %v7461_v44 = vld [vmem:[#allocation10 + $0x6e0] ss:$28 sps:$4 sm:$0xff]   ;;  %v7458_v45 = vld [vmem:[#allocation10 + $0x358] ss:$28 sps:$4 sm:$0xff]  }
 0x6e6   : > { %5227 = vmatpush1.bf16.msra.mxu0 %v7393_v46  ;;  %v7462_v46 = vld [vmem:[#allocation10 + $0x520] ss:$28 sps:$4 sm:$0xff]  }
 0x6e7   : > { %6441 = vmatpush3.bf16.msra.mxu1 %v7397_v47  ;;  %5228 = vmatprep.subr.bf16.mxu0 %v7400_v48  ;;  %v7465_v47 = vld [vmem:[#allocation10 + $0x394] ss:$28 sps:$4 sm:$0xff]  }
 0x6e8   : > { %6442 = vmatprep.subr.bf16.mxu1 %v7401_v50  ;;  %v7463_v48 = vld [vmem:[#allocation10 + $0x390] ss:$28 sps:$4 sm:$0xff]  }
 0x6e9   : > { %v7468_v50 = vld [vmem:[#allocation10 + $0x3cc] ss:$28 sps:$4 sm:$0xff]  }
 0x6ea   : > { %5229 = vmatpush1.bf16.msra.mxu0 %v7398_v51  ;;  %v7466_v51 = vld [vmem:[#allocation10 + $0x3c8] ss:$28 sps:$4 sm:$0xff]  }
 0x6eb   : > { %6443 = vmatpush3.bf16.msra.mxu1 %v7402_v52  ;;  %5230 = vmatprep.subr.bf16.mxu0 %v7405_v53  ;;  %v7471_v52 = vld [vmem:[#allocation10 + $0x404] ss:$28 sps:$4 sm:$0xff]  }
 0x6ec   : > { %6444 = vmatprep.subr.bf16.mxu1 %v7406_v1  ;;  %v7469_v53 = vld [vmem:[#allocation10 + $0x400] ss:$28 sps:$4 sm:$0xff]  }
 0x6ed   : > { %v7474_v1 = vld [vmem:[#allocation10 + $0x43c] ss:$28 sps:$4 sm:$0xff]  }
 0x6ee   : > { %5231 = vmatpush1.bf16.msra.mxu0 %v7403_v54  ;;  %v7472_v54 = vld [vmem:[#allocation10 + $0x438] ss:$28 sps:$4 sm:$0xff]  }
 0x6ef   : > { %6445 = vmatpush3.bf16.msra.mxu1 %v7407_v55  ;;  %5232 = vmatprep.subr.bf16.mxu0 %v7410_v56  ;;  %v7477_v55 = vld [vmem:[#allocation10 + $0x474] ss:$28 sps:$4 sm:$0xff]  }
 0x6f0   : > { %6446 = vmatprep.subr.bf16.mxu1 %v7411_v24  ;;  %v7475_v56 = vld [vmem:[#allocation10 + $0x470] ss:$28 sps:$4 sm:$0xff]   ;;  %v7478_v24 = vld [vmem:[#allocation10 + $0x4a8] ss:$28 sps:$4 sm:$0xff]  }
 0x6f2   : > { %5233 = vmatpush1.bf16.msra.mxu0 %v7408_v58  ;;  %v7483_v58 = vld [vmem:[#allocation10 + $0x4e4] ss:$28 sps:$4 sm:$0xff]  }
 0x6f3   : > { %6447 = vmatpush3.bf16.msra.mxu1 %v7412_v59  ;;  %5234 = vmatprep.subr.bf16.mxu0 %v7415_v60  ;;  %v7486_v59 = vld [vmem:[#allocation10 + $0x51c] ss:$28 sps:$4 sm:$0xff]  }
 0x6f4   : > { %6448 = vmatprep.subr.bf16.mxu1 %v7416_v61  ;;  %v7484_v60 = vld [vmem:[#allocation10 + $0x518] ss:$28 sps:$4 sm:$0xff]  }
 0x6f5   : > { %v7489_v61 = vld [vmem:[#allocation10 + $0x554] ss:$28 sps:$4 sm:$0xff]  }
 0x6f6   : > { %5235 = vmatpush1.bf16.msra.mxu0 %v7413_v62  ;;  %v7487_v62 = vld [vmem:[#allocation10 + $0x550] ss:$28 sps:$4 sm:$0xff]  }
 0x6f7   : > { %6449 = vmatpush3.bf16.msra.mxu1 %v7417_v63  ;;  %5236 = vmatprep.subr.bf16.mxu0 %v7420_v0  ;;  %v7492_v63 = vld [vmem:[#allocation10 + $0x58c] ss:$28 sps:$4 sm:$0xff]  }
 0x6f8   : > { %6450 = vmatprep.subr.bf16.mxu1 %v7421_v2  ;;  %v7490_v0 = vld [vmem:[#allocation10 + $0x588] ss:$28 sps:$4 sm:$0xff]  }
 0x6f9   : > { %v7495_v2 = vld [vmem:[#allocation10 + $0x5c4] ss:$28 sps:$4 sm:$0xff]  }
 0x6fa   : > { %5237 = vmatpush1.bf16.msra.mxu0 %v7418_v4  ;;  %v7493_v4 = vld [vmem:[#allocation10 + $0x5c0] ss:$28 sps:$4 sm:$0xff]  }
 0x6fb   : > { %6451 = vmatpush3.bf16.msra.mxu1 %v7422_v6  ;;  %5238 = vmatprep.subr.bf16.mxu0 %v7425_v7  ;;  %v7498_v6 = vld [vmem:[#allocation10 + $0x5fc] ss:$28 sps:$4 sm:$0xff]  }
 0x6fc   : > { %6458 = vmatprep.subr.bf16.mxu1 %v7426_v8  ;;  %v7496_v7 = vld [vmem:[#allocation10 + $0x5f8] ss:$28 sps:$4 sm:$0xff]  }
 0x6fd   : > { %v7501_v8 = vld [vmem:[#allocation10 + $0x634] ss:$28 sps:$4 sm:$0xff]  }
 0x6fe   : > { %5337 = vmatmul.mubr.bf16.vlgmr.msra.gmra.mrb[24].mxu1 %v8265_v5  ;;  %5239 = vmatpush1.bf16.msra.mxu0 %v7423_v9  ;;  %v7499_v9 = vld [vmem:[#allocation10 + $0x630] ss:$28 sps:$4 sm:$0xff]  }
 0x6ff   : > { %6459 = vmatpush3.bf16.msra.mxu1 %v7427_v10  ;;  %5376 = vmatprep.mubr.bf16.mxu1 %v8278_v37  ;;  %v7504_v10 = vld [vmem:[#allocation10 + $0x66c] ss:$28 sps:$4 sm:$0xff]  }
 0x700   : > { %5240 = vmatprep.subr.bf16.mxu0 %v7430_v11  ;;  %6460 = vmatprep.subr.bf16.mxu1 %v7431_v12  ;;  %v7502_v11 = vld [vmem:[#allocation10 + $0x668] ss:$28 sps:$4 sm:$0xff]  }
 0x701   : > { %v7507_v12 = vld [vmem:[#allocation10 + $0x6a4] ss:$28 sps:$4 sm:$0xff]  }
 0x702   : > { %5241 = vmatpush1.bf16.msra.mxu0 %v7428_v13  ;;  %v7505_v13 = vld [vmem:[#allocation10 + $0x6a0] ss:$28 sps:$4 sm:$0xff]  }
 0x703   : > { %6461 = vmatpush3.bf16.msra.mxu1 %v7432_v14  ;;  %5242 = vmatprep.subr.bf16.mxu0 %v7435_v15  ;;  %v7510_v14 = vld [vmem:[#allocation10 + $0x6dc] ss:$28 sps:$4 sm:$0xff]  }
 0x704   : > { %6462 = vmatprep.subr.bf16.mxu1 %v7436_v17  ;;  %v7508_v15 = vld [vmem:[#allocation10 + $0x6d8] ss:$28 sps:$4 sm:$0xff]   ;;  %v8295_v17 = vld [vmem:[%s8456_s14] sm:$0xff] }
 0x706   : > { %5243 = vmatpush1.bf16.msra.mxu0 %v7433_v18  ;;  %v3874_v18 = vrot.slane %v8295_v17, %v8168_v31 }
 0x707   : > { %6463 = vmatpush3.bf16.msra.mxu1 %v7437_v19  ;;  %5244 = vmatprep.subr.bf16.mxu0 %v7440_v20  ;;  %v3882_v19 = vrot.slane %v8295_v17, %v8187_v16  ;;  %v3878_v20 = vrot.slane %v8295_v17, %v8173_v33 }
 0x708   : > { %6464 = vmatprep.subr.bf16.mxu1 %v7441_v21  ;;  %v3886_v21 = vrot.slane %v8295_v17, %v8176_v34 }
 0x70a   : > { %5245 = vmatpush1.bf16.msra.mxu0 %v7438_v22 }
 0x70b   : > { %6465 = vmatpush3.bf16.msra.mxu1 %v7442_v23  ;;  %5246 = vmatprep.subr.bf16.mxu0 %v7445_v25 }
 0x70c   : > { %6466 = vmatprep.subr.bf16.mxu1 %v7446_v49 }
 0x70e   : > { %5247 = vmatpush1.bf16.msra.mxu0 %v7443_v26 }
 0x70f   : > { %6467 = vmatpush3.bf16.msra.mxu1 %v7447_v27  ;;  %5248 = vmatprep.subr.bf16.mxu0 %v7450_v28 }
 0x710   : > { %6468 = vmatprep.subr.bf16.mxu1 %v7451_v32 }
 0x712   : > { %5249 = vmatpush1.bf16.msra.mxu0 %v7448_v35 }
 0x713   : > { %6469 = vmatpush3.bf16.msra.mxu1 %v7452_v38  ;;  %5250 = vmatprep.subr.bf16.mxu0 %v7455_v39 }
 0x714   : > { %6470 = vmatprep.subr.bf16.mxu1 %v7456_v40 }
 0x716   : > { %5251 = vmatpush1.bf16.msra.mxu0 %v7453_v41 }
 0x717   : > { %6471 = vmatpush3.bf16.msra.mxu1 %v7457_v42  ;;  %5252 = vmatprep.subr.bf16.mxu0 %v7460_v43 }
 0x718   : > { %6472 = vmatprep.subr.bf16.mxu1 %v7461_v44 }
 0x71a   : > { %5253 = vmatpush1.bf16.msra.mxu0 %v7458_v45 }
 0x71b   : > { %6473 = vmatpush3.bf16.msra.mxu1 %v7462_v46  ;;  %5263 = vmatprep.subr.bf16.mxu0 %v7465_v47 }
 0x71d   : > { %5255 = vmatmul.mubr.bf16.vlgmr.msra.gmra.mrb[12].mxu0 %v8265_v5  ;;  %v7480_v5 = vld [vmem:[#allocation10 + $0x4ac] ss:$28 sps:$4 sm:$0xff]  }
 0x71e   : > { %5377 = vmatmul.mubr.bf16.vlgmr.msra.gmra.mrb[28].mxu1 %v8276_v36  ;;  %5264 = vmatpush1.bf16.msra.mxu0 %v7463_v48 }
 0x71f   : > { %5295 = vmatprep.mubr.bf16.mxu0 %v8278_v37  ;;  %5265 = vmatprep.subr.bf16.mxu0 %v7468_v50  ;;  %v7481_v37 = vld [vmem:[#allocation10 + $0x4e0] ss:$28 sps:$4 sm:$0xff]  }
 0x722   : > { %5266 = vmatpush1.bf16.msra.mxu0 %v7466_v51 }
 0x723   : > { %5267 = vmatprep.subr.bf16.mxu0 %v7471_v52 }
 0x726   : > { %5268 = vmatpush1.bf16.msra.mxu0 %v7469_v53 }
 0x727   : > { %5269 = vmatprep.subr.bf16.mxu0 %v7474_v1 }
 0x72a   : > { %5270 = vmatpush1.bf16.msra.mxu0 %v7472_v54 }
 0x72b   : > { %5271 = vmatprep.subr.bf16.mxu0 %v7477_v55 }
 0x72e   : > { %5272 = vmatpush1.bf16.msra.mxu0 %v7475_v56 }
 0x72f   : > { %5273 = vmatprep.subr.bf16.mxu0 %v7480_v5 }
 0x732   : > { %5274 = vmatpush1.bf16.msra.mxu0 %v7478_v24 }
 0x733   : > { %5275 = vmatprep.subr.bf16.mxu0 %v7483_v58 }
 0x736   : > { %5276 = vmatpush1.bf16.msra.mxu0 %v7481_v37 }
 0x737   : > { %5277 = vmatprep.subr.bf16.mxu0 %v7486_v59 }
 0x73a   : > { %5278 = vmatpush1.bf16.msra.mxu0 %v7484_v60 }
 0x73b   : > { %5279 = vmatprep.subr.bf16.mxu0 %v7489_v61 }
 0x73e   : > { %5280 = vmatpush1.bf16.msra.mxu0 %v7487_v62 }
 0x73f   : > { %5281 = vmatprep.subr.bf16.mxu0 %v7492_v63 }
 0x742   : > { %5282 = vmatpush1.bf16.msra.mxu0 %v7490_v0 }
 0x743   : > { %5283 = vmatprep.subr.bf16.mxu0 %v7495_v2 }
 0x746   : > { %5284 = vmatpush1.bf16.msra.mxu0 %v7493_v4 }
 0x747   : > { %5285 = vmatprep.subr.bf16.mxu0 %v7498_v6 }
 0x74a   : > { %5286 = vmatpush1.bf16.msra.mxu0 %v7496_v7 }
 0x74b   : > { %5287 = vmatprep.subr.bf16.mxu0 %v7501_v8 }
 0x74e   : > { %5288 = vmatpush1.bf16.msra.mxu0 %v7499_v9 }
 0x74f   : > { %5289 = vmatprep.subr.bf16.mxu0 %v7504_v10 }
 0x752   : > { %5290 = vmatpush1.bf16.msra.mxu0 %v7502_v11 }
 0x753   : > { %5291 = vmatprep.subr.bf16.mxu0 %v7507_v12 }
 0x756   : > { %5292 = vmatpush1.bf16.msra.mxu0 %v7505_v13 }
 0x757   : > { %5293 = vmatprep.subr.bf16.mxu0 %v7510_v14 }
 0x75a   : > { %5294 = vmatpush1.bf16.msra.mxu0 %v7508_v15 }
 0x75d   : > { %5296 = vmatmul.mubr.bf16.vlgmr.msra.gmra.mrb[12].mxu0 %v8276_v36 }
 0x7b0   : > { %v5133_v22 = vpop.f32.mrb[8].mxu0  ;;  %v5215_v23 = vpop.f32.mrb[20].mxu1 }
 0x7b1   : > { %v8305_v36 = vadd.f32 %v5133_v22, %v3874_v18  ;;  %v8307_v25 = vadd.f32 %v5215_v23, %v3882_v19  ;;  %v5135_v49 = vpop.f32.mrb[9].mxu0  ;;  %v5217_v26 = vpop.f32.mrb[21].mxu1  ;;  %v7571_v22 = vld [vmem:[%s8117_s19] sm:$0xff] }
 0x7b2   : > { %v8309_v27 = vadd.f32 %v5135_v49, %v3878_v20  ;;  %v5137_v31 = vpop.f32.mrb[10].mxu0  ;;  %v5219_v28 = vpop.f32.mrb[22].mxu1  ;;  %v8313_v33 = vadd.f32 %v5217_v26, %v3886_v21 }
 0x7b3   : > { %v6400_v16 = vmul.f32 -1.442695, %v8305_v36  ;;  %v5458_v32 = vand.u32 2147483647, %v8305_v36  ;;  %v5138_v35 = vpop.f32.mrb[11].mxu0  ;;  %v5220_v39 = vpop.f32.mrb[23].mxu1  ;;  %v5543_v23 = vmul.f32 %v7571_v22, %v8305_v36 }
 0x7b4   : > { %v6402_v34 = vmul.f32 -1.442695, %v8307_v25  ;;  %v5460_v38 = vand.u32 2147483647, %v8307_v25  ;;  %v6401_v41 = vmul.f32 -1.442695, %v8309_v27 }
 0x7b5   : > { %7515 = vpow2.f32 %v6400_v16  ;;  %v5465_v40 = vsub.f32 0.0, %v5458_v32  ;;  %v5459_v43 = vand.u32 2147483647, %v8309_v27  ;;  %v6403_v45 = vmul.f32 -1.442695, %v8313_v33  ;;  %v7572_v32 = vld [vmem:[%s8117_s19 + $0x8] sm:$0xff] }
 0x7b6   : > { %7517 = vpow2.f32 %v6402_v34  ;;  %v5467_v42 = vsub.f32 0.0, %v5460_v38  ;;  %v5461_v48 = vand.u32 2147483647, %v8313_v33  ;;  %v5451_v10 = vmax.f32 %v8305_v36, 0.0 }
 0x7b7   : > { %v5472_v44 = vmul.f32 1.442695, %v5465_v40  ;;  %7519 = vpow2.f32 %v6401_v41  ;;  %v5466_v47 = vsub.f32 0.0, %v5459_v43  ;;  %v5453_v49 = vmax.f32 %v8307_v25, 0.0 }
 0x7b8   : > { %v5476_v46 = vmul.f32 1.442695, %v5467_v42  ;;  %v5468_v51 = vsub.f32 0.0, %v5461_v48  ;;  %v5452_v26 = vmax.f32 %v8309_v27, 0.0  ;;  %v5544_v35 = vmul.f32 %v7572_v32, %v8309_v27  ;;  %v7573_v42 = vld [vmem:[%s8117_s19 + $0x10] sm:$0xff] }
 0x7b9   : > { %7521 = vpow2.f32 %v5472_v44  ;;  %v5474_v50 = vmul.f32 1.442695, %v5466_v47  ;;  %v5454_v34 = vmax.f32 %v8313_v33, 0.0  ;;  %v5545_v36 = vmul.f32 %v7573_v42, %v8307_v25 }
 0x7ba   : > { %7523 = vpow2.f32 %v5476_v46  ;;  %v5478_v52 = vmul.f32 1.442695, %v5468_v51  ;;  %v7574_v46 = vld [vmem:[%s8117_s19 + $0x18] sm:$0xff]  ;;  %v3897_v27 = vsub.s32 6, %v8165_v30 }
 0x7bb   : > { %7525 = vpow2.f32 %v6403_v45  ;;  %v5546_v47 = vmul.f32 %v7574_v46, %v8313_v33 }
 0x7bc   : > { %7527 = vpow2.f32 %v5474_v50 }
 0x7bd   : > { %7529 = vpow2.f32 %v5478_v52 }
 0x7bf   : > { %v7516_v53 = vpop.eup %7515 }
 0x7c0   : > { %v7518_v1 = vpop.eup %7517  ;;  %v5405_v54 = vadd.f32 1.0, %v7516_v53  ;;  %v3898_v53 = vrot.slane %v8295_v17, %v3897_v27  ;;  %v7576_v27 = vld [vmem:[%s8117_s19 + $0x30] sm:$0xff] }
 0x7c1   : > { %v7520_v55 = vpop.eup %7519  ;;  %v5407_v56 = vadd.f32 1.0, %v7518_v1 }
 0x7c2   : > { %7531 = vrcp.f32 %v5405_v54  ;;  %v5406_v5 = vadd.f32 1.0, %v7520_v55 }
 0x7c3   : > { %v7522_v24 = vpop.eup %7521  ;;  %7533 = vrcp.f32 %v5407_v56 }
 0x7c4   : > { %v7524_v58 = vpop.eup %7523  ;;  %v5486_v37 = vadd.f32 1.0, %v7522_v24  ;;  %7535 = vrcp.f32 %v5406_v5 }
 0x7c5   : > { %v7526_v59 = vpop.eup %7525  ;;  %v5488_v60 = vadd.f32 1.0, %v7524_v58 }
 0x7c6   : > { %v7528_v61 = vpop.eup %7527  ;;  %7537 = vlog2.f32 %v5486_v37  ;;  %v5408_v62 = vadd.f32 1.0, %v7526_v59 }
 0x7c7   : > { %7539 = vlog2.f32 %v5488_v60  ;;  %v5487_v63 = vadd.f32 1.0, %v7528_v61  ;;  %v7530_v0 = vpop.eup %7529 }
 0x7c8   : > { %7541 = vrcp.f32 %v5408_v62  ;;  %v5489_v2 = vadd.f32 1.0, %v7530_v0  ;;  %v3889_v62 = vsub.s32 4, %v8165_v30 }
 0x7c9   : > { %7543 = vlog2.f32 %v5487_v63  ;;  %v3893_v63 = vsub.s32 5, %v8165_v30 }
 0x7ca   : > { %7545 = vlog2.f32 %v5489_v2  ;;  %v3890_v2 = vrot.slane %v8295_v17, %v3889_v62 }
 0x7cc   : > { %v7532_v4 = vpop.eup %7531 }
 0x7cd   : > { %v7534_v6 = vpop.eup %7533  ;;  %5426 = vst [vmem:[%s8325_s24] sm:$0xff] %v7532_v4  ;;  %v3894_v4 = vrot.slane %v8295_v17, %v3893_v63 }
 0x7ce   : > { %v7536_v7 = vpop.eup %7535  ;;  %5428 = vst [vmem:[%s8325_s24 + $0x10] sm:$0xff] %v7534_v6 }
 0x7cf   : > { %5427 = vst [vmem:[%s8325_s24 + $0x8] sm:$0xff] %v7536_v7 }
 0x7d0   : > { %v7538_v8 = vpop.eup %7537 }
 0x7d1   : > { %v7540_v9 = vpop.eup %7539  ;;  %v5494_v11 = vmul.f32 0.6931472, %v7538_v8  ;;  %v6452_v12 = vpop.f32.mrb[24].mxu1 }
 0x7d2   : > { %v7542_v13 = vpop.eup %7541  ;;  %v5498_v14 = vmul.f32 0.6931472, %v7540_v9  ;;  %v6453_v15 = vpop.f32.mrb[25].mxu1 }
 0x7d3   : > { %v7544_v18 = vpop.eup %7543  ;;  %v5507_v19 = vadd.f32 %v5494_v11, %v5451_v10  ;;  %v6454_v20 = vadd.f32 %v6453_v15, %v6452_v12  ;;  %v6455_v21 = vpop.f32.mrb[26].mxu1  ;;  %5429 = vst [vmem:[%s8325_s24 + $0x18] sm:$0xff] %v7542_v13 }
 0x7d4   : > { %v5496_v31 = vmul.f32 0.6931472, %v7544_v18  ;;  %v6456_v28 = vpop.f32.mrb[27].mxu1  ;;  %v7546_v16 = vpop.eup %7545  ;;  %v5509_v39 = vadd.f32 %v5498_v14, %v5453_v49 }
 0x7d5   : > { %v5550_v38 = vsub.f32 %v5543_v23, %v5507_v19  ;;  %v5500_v41 = vmul.f32 0.6931472, %v7546_v16  ;;  %v5339_v55 = vadd.f32 %v6454_v20, %v3898_v53 }
 0x7d6   : > { %v5508_v40 = vadd.f32 %v5496_v31, %v5452_v26  ;;  %v5552_v45 = vsub.f32 %v5545_v36, %v5509_v39 }
 0x7d7   : > { %v5510_v44 = vadd.f32 %v5500_v41, %v5454_v34  ;;  %v5515_v34 = vand.u32 127, %v880_v29  ;;  %v7575_v29 = vld [vmem:[%s8117_s19 + $0x20] sm:$0xff] }
 0x7d8   : > { %v5551_v43 = vsub.f32 %v5544_v35, %v5508_v40 }
 0x7d9   : > { %v5553_v50 = vsub.f32 %v5546_v47, %v5510_v44  ;;  %v5521_v41 = vadd.s32 768, %v5515_v34 }
 0x7da   : > { %v5564_v48 = vadd.f32 %v5551_v43, %v5550_v38 }
 0x7db   : > { %vm5528_vm1 = vcmp.lt.s32.totalorder %v5521_v41, 784 }
 0x7dc   : > { %v5565_v51 = vadd.f32 %v5564_v48, %v5552_v45 }
 0x7de   : > { %v8343_v52 = vadd.f32 %v5565_v51, %v5553_v50 }
 0x7f1   : > { %v6474_v1 = vpop.f32.mrb[28].mxu1 }
 0x7f2   : > { %v6475_v54 = vpop.f32.mrb[29].mxu1 }
 0x7f3   : > { %v6476_v25 = vadd.f32 %v6475_v54, %v6474_v1  ;;  %v6477_v56 = vpop.f32.mrb[30].mxu1  ;;  %v7577_v54 = vld [vmem:[%s8117_s19 + $0x28] sm:$0xff] }
 0x7f4   : > { %v6478_v5 = vpop.f32.mrb[31].mxu1 }
 0x7f5   : > { %v8347_v24 = vadd.f32 %v6476_v25, %v5339_v55  ;;  %v7840_v5 = vmov 0.0  }
 0x7f7   : > { %v6406_v33 = vmul.f32 -1.442695, %v8347_v24  ;;  %v5464_v60 = vand.u32 2147483647, %v8347_v24  ;;  %v5457_v42 = vmax.f32 %v8347_v24, 0.0  ;;  %v5549_v53 = vmul.f32 %v7576_v27, %v8347_v24 }
 0x7f9   : > { %7547 = vpow2.f32 %v6406_v33  ;;  %v5471_v61 = vsub.f32 0.0, %v5464_v60  ;;  %v6407_v33 = vsel %vm5528_vm1, 1.0, %v7840_v5 }
 0x7fb   : > { %v5484_v0 = vmul.f32 1.442695, %v5471_v61 }
 0x803   : > { %v7548_v58 = vpop.eup %7547 }
 0x804   : > { %v5411_v37 = vadd.f32 1.0, %v7548_v58 }
 0x806   : > { %7549 = vrcp.f32 %v5411_v37 }
 0x807   : > { %7551 = vpow2.f32 %v5484_v0 }
 0x810   : > { %v7550_v59 = vpop.eup %7549 }
 0x811   : > { %5432 = vst [vmem:[%s8325_s24 + $0x30] sm:$0xff] %v7550_v59  ;;  %v7552_v21 = vpop.eup %7551 }
 0x812   : > { %v5492_v17 = vadd.f32 1.0, %v7552_v21 }
 0x830   : > { %v5297_v6 = vpop.f32.mrb[12].mxu0 }
 0x831   : > { %v6490_v7 = vadd.f32 %v5297_v6, %v3890_v2  ;;  %v5299_v8 = vpop.f32.mrb[13].mxu0 }
 0x832   : > { %v6491_v9 = vadd.f32 %v5299_v8, %v3894_v4  ;;  %v5301_v10 = vpop.f32.mrb[14].mxu0 }
 0x833   : > { %v6404_v11 = vmul.f32 -1.442695, %v6490_v7  ;;  %v5462_v12 = vand.u32 2147483647, %v6490_v7  ;;  %v5302_v13 = vpop.f32.mrb[15].mxu0  ;;  %v5455_v44 = vmax.f32 %v6490_v7, 0.0  ;;  %v5547_v50 = vmul.f32 %v7575_v29, %v6490_v7 }
 0x834   : > { %v6405_v14 = vmul.f32 -1.442695, %v6491_v9  ;;  %v5463_v15 = vand.u32 2147483647, %v6491_v9  ;;  %v5456_v47 = vmax.f32 %v6491_v9, 0.0  ;;  %v5548_v55 = vmul.f32 %v7577_v54, %v6491_v9 }
 0x835   : > { %7553 = vpow2.f32 %v6404_v11  ;;  %v5469_v18 = vsub.f32 0.0, %v5462_v12 }
 0x836   : > { %7555 = vpow2.f32 %v6405_v14  ;;  %v5470_v30 = vsub.f32 0.0, %v5463_v15 }
 0x837   : > { %v5480_v19 = vmul.f32 1.442695, %v5469_v18 }
 0x838   : > { %v5482_v20 = vmul.f32 1.442695, %v5470_v30 }
 0x839   : > { %7557 = vpow2.f32 %v5480_v19 }
 0x83a   : > { %7559 = vpow2.f32 %v5482_v20 }
 0x83b   : > { %7561 = vlog2.f32 %v5492_v17 }
 0x83f   : > { %v7554_v22 = vpop.eup %7553 }
 0x840   : > { %v7556_v23 = vpop.eup %7555  ;;  %v5409_v49 = vadd.f32 1.0, %v7554_v22 }
 0x841   : > { %v5410_v26 = vadd.f32 1.0, %v7556_v23 }
 0x842   : > { %7563 = vrcp.f32 %v5409_v49 }
 0x843   : > { %v7558_v31 = vpop.eup %7557  ;;  %7565 = vrcp.f32 %v5410_v26 }
 0x844   : > { %v7560_v28 = vpop.eup %7559  ;;  %v5490_v16 = vadd.f32 1.0, %v7558_v31 }
 0x845   : > { %v5491_v32 = vadd.f32 1.0, %v7560_v28  ;;  %v7562_v35 = vpop.eup %7561 }
 0x846   : > { %7567 = vlog2.f32 %v5490_v16  ;;  %v5506_v40 = vmul.f32 0.6931472, %v7562_v35 }
 0x847   : > { %7569 = vlog2.f32 %v5491_v32 }
 0x848   : > { %v5513_v46 = vadd.f32 %v5506_v40, %v5457_v42 }
 0x84a   : > { %v5556_v56 = vsub.f32 %v5549_v53, %v5513_v46 }
 0x84c   : > { %v7564_v38 = vpop.eup %7563  ;;  %v5563_v59 = vmul.f32 %v6407_v33, %v5556_v56 }
 0x84d   : > { %v7566_v39 = vpop.eup %7565  ;;  %5430 = vst [vmem:[%s8325_s24 + $0x20] sm:$0xff] %v7564_v38 }
 0x84e   : > { %5431 = vst [vmem:[%s8325_s24 + $0x28] sm:$0xff] %v7566_v39 }
 0x850   : > { %v7568_v36 = vpop.eup %7567 }
 0x851   : > { %v7570_v43 = vpop.eup %7569  ;;  %v5502_v45 = vmul.f32 0.6931472, %v7568_v36 }
 0x852   : > { %v5504_v48 = vmul.f32 0.6931472, %v7570_v43 }
 0x853   : > { %v5511_v51 = vadd.f32 %v5502_v45, %v5455_v44 }
 0x854   : > { %v5512_v1 = vadd.f32 %v5504_v48, %v5456_v47 }
 0x855   : > { %v5554_v25 = vsub.f32 %v5547_v50, %v5511_v51 }
 0x856   : > { %v5555_v58 = vsub.f32 %v5548_v55, %v5512_v1 }
 0x857   : > { %v5567_v37 = vadd.f32 %v8343_v52, %v5554_v25 }
 0x859   : > { %v5568_v60 = vadd.f32 %v5567_v37, %v5555_v58 }
 0x85b   : > { %v5569_v61 = vadd.f32 %v5568_v60, %v5563_v59 }
 0x85d   : > { %5570 = vadd.xlane.f32.xlu0 %v5569_v61 }
 0x873   : > { %5573 = vrot.lane.b32.xlu0 %v8219_v57, %s7839_s18 }
 0x874   : > { %7731 = shalt.err (!%p7728_p1)
}
 0x875   : > { %s7732_s18 = scalar_lea.hbm %s8372_s21, 896  ;;  %s7736_s24 = scalar_lea.hbm %s8500_s20, 1792 }
 0x876   : > { %p7733_p0 = scmp.ne.s32.totalorder %s8372_s21, %s7732_s18  ;;  %p7737_p9 = scmp.lt.u32.totalorder %s8372_s21, %s8500_s20 }
 0x877   : > { %p7738_p12 = scmp.lt.u32.totalorder %s7736_s24, %s7732_s18  ;;  %p7740_p2 = scmp.lt.u32.totalorder %s7732_s18, %s8372_s21 }
 0x878   : > { %p7734_p6 = pnand %p7733_p0, %p8501_p3 }
 0x879   : > { %p7739_p10 = por %p7738_p12, %p7737_p9 }
 0x87a   : > { %p7735_p5 = pneg %p7734_p6 }
 0x87b   : > { %p7741_p4 = por %p7740_p2, %p7739_p10 }
 0x87d   : > { %p7742_p7 = pnand %p7741_p4, %p7735_p5 }
 0x87f   : > { %7745 = shalt.err (!%p7742_p7)
}
 0x880   : > { %6555 = dma.vmem_to_hbm [thread:$0]  (%p8501_p3), %s5604_s30, 896, %s8372_s21, %s5584_s23   ;;  %v5449_v52 = vpop.xlane.xlu1 %5448  ;;  %vm5577_vm2 = vcmask 392192   ;;  %vm5579_vm3 = vcmask 400384   ;;  %vm5581_vm4 = vcmask 408576  }
 0x881   : > { %s5795_s27 = sshll.u32 %s8322_s29, 3  ;;  %s6410_s17 = sshll.u32 %s7949_s25, 7  ;;  %v5450_v24 = vmul.f32 0.5, %v5449_v52 }
 0x882   : > { %s624_s15 = scalar_lea.vmem [#allocation12], %s5795_s27  ;;  %s8502_s30 = sld [smem:[#allocation30_spill]] }
 0x883   : > { %s5616_s0 = sshll.u32 %s624_s15, 4  ;;  %s5589_s25 = scalar_lea.sflag [#allocation13], %s8322_s29  ;;  %s8401_s0 = int_to_ptr.vmem [resolvable:$true] %s5616_s0 }
 0x884   : > { %s7746_s23 = scalar_lea.vmem %s8401_s0, 128  ;;  %s7842_s11 = smov [#allocation12]  }
 0x885   : > { %p7747_p8 = scmp.ne.s32.totalorder %s8401_s0, %s7746_s23  ;;  %s7750_s26 = sshll.u32 %s7842_s11, 4  ;;  %s7751_s26 = int_to_ptr.vmem [resolvable:$false] %s7750_s26 }
 0x886   : > { %s7752_s24 = scalar_lea.vmem %s7751_s26, 256  ;;  %p7753_p1 = scmp.lt.s32.totalorder %s8401_s0, %s7751_s26 }
 0x887   : > { %p7748_p11 = pnand %p7747_p8, %p8501_p3  ;;  %p7754_p0 = scmp.lt.s32.totalorder %s7752_s24, %s7746_s23 }
 0x888   : > { %s8399_s21 = scalar_lea.hbm %s8502_s30, %s6410_s17 }
 0x889   : > { %p7749_p13 = pneg %p7748_p11  ;;  %p7755_p6 = por %p7754_p0, %p7753_p1 }
 0x88b   : > { %p7756_p5 = pnand %p7755_p6, %p7749_p13 }
 0x8ea   : > { %v5571_v57 = vpop.xlane.xlu0 %5570 }
 0x8ee   : > { %v5574_v62 = vpop.permute.xlu0 %5573 }
 0x8ef   : > { %v5576_v63 = vsel %vm3048_vm0, %v8231_v3, %v5574_v62 }
 0x8f0   : > { %v5578_v0 = vsel %vm5577_vm2, %v5576_v63, %v5450_v24 }
 0x8f1   : > { %v5580_v2 = vsel %vm5579_vm3, %v5578_v0, %v5571_v57 }
 0x8f2   : > { %5582 = vst.msk [vmem:[%s624_s15] sm:$0xff] %vm5581_vm4, %v5580_v2 }
 0x8f3   : > { %7759 = shalt.err (!%p7756_p5)
}
 0x8f4   : > { %s7760_s29 = scalar_lea.hbm %s8399_s21, 128  ;;  %s7764_s27 = scalar_lea.hbm %s8502_s30, 256 }
 0x8f5   : > { %p7761_p9 = scmp.ne.s32.totalorder %s8399_s21, %s7760_s29  ;;  %p7765_p2 = scmp.lt.u32.totalorder %s8399_s21, %s8502_s30 }
 0x8f6   : > { %p7766_p4 = scmp.lt.u32.totalorder %s7764_s27, %s7760_s29  ;;  %p7768_p8 = scmp.lt.u32.totalorder %s7760_s29, %s8399_s21 }
 0x8f7   : > { %p7762_p12 = pnand %p7761_p9, %p8501_p3 }
 0x8f8   : > { %p7767_p7 = por %p7766_p4, %p7765_p2 }
 0x8f9   : > { %p7763_p10 = pneg %p7762_p12 }
 0x8fa   : > { %p7769_p11 = por %p7768_p8, %p7767_p7 }
 0x8fc   : > { %p7770_p13 = pnand %p7769_p11, %p7763_p10 }
 0x8fe   : > { %7773 = shalt.err (!%p7770_p13)
}
 0x8ff   : > { %6556 = dma.vmem_to_hbm [thread:$0]  (%p8501_p3), %s8401_s0, 128, %s8399_s21, %s5589_s25  }
 0x900 PF: > { %s8503_s16 = sld [smem:[#allocation21_spill]]  ;;  %s8504_s18 = sld [smem:[#allocation19_spill]] }
 0x901   : > { %s8505_s23 = sld [smem:[#allocation25_spill]] }
 0x906   : > { %p6592_p1 = scmp.ge.s32.totalorder %s8503_s16, 2  ;;  %s5628_s11 = sand.u32 1, %s8504_s18  }
 0x907   : > { %p8506_p0 = scmp.ne.s32.totalorder %s8505_s23, 0  ;;  %s5629_s26 = scalar_lea.sflag [#allocation4], %s5628_s11 }
 0x909   : > { %p6576_p6 = pnand %p6592_p1, %p8506_p0 }
 0x90b   : > { %7803 = dma.done.wait (!%p6576_p6), %s5629_s26, 896  }
 0x90c   : > { %7805 = vsyncadd (!%p6576_p6), %s5629_s26, 4294966400  ;;  %s5638_s24 = scalar_lea.sflag [#allocation13], %s5628_s11 }
 0x90d   : > { %7807 = dma.done.wait (!%p6576_p6), %s5638_s24, 128  }
 0x90e   : > { %7809 = vsyncadd (!%p6576_p6), %s5638_s24, 4294967168  ;;  %s8507_s24 = sld [smem:[#allocation22_spill]]  ;;  %s8508_s4 = sld [smem:[#allocation20_spill]] }
 0x90f   : > { %s8509_s23 = sld [smem:[#allocation23_spill]]  ;;  %s8510_s21 = smov %s7816_s22 }
 0x914   : > { %p33_p3 = scmp.ge.s32.totalorder %s8507_s24, 4   ;;  %s8511_s22 = smov %s8508_s4 }
 0x916   :  { %35 = sbr.rel (!%p33_p3) target bundleno = 14 (0xe), region = 159 }
 0x91d   :  { %5643 = vsyncpa [#allocation3], 1 }
 0x91e   :  { %5645 = vsyncpa [#allocation3 + $0x1], 1 }
 0x91f   :  { %5646 = vsyncpa [#allocation6], 1 }
 0x920   :  { %5647 = vsyncpa [#allocation9], 1 }
 0x921   :  { %5648 = vsyncpa [#allocation4], 1 }
 0x922   :  { %5650 = vsyncpa [#allocation4 + $0x1], 1 }
 0x923   :  { %5651 = vsyncpa [#allocation13], 1 }
 0x924   :  { %5653 = vsyncpa [#allocation13 + $0x1], 1 }

</bundles_post_ra>
